<compile_context>
chip_gen: v7x
topology: tpu7x:2x2x1
jax: 0.10.0
libtpu: 0.0.40
codegen_flags: <defaults>
</compile_context>

<pallas_src>
import jax
import jax.numpy as jnp
from jax.experimental import pallas as pl
from jax.experimental.pallas import tpu as pltpu


LANE = 128  # vreg lane width; all GEMM N (and conv K) dims are padded to this.
_VMEM = pl.BlockSpec(memory_space=pltpu.MemorySpace.VMEM)


def _round_up(x, m):
    return (x + m - 1) // m * m


# ---------------------------------------------------------------------------
# Pallas kernels
# ---------------------------------------------------------------------------
def _conv_relu_pool_kernel(p00_ref, p01_ref, p10_ref, p11_ref, w_ref, b_ref, o_ref):
    """Fused conv-as-GEMM + bias + ReLU + 2x2 max pool.

    p??: (G, Kp) im2col patches for the 4 corners of each 2x2 pool window.
    w:   (Kp, 128) zero-padded flattened conv weight.
    b:   (1, 128)  zero-padded bias.
    o:   (G, 128)  pooled, lane-dense output (padded channels stay 0 after ReLU).
    """
    w = w_ref[...]
    b = b_ref[...]

    def corner(p_ref):
        acc = jnp.dot(p_ref[...], w, preferred_element_type=jnp.float32)
        return jnp.maximum(acc + b, 0.0)

    o_ref[...] = jnp.maximum(
        jnp.maximum(corner(p00_ref), corner(p01_ref)),
        jnp.maximum(corner(p10_ref), corner(p11_ref)),
    ).astype(o_ref.dtype)


def _fc_stack_kernel(x_ref, w1_ref, b1_ref, w2_ref, b2_ref, w3_ref, b3_ref, o_ref):
    """Fused fc1+ReLU -> fc2+ReLU -> fc3. All N dims padded to 128 lanes."""
    h = jnp.dot(x_ref[...], w1_ref[...], preferred_element_type=jnp.float32) + b1_ref[...]
    h = jnp.maximum(h, 0.0)
    h = jnp.dot(h, w2_ref[...], preferred_element_type=jnp.float32) + b2_ref[...]
    h = jnp.maximum(h, 0.0)
    out = jnp.dot(h, w3_ref[...], preferred_element_type=jnp.float32) + b3_ref[...]
    o_ref[...] = out.astype(o_ref.dtype)


# ---------------------------------------------------------------------------
# Layer wrappers
# ---------------------------------------------------------------------------
def conv_relu_pool(x_nhwc, w2d, b2d, kh, kw):
    """Valid conv (stride 1) + ReLU + 2x2/2 max pool, channels-last.

    x_nhwc: (B, H, W, C) real (unpadded) channels.
    w2d:    (Kp, 128) prepared weight, Kp = round_up(kh*kw*C, 128).
    b2d:    (1, 128)  prepared bias.
    returns (B, OH//2, OW//2, 128) with channels >= OC equal to 0.
    """
    B, H, W, C = x_nhwc.shape
    OH, OW = H - kh + 1, W - kw + 1
    assert OH % 2 == 0 and OW % 2 == 0, "pool needs even conv output dims"
    K = kh * kw * C
    Kp = w2d.shape[0]

    # im2col patch gather + K zero-pad: plain-JAX glue, fused by XLA.
    cols = [x_nhwc[:, i:i + OH, j:j + OW, :] for i in range(kh) for j in range(kw)]
    patches = jnp.concatenate(cols, axis=-1)                       # (B, OH, OW, K)
    patches = jnp.pad(patches, ((0, 0), (0, 0), (0, 0), (0, Kp - K)))

    OH2, OW2 = OH // 2, OW // 2
    G = B * OH2 * OW2
    corners = [patches[:, p::2, q::2, :].reshape(G, Kp)
               for p in (0, 1) for q in (0, 1)]

    out = pl.pallas_call(
        _conv_relu_pool_kernel,
        out_shape=jax.ShapeDtypeStruct((G, LANE), jnp.float32),
        in_specs=[_VMEM] * 6,
        out_specs=_VMEM,
    )(*corners, w2d, b2d)
    return out.reshape(B, OH2, OW2, LANE)


def fc_stack(x, w1, b1, w2, b2, w3, b3, num_classes):
    """x: (B, 400). Returns (B, num_classes) after fc1/relu/fc2/relu/fc3."""
    B = x.shape[0]
    out = pl.pallas_call(
        _fc_stack_kernel,
        out_shape=jax.ShapeDtypeStruct((B, LANE), jnp.float32),
        in_specs=[_VMEM] * 7,
        out_specs=_VMEM,
    )(x, w1, b1, w2, b2, w3, b3)
    return out[:, :num_classes]


# ---------------------------------------------------------------------------
# Params: PyTorch-layout init + one-time prep (pad / transpose / permute)
# ---------------------------------------------------------------------------
def init_lenet_params(key, num_classes=10):
    ks = jax.random.split(key, 10)
    scale = 0.1
    return {
        "conv1_w": scale * jax.random.normal(ks[0], (6, 3, 5, 5), jnp.float32),
        "conv1_b": scale * jax.random.normal(ks[1], (6,), jnp.float32),
        "conv2_w": scale * jax.random.normal(ks[2], (16, 6, 5, 5), jnp.float32),
        "conv2_b": scale * jax.random.normal(ks[3], (16,), jnp.float32),
        "fc1_w": scale * jax.random.normal(ks[4], (120, 16 * 5 * 5), jnp.float32),
        "fc1_b": scale * jax.random.normal(ks[5], (120,), jnp.float32),
        "fc2_w": scale * jax.random.normal(ks[6], (84, 120), jnp.float32),
        "fc2_b": scale * jax.random.normal(ks[7], (84,), jnp.float32),
        "fc3_w": scale * jax.random.normal(ks[8], (num_classes, 84), jnp.float32),
        "fc3_b": scale * jax.random.normal(ks[9], (num_classes,), jnp.float32),
    }


def prepare_lenet_params(p, num_classes=10):
    """One-time (outside jit) conversion of PyTorch-layout params to kernel layout."""
    def conv_wb(w, b):
        OC, IC, KH, KW = w.shape
        K = KH * KW * IC
        Kp = _round_up(K, LANE)
        # column order (kh, kw, c) to match the NHWC im2col above
        w2d = w.transpose(2, 3, 1, 0).reshape(K, OC)
        w2d = jnp.pad(w2d, ((0, Kp - K), (0, LANE - OC)))
        b2d = jnp.pad(b, (0, LANE - OC)).reshape(1, LANE)
        return w2d, b2d

    c1w, c1b = conv_wb(p["conv1_w"], p["conv1_b"])
    c2w, c2b = conv_wb(p["conv2_w"], p["conv2_b"])

    # fc1: PyTorch flattens (B,16,5,5) in (C,H,W) order; our activation is flattened
    # in (H,W,C) order -> permute weight columns once to preserve exact semantics.
    f1 = p["fc1_w"].reshape(120, 16, 5, 5).transpose(2, 3, 1, 0).reshape(400, 120)
    f1 = jnp.pad(f1, ((0, 0), (0, LANE - 120)))
    b1 = jnp.pad(p["fc1_b"], (0, LANE - 120)).reshape(1, LANE)

    f2 = jnp.pad(p["fc2_w"].T, ((0, LANE - 120), (0, LANE - 84)))
    b2 = jnp.pad(p["fc2_b"], (0, LANE - 84)).reshape(1, LANE)

    f3 = jnp.pad(p["fc3_w"].T, ((0, LANE - 84), (0, LANE - num_classes)))
    b3 = jnp.pad(p["fc3_b"], (0, LANE - num_classes)).reshape(1, LANE)

    return {
        "conv1_w": c1w, "conv1_b": c1b,
        "conv2_w": c2w, "conv2_b": c2b,
        "fc1_w": f1, "fc1_b": b1,
        "fc2_w": f2, "fc2_b": b2,
        "fc3_w": f3, "fc3_b": b3,
    }


# ---------------------------------------------------------------------------
# LeNet forward (matches PyTorch LeNet.forward numerics)
# ---------------------------------------------------------------------------
def lenet_forward(params, x_nchw, *, num_classes=10):
    # x: (B, 3, 32, 32) NCHW, matching PyTorch. Convert once to channels-last.
    x = x_nchw.transpose(0, 2, 3, 1)                                  # (B, 32, 32, 3)

    a1 = conv_relu_pool(x, params["conv1_w"], params["conv1_b"], 5, 5)  # (B,14,14,128)
    a1 = a1[:, :, :, :6]                                                # real channels

    a2 = conv_relu_pool(a1, params["conv2_w"], params["conv2_b"], 5, 5)  # (B,5,5,128)
    a2 = a2[:, :, :, :16]

    flat = a2.reshape(a2.shape[0], -1)                                   # (B, 400), (H,W,C) order
    return fc_stack(flat,
                    params["fc1_w"], params["fc1_b"],
                    params["fc2_w"], params["fc2_b"],
                    params["fc3_w"], params["fc3_b"],
                    num_classes)


if __name__ == "__main__":
    key = jax.random.PRNGKey(0)
    pkey, xkey = jax.random.split(key)

    num_classes = 10
    raw_params = init_lenet_params(pkey, num_classes=num_classes)
    params = prepare_lenet_params(raw_params, num_classes=num_classes)

    # LeNet's fc1 (16*5*5) implies 32x32 spatial input (CIFAR); small batch=2.
    x = jax.random.normal(xkey, (2, 3, 32, 32), jnp.float32)

    fwd = jax.jit(lenet_forward, static_argnames=("num_classes",))
    out = jax.block_until_ready(fwd(params, x, num_classes=num_classes))

    assert out.shape == (2, num_classes), out.shape
    assert out.dtype == jnp.float32
    print("KERNEL_OK")
</pallas_src>

<mosaic_0001>
module attributes {stable_mosaic.version = 11 : i64} {
  func.func @_conv_relu_pool_kernel(%arg0: memref<392x128xf32, #tpu.memory_space<vmem>>, %arg1: memref<392x128xf32, #tpu.memory_space<vmem>>, %arg2: memref<392x128xf32, #tpu.memory_space<vmem>>, %arg3: memref<392x128xf32, #tpu.memory_space<vmem>>, %arg4: memref<128x128xf32, #tpu.memory_space<vmem>>, %arg5: memref<1x128xf32, #tpu.memory_space<vmem>>, %arg6: memref<392x128xf32, #tpu.memory_space<vmem>>) attributes {dimension_semantics = [], scalar_prefetch = 0 : i64, scratch_operands = 0 : i64, tpu.core_type = #tpu.core_type<tc>} {
    %c0 = arith.constant 0 : index
    %c0_0 = arith.constant 0 : index
    %0 = vector.load %arg4[%c0, %c0_0] : memref<128x128xf32, #tpu.memory_space<vmem>>, vector<128x128xf32>
    %c0_1 = arith.constant 0 : index
    %c0_2 = arith.constant 0 : index
    %1 = vector.load %arg5[%c0_1, %c0_2] : memref<1x128xf32, #tpu.memory_space<vmem>>, vector<1x128xf32>
    %c0_3 = arith.constant 0 : index
    %c0_4 = arith.constant 0 : index
    %2 = vector.load %arg0[%c0_3, %c0_4] : memref<392x128xf32, #tpu.memory_space<vmem>>, vector<392x128xf32>
    %cst = arith.constant dense<0.000000e+00> : vector<392x128xf32>
    %3 = tpu.matmul %2, %0, %cst {dimension_numbers = #tpu.dot_dimension_numbers<[1], [0], [0], [1], [0, 0, 1, 1], [], []>} : vector<392x128xf32>, vector<128x128xf32>, vector<392x128xf32> -> vector<392x128xf32>
    %4 = vector.broadcast %1 : vector<1x128xf32> to vector<392x128xf32>
    %5 = arith.addf %3, %4 : vector<392x128xf32>
    %cst_5 = arith.constant 0.000000e+00 : f32
    %6 = vector.broadcast %cst_5 : f32 to vector<392x128xf32>
    %7 = arith.maximumf %5, %6 : vector<392x128xf32>
    %c0_6 = arith.constant 0 : index
    %c0_7 = arith.constant 0 : index
    %8 = vector.load %arg1[%c0_6, %c0_7] : memref<392x128xf32, #tpu.memory_space<vmem>>, vector<392x128xf32>
    %cst_8 = arith.constant dense<0.000000e+00> : vector<392x128xf32>
    %9 = tpu.matmul %8, %0, %cst_8 {dimension_numbers = #tpu.dot_dimension_numbers<[1], [0], [0], [1], [0, 0, 1, 1], [], []>} : vector<392x128xf32>, vector<128x128xf32>, vector<392x128xf32> -> vector<392x128xf32>
    %10 = vector.broadcast %1 : vector<1x128xf32> to vector<392x128xf32>
    %11 = arith.addf %9, %10 : vector<392x128xf32>
    %cst_9 = arith.constant 0.000000e+00 : f32
    %12 = vector.broadcast %cst_9 : f32 to vector<392x128xf32>
    %13 = arith.maximumf %11, %12 : vector<392x128xf32>
    %14 = arith.maximumf %7, %13 : vector<392x128xf32>
    %c0_10 = arith.constant 0 : index
    %c0_11 = arith.constant 0 : index
    %15 = vector.load %arg2[%c0_10, %c0_11] : memref<392x128xf32, #tpu.memory_space<vmem>>, vector<392x128xf32>
    %cst_12 = arith.constant dense<0.000000e+00> : vector<392x128xf32>
    %16 = tpu.matmul %15, %0, %cst_12 {dimension_numbers = #tpu.dot_dimension_numbers<[1], [0], [0], [1], [0, 0, 1, 1], [], []>} : vector<392x128xf32>, vector<128x128xf32>, vector<392x128xf32> -> vector<392x128xf32>
    %17 = vector.broadcast %1 : vector<1x128xf32> to vector<392x128xf32>
    %18 = arith.addf %16, %17 : vector<392x128xf32>
    %cst_13 = arith.constant 0.000000e+00 : f32
    %19 = vector.broadcast %cst_13 : f32 to vector<392x128xf32>
    %20 = arith.maximumf %18, %19 : vector<392x128xf32>
    %c0_14 = arith.constant 0 : index
    %c0_15 = arith.constant 0 : index
    %21 = vector.load %arg3[%c0_14, %c0_15] : memref<392x128xf32, #tpu.memory_space<vmem>>, vector<392x128xf32>
    %cst_16 = arith.constant dense<0.000000e+00> : vector<392x128xf32>
    %22 = tpu.matmul %21, %0, %cst_16 {dimension_numbers = #tpu.dot_dimension_numbers<[1], [0], [0], [1], [0, 0, 1, 1], [], []>} : vector<392x128xf32>, vector<128x128xf32>, vector<392x128xf32> -> vector<392x128xf32>
    %23 = vector.broadcast %1 : vector<1x128xf32> to vector<392x128xf32>
    %24 = arith.addf %22, %23 : vector<392x128xf32>
    %cst_17 = arith.constant 0.000000e+00 : f32
    %25 = vector.broadcast %cst_17 : f32 to vector<392x128xf32>
    %26 = arith.maximumf %24, %25 : vector<392x128xf32>
    %27 = arith.maximumf %20, %26 : vector<392x128xf32>
    %28 = arith.maximumf %14, %27 : vector<392x128xf32>
    %c0_18 = arith.constant 0 : index
    %c0_19 = arith.constant 0 : index
    %29 = vector.load %arg6[%c0_18, %c0_19] : memref<392x128xf32, #tpu.memory_space<vmem>>, vector<392x128xf32>
    tpu.vector_store %arg6[%c0_18, %c0_19], %28 {strides = array<i32>} : memref<392x128xf32, #tpu.memory_space<vmem>>, vector<392x128xf32>,
    return
  }
}

module attributes {stable_mosaic.version = 11 : i64} {
  func.func @_conv_relu_pool_kernel(%arg0: memref<50x256xf32, #tpu.memory_space<vmem>>, %arg1: memref<50x256xf32, #tpu.memory_space<vmem>>, %arg2: memref<50x256xf32, #tpu.memory_space<vmem>>, %arg3: memref<50x256xf32, #tpu.memory_space<vmem>>, %arg4: memref<256x128xf32, #tpu.memory_space<vmem>>, %arg5: memref<1x128xf32, #tpu.memory_space<vmem>>, %arg6: memref<50x128xf32, #tpu.memory_space<vmem>>) attributes {dimension_semantics = [], scalar_prefetch = 0 : i64, scratch_operands = 0 : i64, tpu.core_type = #tpu.core_type<tc>} {
    %c0 = arith.constant 0 : index
    %c0_0 = arith.constant 0 : index
    %0 = vector.load %arg4[%c0, %c0_0] : memref<256x128xf32, #tpu.memory_space<vmem>>, vector<256x128xf32>
    %c0_1 = arith.constant 0 : index
    %c0_2 = arith.constant 0 : index
    %1 = vector.load %arg5[%c0_1, %c0_2] : memref<1x128xf32, #tpu.memory_space<vmem>>, vector<1x128xf32>
    %c0_3 = arith.constant 0 : index
    %c0_4 = arith.constant 0 : index
    %2 = vector.load %arg0[%c0_3, %c0_4] : memref<50x256xf32, #tpu.memory_space<vmem>>, vector<50x256xf32>
    %cst = arith.constant dense<0.000000e+00> : vector<50x128xf32>
    %3 = tpu.matmul %2, %0, %cst {dimension_numbers = #tpu.dot_dimension_numbers<[1], [0], [0], [1], [0, 0, 1, 1], [], []>} : vector<50x256xf32>, vector<256x128xf32>, vector<50x128xf32> -> vector<50x128xf32>
    %4 = vector.broadcast %1 : vector<1x128xf32> to vector<50x128xf32>
    %5 = arith.addf %3, %4 : vector<50x128xf32>
    %cst_5 = arith.constant 0.000000e+00 : f32
    %6 = vector.broadcast %cst_5 : f32 to vector<50x128xf32>
    %7 = arith.maximumf %5, %6 : vector<50x128xf32>
    %c0_6 = arith.constant 0 : index
    %c0_7 = arith.constant 0 : index
    %8 = vector.load %arg1[%c0_6, %c0_7] : memref<50x256xf32, #tpu.memory_space<vmem>>, vector<50x256xf32>
    %cst_8 = arith.constant dense<0.000000e+00> : vector<50x128xf32>
    %9 = tpu.matmul %8, %0, %cst_8 {dimension_numbers = #tpu.dot_dimension_numbers<[1], [0], [0], [1], [0, 0, 1, 1], [], []>} : vector<50x256xf32>, vector<256x128xf32>, vector<50x128xf32> -> vector<50x128xf32>
    %10 = vector.broadcast %1 : vector<1x128xf32> to vector<50x128xf32>
    %11 = arith.addf %9, %10 : vector<50x128xf32>
    %cst_9 = arith.constant 0.000000e+00 : f32
    %12 = vector.broadcast %cst_9 : f32 to vector<50x128xf32>
    %13 = arith.maximumf %11, %12 : vector<50x128xf32>
    %14 = arith.maximumf %7, %13 : vector<50x128xf32>
    %c0_10 = arith.constant 0 : index
    %c0_11 = arith.constant 0 : index
    %15 = vector.load %arg2[%c0_10, %c0_11] : memref<50x256xf32, #tpu.memory_space<vmem>>, vector<50x256xf32>
    %cst_12 = arith.constant dense<0.000000e+00> : vector<50x128xf32>
    %16 = tpu.matmul %15, %0, %cst_12 {dimension_numbers = #tpu.dot_dimension_numbers<[1], [0], [0], [1], [0, 0, 1, 1], [], []>} : vector<50x256xf32>, vector<256x128xf32>, vector<50x128xf32> -> vector<50x128xf32>
    %17 = vector.broadcast %1 : vector<1x128xf32> to vector<50x128xf32>
    %18 = arith.addf %16, %17 : vector<50x128xf32>
    %cst_13 = arith.constant 0.000000e+00 : f32
    %19 = vector.broadcast %cst_13 : f32 to vector<50x128xf32>
    %20 = arith.maximumf %18, %19 : vector<50x128xf32>
    %c0_14 = arith.constant 0 : index
    %c0_15 = arith.constant 0 : index
    %21 = vector.load %arg3[%c0_14, %c0_15] : memref<50x256xf32, #tpu.memory_space<vmem>>, vector<50x256xf32>
    %cst_16 = arith.constant dense<0.000000e+00> : vector<50x128xf32>
    %22 = tpu.matmul %21, %0, %cst_16 {dimension_numbers = #tpu.dot_dimension_numbers<[1], [0], [0], [1], [0, 0, 1, 1], [], []>} : vector<50x256xf32>, vector<256x128xf32>, vector<50x128xf32> -> vector<50x128xf32>
    %23 = vector.broadcast %1 : vector<1x128xf32> to vector<50x128xf32>
    %24 = arith.addf %22, %23 : vector<50x128xf32>
    %cst_17 = arith.constant 0.000000e+00 : f32
    %25 = vector.broadcast %cst_17 : f32 to vector<50x128xf32>
    %26 = arith.maximumf %24, %25 : vector<50x128xf32>
    %27 = arith.maximumf %20, %26 : vector<50x128xf32>
    %28 = arith.maximumf %14, %27 : vector<50x128xf32>
    %c0_18 = arith.constant 0 : index
    %c0_19 = arith.constant 0 : index
    %29 = vector.load %arg6[%c0_18, %c0_19] : memref<50x128xf32, #tpu.memory_space<vmem>>, vector<50x128xf32>
    tpu.vector_store %arg6[%c0_18, %c0_19], %28 {strides = array<i32>} : memref<50x128xf32, #tpu.memory_space<vmem>>, vector<50x128xf32>,
    return
  }
}

module attributes {stable_mosaic.version = 11 : i64} {
  func.func @_fc_stack_kernel(%arg0: memref<2x400xf32, #tpu.memory_space<vmem>>, %arg1: memref<400x128xf32, #tpu.memory_space<vmem>>, %arg2: memref<1x128xf32, #tpu.memory_space<vmem>>, %arg3: memref<128x128xf32, #tpu.memory_space<vmem>>, %arg4: memref<1x128xf32, #tpu.memory_space<vmem>>, %arg5: memref<128x128xf32, #tpu.memory_space<vmem>>, %arg6: memref<1x128xf32, #tpu.memory_space<vmem>>, %arg7: memref<2x128xf32, #tpu.memory_space<vmem>>) attributes {dimension_semantics = [], scalar_prefetch = 0 : i64, scratch_operands = 0 : i64, tpu.core_type = #tpu.core_type<tc>} {
    %c0 = arith.constant 0 : index
    %c0_0 = arith.constant 0 : index
    %0 = vector.load %arg0[%c0, %c0_0] : memref<2x400xf32, #tpu.memory_space<vmem>>, vector<2x400xf32>
    %c0_1 = arith.constant 0 : index
    %c0_2 = arith.constant 0 : index
    %1 = vector.load %arg1[%c0_1, %c0_2] : memref<400x128xf32, #tpu.memory_space<vmem>>, vector<400x128xf32>
    %cst = arith.constant dense<0.000000e+00> : vector<2x128xf32>
    %2 = tpu.matmul %0, %1, %cst {dimension_numbers = #tpu.dot_dimension_numbers<[1], [0], [0], [1], [0, 0, 1, 1], [], []>} : vector<2x400xf32>, vector<400x128xf32>, vector<2x128xf32> -> vector<2x128xf32>
    %c0_3 = arith.constant 0 : index
    %c0_4 = arith.constant 0 : index
    %3 = vector.load %arg2[%c0_3, %c0_4] : memref<1x128xf32, #tpu.memory_space<vmem>>, vector<1x128xf32>
    %4 = vector.broadcast %3 : vector<1x128xf32> to vector<2x128xf32>
    %5 = arith.addf %2, %4 : vector<2x128xf32>
    %cst_5 = arith.constant 0.000000e+00 : f32
    %6 = vector.broadcast %cst_5 : f32 to vector<2x128xf32>
    %7 = arith.maximumf %5, %6 : vector<2x128xf32>
    %c0_6 = arith.constant 0 : index
    %c0_7 = arith.constant 0 : index
    %8 = vector.load %arg3[%c0_6, %c0_7] : memref<128x128xf32, #tpu.memory_space<vmem>>, vector<128x128xf32>
    %cst_8 = arith.constant dense<0.000000e+00> : vector<2x128xf32>
    %9 = tpu.matmul %7, %8, %cst_8 {dimension_numbers = #tpu.dot_dimension_numbers<[1], [0], [0], [1], [0, 0, 1, 1], [], []>} : vector<2x128xf32>, vector<128x128xf32>, vector<2x128xf32> -> vector<2x128xf32>
    %c0_9 = arith.constant 0 : index
    %c0_10 = arith.constant 0 : index
    %10 = vector.load %arg4[%c0_9, %c0_10] : memref<1x128xf32, #tpu.memory_space<vmem>>, vector<1x128xf32>
    %11 = vector.broadcast %10 : vector<1x128xf32> to vector<2x128xf32>
    %12 = arith.addf %9, %11 : vector<2x128xf32>
    %cst_11 = arith.constant 0.000000e+00 : f32
    %13 = vector.broadcast %cst_11 : f32 to vector<2x128xf32>
    %14 = arith.maximumf %12, %13 : vector<2x128xf32>
    %c0_12 = arith.constant 0 : index
    %c0_13 = arith.constant 0 : index
    %15 = vector.load %arg5[%c0_12, %c0_13] : memref<128x128xf32, #tpu.memory_space<vmem>>, vector<128x128xf32>
    %cst_14 = arith.constant dense<0.000000e+00> : vector<2x128xf32>
    %16 = tpu.matmul %14, %15, %cst_14 {dimension_numbers = #tpu.dot_dimension_numbers<[1], [0], [0], [1], [0, 0, 1, 1], [], []>} : vector<2x128xf32>, vector<128x128xf32>, vector<2x128xf32> -> vector<2x128xf32>
    %c0_15 = arith.constant 0 : index
    %c0_16 = arith.constant 0 : index
    %17 = vector.load %arg6[%c0_15, %c0_16] : memref<1x128xf32, #tpu.memory_space<vmem>>, vector<1x128xf32>
    %18 = vector.broadcast %17 : vector<1x128xf32> to vector<2x128xf32>
    %19 = arith.addf %16, %18 : vector<2x128xf32>
    %c0_17 = arith.constant 0 : index
    %c0_18 = arith.constant 0 : index
    %20 = vector.load %arg7[%c0_17, %c0_18] : memref<2x128xf32, #tpu.memory_space<vmem>>, vector<2x128xf32>
    tpu.vector_store %arg7[%c0_17, %c0_18], %19 {strides = array<i32>} : memref<2x128xf32, #tpu.memory_space<vmem>>, vector<2x128xf32>,
    return
  }
}

</mosaic_0001>

<bundles_post_ra>
// kernel: lenet_forward.3
= control target key start
LH: loop header
LB: loop body
LE: loop exit
PB: predicated region body
PF: predicated region fallthrough
CT: control target
= control target key end

     0   :  { %v2956_v0 = vmov 0.0|0.0   ;;  %vm2957_vm0 = vmmov 0   ;;  %v2958_v6 = vmov 0.0   ;;  %s4607_s4 = inlined_call_operand.vmem [shape: f32[128,128], index: 4, kind: input, shape index: {}]   ;;  %s4608_s0 = inlined_call_operand.vmem [shape: f32[392,128], index: 0, kind: input, shape index: {}]   ;;  %s4609_s1 = inlined_call_operand.vmem [shape: f32[392,128], index: 1, kind: input, shape index: {}]   ;;  %s4610_s2 = inlined_call_operand.vmem [shape: f32[392,128], index: 2, kind: input, shape index: {}]   ;;  %s4611_s3 = inlined_call_operand.vmem [shape: f32[392,128], index: 3, kind: input, shape index: {}]   ;;  %s4612_s5 = inlined_call_operand.vmem [shape: f32[1,128], index: 5, kind: input, shape index: {}]   ;;  %s4613_s6 = inlined_call_operand.vmem [shape: f32[392,128], index: 6, kind: output, shape index: {}]  }
   0x1   :  { %2855 = vmatprep.subr.bf16.mxu0 %v2956_v0  ;;  %2879 = vmatprep.subr.bf16.mxu1 %v2956_v0  ;;  %v23_v1 = vld [vmem:[%s4607_s4] sm:$0xff]  ;;  %v24_v2 = vld [vmem:[%s4607_s4 + $0x8] sm:$0xff]  ;;  %v25_v3 = vld [vmem:[%s4607_s4 + $0x10] sm:$0xff] }
   0x2   :  { %v3005_v4 = vpack.c.bf16 %v24_v2, %v23_v1  ;;  %v26_v5 = vld [vmem:[%s4607_s4 + $0x18] sm:$0xff]  ;;  %2171 = vmatprep.mubr.msk.f32.mxu0 %vm2957_vm0, %v2958_v6  ;;  %2350 = vmatprep.mubr.msk.f32.mxu1 %vm2957_vm0, %v2958_v6  ;;  %v27_v8 = vld [vmem:[%s4607_s4 + $0x20] sm:$0xff]  ;;  %v28_v9 = vld [vmem:[%s4607_s4 + $0x28] sm:$0xff] }
   0x3   :  { %v3016_v7 = vpack.c.bf16 %v26_v5, %v25_v3  ;;  %v3028_v10 = vpack.c.bf16 %v28_v9, %v27_v8  ;;  %v29_v11 = vld [vmem:[%s4607_s4 + $0x30] sm:$0xff]  ;;  %v30_v12 = vld [vmem:[%s4607_s4 + $0x38] sm:$0xff]  ;;  %v31_v14 = vld [vmem:[%s4607_s4 + $0x40] sm:$0xff] }
   0x4   :  { %2857 = vmatpush3.bf16.msra.mxu0 %v3005_v4  ;;  %2881 = vmatpush3.bf16.msra.mxu1 %v3005_v4  ;;  %v3040_v13 = vpack.c.bf16 %v30_v12, %v29_v11  ;;  %v32_v15 = vld [vmem:[%s4607_s4 + $0x48] sm:$0xff]  ;;  %v33_v17 = vld [vmem:[%s4607_s4 + $0x50] sm:$0xff]  ;;  %v34_v18 = vld [vmem:[%s4607_s4 + $0x58] sm:$0xff] }
   0x5   :  { %2858 = vmatprep.subr.bf16.mxu0 %v2956_v0  ;;  %2882 = vmatprep.subr.bf16.mxu1 %v2956_v0  ;;  %v3052_v16 = vpack.c.bf16 %v32_v15, %v31_v14  ;;  %v3064_v19 = vpack.c.bf16 %v34_v18, %v33_v17  ;;  %v35_v20 = vld [vmem:[%s4607_s4 + $0x60] sm:$0xff]  ;;  %v36_v21 = vld [vmem:[%s4607_s4 + $0x68] sm:$0xff]  ;;  %v37_v23 = vld [vmem:[%s4607_s4 + $0x70] sm:$0xff] }
   0x6   :  { %v3076_v22 = vpack.c.bf16 %v36_v21, %v35_v20  ;;  %v38_v24 = vld [vmem:[%s4607_s4 + $0x78] sm:$0xff]  ;;  %v40_v26 = vld [vmem:[%s4608_s0] sm:$0xff]  ;;  %v41_v28 = vld [vmem:[%s4608_s0 + $0x8] sm:$0xff] }
   0x7   :  { %v3088_v25 = vpack.c.bf16 %v38_v24, %v37_v23  ;;  %v454_v27 = vld [vmem:[%s4609_s1] sm:$0xff]  ;;  %v455_v29 = vld [vmem:[%s4609_s1 + $0x8] sm:$0xff]  ;;  %v42_v30 = vld [vmem:[%s4608_s0 + $0x10] sm:$0xff] }
   0x8   :  { %2860 = vmatpush3.bf16.msra.mxu0 %v3016_v7  ;;  %2884 = vmatpush3.bf16.msra.mxu1 %v3016_v7  ;;  %v456_v31 = vld [vmem:[%s4609_s1 + $0x10] sm:$0xff]  ;;  %v43_v32 = vld [vmem:[%s4608_s0 + $0x18] sm:$0xff]  ;;  %v44_v34 = vld [vmem:[%s4608_s0 + $0x20] sm:$0xff] }
   0x9   :  { %2861 = vmatprep.subr.bf16.mxu0 %v2956_v0  ;;  %2885 = vmatprep.subr.bf16.mxu1 %v2956_v0  ;;  %v457_v33 = vld [vmem:[%s4609_s1 + $0x18] sm:$0xff]  ;;  %v458_v35 = vld [vmem:[%s4609_s1 + $0x20] sm:$0xff]  ;;  %v45_v36 = vld [vmem:[%s4608_s0 + $0x28] sm:$0xff] }
   0xa   :  { %v459_v37 = vld [vmem:[%s4609_s1 + $0x28] sm:$0xff]  ;;  %v46_v38 = vld [vmem:[%s4608_s0 + $0x30] sm:$0xff]  ;;  %v47_v40 = vld [vmem:[%s4608_s0 + $0x38] sm:$0xff] }
   0xb   :  { %v460_v39 = vld [vmem:[%s4609_s1 + $0x30] sm:$0xff]  ;;  %v461_v41 = vld [vmem:[%s4609_s1 + $0x38] sm:$0xff]  ;;  %v48_v42 = vld [vmem:[%s4608_s0 + $0x40] sm:$0xff] }
   0xc   :  { %2863 = vmatpush3.bf16.msra.mxu0 %v3028_v10  ;;  %2887 = vmatpush3.bf16.msra.mxu1 %v3028_v10  ;;  %v462_v43 = vld [vmem:[%s4609_s1 + $0x40] sm:$0xff]  ;;  %v49_v44 = vld [vmem:[%s4608_s0 + $0x48] sm:$0xff]  ;;  %v50_v46 = vld [vmem:[%s4608_s0 + $0x50] sm:$0xff] }
   0xd   :  { %2864 = vmatprep.subr.bf16.mxu0 %v2956_v0  ;;  %2888 = vmatprep.subr.bf16.mxu1 %v2956_v0  ;;  %v463_v45 = vld [vmem:[%s4609_s1 + $0x48] sm:$0xff]  ;;  %v464_v47 = vld [vmem:[%s4609_s1 + $0x50] sm:$0xff]  ;;  %v51_v48 = vld [vmem:[%s4608_s0 + $0x58] sm:$0xff] }
   0xe   :  { %v465_v49 = vld [vmem:[%s4609_s1 + $0x58] sm:$0xff]  ;;  %v52_v50 = vld [vmem:[%s4608_s0 + $0x60] sm:$0xff]  ;;  %v53_v52 = vld [vmem:[%s4608_s0 + $0x68] sm:$0xff] }
   0xf   :  { %v466_v51 = vld [vmem:[%s4609_s1 + $0x60] sm:$0xff]  ;;  %v467_v53 = vld [vmem:[%s4609_s1 + $0x68] sm:$0xff]  ;;  %v54_v54 = vld [vmem:[%s4608_s0 + $0x70] sm:$0xff] }
  0x10   :  { %2866 = vmatpush3.bf16.msra.mxu0 %v3040_v13  ;;  %2890 = vmatpush3.bf16.msra.mxu1 %v3040_v13  ;;  %v468_v55 = vld [vmem:[%s4609_s1 + $0x70] sm:$0xff]  ;;  %v55_v56 = vld [vmem:[%s4608_s0 + $0x78] sm:$0xff]  ;;  %v56_v58 = vld [vmem:[%s4608_s0 + $0x80] sm:$0xff] }
  0x11   :  { %2867 = vmatprep.subr.bf16.mxu0 %v2956_v0  ;;  %2891 = vmatprep.subr.bf16.mxu1 %v2956_v0  ;;  %v469_v57 = vld [vmem:[%s4609_s1 + $0x78] sm:$0xff]  ;;  %v470_v59 = vld [vmem:[%s4609_s1 + $0x80] sm:$0xff]  ;;  %v57_v60 = vld [vmem:[%s4608_s0 + $0x88] sm:$0xff] }
  0x12   :  { %v471_v61 = vld [vmem:[%s4609_s1 + $0x88] sm:$0xff]  ;;  %v58_v62 = vld [vmem:[%s4608_s0 + $0x90] sm:$0xff]  ;;  %v473_v1 = vld [vmem:[%s4609_s1 + $0x98] sm:$0xff] }
  0x13   :  { %v472_v63 = vld [vmem:[%s4609_s1 + $0x90] sm:$0xff]  ;;  %v60_v2 = vld [vmem:[%s4608_s0 + $0xa0] sm:$0xff]  ;;  %v475_v5 = vld [vmem:[%s4609_s1 + $0xa8] sm:$0xff] }
  0x14   :  { %2869 = vmatpush3.bf16.msra.mxu0 %v3052_v16  ;;  %2893 = vmatpush3.bf16.msra.mxu1 %v3052_v16  ;;  %v474_v3 = vld [vmem:[%s4609_s1 + $0xa0] sm:$0xff]  ;;  %v476_v8 = vld [vmem:[%s4609_s1 + $0xb0] sm:$0xff]  ;;  %v63_v9 = vld [vmem:[%s4608_s0 + $0xb8] sm:$0xff] }
  0x15   :  { %2870 = vmatprep.subr.bf16.mxu0 %v2956_v0  ;;  %2894 = vmatprep.subr.bf16.mxu1 %v2956_v0  ;;  %v64_v11 = vld [vmem:[%s4608_s0 + $0xc0] sm:$0xff]  ;;  %v479_v14 = vld [vmem:[%s4609_s1 + $0xc8] sm:$0xff]  ;;  %v66_v15 = vld [vmem:[%s4608_s0 + $0xd0] sm:$0xff] }
  0x16   :  { %v478_v12 = vld [vmem:[%s4609_s1 + $0xc0] sm:$0xff]  ;;  %v67_v17 = vld [vmem:[%s4608_s0 + $0xd8] sm:$0xff]  ;;  %v69_v21 = vld [vmem:[%s4608_s0 + $0xe8] sm:$0xff] }
  0x17   :  { %v481_v18 = vld [vmem:[%s4609_s1 + $0xd8] sm:$0xff]  ;;  %v482_v20 = vld [vmem:[%s4609_s1 + $0xe0] sm:$0xff]  ;;  %v70_v23 = vld [vmem:[%s4608_s0 + $0xf0] sm:$0xff] }
  0x18   :  { %2872 = vmatpush3.bf16.msra.mxu0 %v3064_v19  ;;  %2896 = vmatpush3.bf16.msra.mxu1 %v3064_v19  ;;  %v484_v24 = vld [vmem:[%s4609_s1 + $0xf0] sm:$0xff] }
  0x19   :  { %2873 = vmatprep.subr.bf16.mxu0 %v2956_v0  ;;  %2897 = vmatprep.subr.bf16.mxu1 %v2956_v0 }
  0x1c   :  { %2875 = vmatpush3.bf16.msra.mxu0 %v3076_v22  ;;  %2899 = vmatpush3.bf16.msra.mxu1 %v3076_v22 }
  0x1d   :  { %2876 = vmatprep.subr.bf16.mxu0 %v2956_v0  ;;  %2900 = vmatprep.subr.bf16.mxu1 %v2956_v0 }
  0x20   :  { %2878 = vmatpush3.bf16.msra.mxu0 %v3088_v25  ;;  %2902 = vmatpush3.bf16.msra.mxu1 %v3088_v25 }
  0x21   :  { %2903 = vmatprep.subr.bf16.mxu0 %v2956_v0  ;;  %2927 = vmatprep.subr.bf16.mxu1 %v2956_v0 }
  0x23   :  { %2172 = vmatmul.mubr.f32.vlgmr.msra.gmra.mrb[0].mxu0 %v40_v26  ;;  %2351 = vmatmul.mubr.f32.vlgmr.msra.gmra.mrb[0].mxu1 %v454_v27  ;;  %v485_v26 = vld [vmem:[%s4609_s1 + $0xf8] sm:$0xff]  ;;  %v72_v27 = vld [vmem:[%s4608_s0 + $0x100] sm:$0xff] }
  0x24   :  { %2905 = vmatpush3.bf16.msra.mxu0 %v3005_v4  ;;  %2929 = vmatpush3.bf16.msra.mxu1 %v3005_v4  ;;  %v61_v4 = vld [vmem:[%s4608_s0 + $0xa8] sm:$0xff] }
  0x25   :  { %2174 = vmatprep.mubr.msk.f32.mxu0 %vm2957_vm0, %v2958_v6  ;;  %2353 = vmatprep.mubr.msk.f32.mxu1 %vm2957_vm0, %v2958_v6 }
  0x26   :  { %2906 = vmatprep.subr.bf16.mxu0 %v2956_v0  ;;  %2930 = vmatprep.subr.bf16.mxu1 %v2956_v0 }
  0x27   :  { %2175 = vmatmul.mubr.f32.gmra.mrb[2].mxu0 %v41_v28  ;;  %2354 = vmatmul.mubr.f32.gmra.mrb[2].mxu1 %v455_v29  ;;  %v486_v28 = vld [vmem:[%s4609_s1 + $0x100] sm:$0xff]  ;;  %v73_v29 = vld [vmem:[%s4608_s0 + $0x108] sm:$0xff] }
  0x28   :  { %2177 = vmatprep.mubr.msk.f32.mxu0 %vm2957_vm0, %v2958_v6  ;;  %2356 = vmatprep.mubr.msk.f32.mxu1 %vm2957_vm0, %v2958_v6 }
  0x29   :  { %2908 = vmatpush3.bf16.msra.mxu0 %v3016_v7  ;;  %2932 = vmatpush3.bf16.msra.mxu1 %v3016_v7  ;;  %v62_v7 = vld [vmem:[%s4608_s0 + $0xb0] sm:$0xff] }
  0x2a   :  { %2909 = vmatprep.subr.bf16.mxu0 %v2956_v0  ;;  %2933 = vmatprep.subr.bf16.mxu1 %v2956_v0 }
  0x2b   :  { %2178 = vmatmul.mubr.f32.gmra.mrb[4].mxu0 %v42_v30  ;;  %2357 = vmatmul.mubr.f32.gmra.mrb[4].mxu1 %v456_v31  ;;  %v487_v30 = vld [vmem:[%s4609_s1 + $0x108] sm:$0xff]  ;;  %v74_v31 = vld [vmem:[%s4608_s0 + $0x110] sm:$0xff] }
  0x2c   :  { %2180 = vmatprep.mubr.msk.f32.mxu0 %vm2957_vm0, %v2958_v6  ;;  %2359 = vmatprep.mubr.msk.f32.mxu1 %vm2957_vm0, %v2958_v6 }
  0x2d   :  { %2911 = vmatpush3.bf16.msra.mxu0 %v3028_v10  ;;  %2935 = vmatpush3.bf16.msra.mxu1 %v3028_v10  ;;  %v477_v10 = vld [vmem:[%s4609_s1 + $0xb8] sm:$0xff] }
  0x2e   :  { %2912 = vmatprep.subr.bf16.mxu0 %v2956_v0  ;;  %2936 = vmatprep.subr.bf16.mxu1 %v2956_v0 }
  0x2f   :  { %2181 = vmatmul.mubr.f32.gmra.mrb[6].mxu0 %v43_v32  ;;  %2360 = vmatmul.mubr.f32.gmra.mrb[6].mxu1 %v457_v33  ;;  %v488_v32 = vld [vmem:[%s4609_s1 + $0x110] sm:$0xff]  ;;  %v75_v33 = vld [vmem:[%s4608_s0 + $0x118] sm:$0xff] }
  0x30   :  { %2183 = vmatprep.mubr.msk.f32.mxu0 %vm2957_vm0, %v2958_v6  ;;  %2362 = vmatprep.mubr.msk.f32.mxu1 %vm2957_vm0, %v2958_v6 }
  0x31   :  { %2914 = vmatpush3.bf16.msra.mxu0 %v3040_v13  ;;  %2938 = vmatpush3.bf16.msra.mxu1 %v3040_v13  ;;  %v65_v13 = vld [vmem:[%s4608_s0 + $0xc8] sm:$0xff] }
  0x32   :  { %2915 = vmatprep.subr.bf16.mxu0 %v2956_v0  ;;  %2939 = vmatprep.subr.bf16.mxu1 %v2956_v0 }
  0x33   :  { %2184 = vmatmul.mubr.f32.gmra.mrb[8].mxu0 %v44_v34  ;;  %2363 = vmatmul.mubr.f32.gmra.mrb[8].mxu1 %v458_v35  ;;  %v489_v34 = vld [vmem:[%s4609_s1 + $0x118] sm:$0xff]  ;;  %v76_v35 = vld [vmem:[%s4608_s0 + $0x120] sm:$0xff] }
  0x34   :  { %2186 = vmatprep.mubr.msk.f32.mxu0 %vm2957_vm0, %v2958_v6  ;;  %2365 = vmatprep.mubr.msk.f32.mxu1 %vm2957_vm0, %v2958_v6 }
  0x35   :  { %2917 = vmatpush3.bf16.msra.mxu0 %v3052_v16  ;;  %2941 = vmatpush3.bf16.msra.mxu1 %v3052_v16  ;;  %v480_v16 = vld [vmem:[%s4609_s1 + $0xd0] sm:$0xff] }
  0x36   :  { %2918 = vmatprep.subr.bf16.mxu0 %v2956_v0  ;;  %2942 = vmatprep.subr.bf16.mxu1 %v2956_v0 }
  0x37   :  { %2187 = vmatmul.mubr.f32.gmra.mrb[10].mxu0 %v45_v36  ;;  %2366 = vmatmul.mubr.f32.gmra.mrb[10].mxu1 %v459_v37  ;;  %v490_v36 = vld [vmem:[%s4609_s1 + $0x120] sm:$0xff]  ;;  %v77_v37 = vld [vmem:[%s4608_s0 + $0x128] sm:$0xff] }
  0x38   :  { %2189 = vmatprep.mubr.msk.f32.mxu0 %vm2957_vm0, %v2958_v6  ;;  %2368 = vmatprep.mubr.msk.f32.mxu1 %vm2957_vm0, %v2958_v6 }
  0x39   :  { %2920 = vmatpush3.bf16.msra.mxu0 %v3064_v19  ;;  %2944 = vmatpush3.bf16.msra.mxu1 %v3064_v19  ;;  %v68_v19 = vld [vmem:[%s4608_s0 + $0xe0] sm:$0xff] }
  0x3a   :  { %2921 = vmatprep.subr.bf16.mxu0 %v2956_v0  ;;  %2945 = vmatprep.subr.bf16.mxu1 %v2956_v0 }
  0x3b   :  { %2190 = vmatmul.mubr.f32.gmra.mrb[12].mxu0 %v46_v38  ;;  %2369 = vmatmul.mubr.f32.gmra.mrb[12].mxu1 %v460_v39  ;;  %v491_v38 = vld [vmem:[%s4609_s1 + $0x128] sm:$0xff]  ;;  %v78_v39 = vld [vmem:[%s4608_s0 + $0x130] sm:$0xff] }
  0x3c   :  { %2192 = vmatprep.mubr.msk.f32.mxu0 %vm2957_vm0, %v2958_v6  ;;  %2371 = vmatprep.mubr.msk.f32.mxu1 %vm2957_vm0, %v2958_v6 }
  0x3d   :  { %2923 = vmatpush3.bf16.msra.mxu0 %v3076_v22  ;;  %2947 = vmatpush3.bf16.msra.mxu1 %v3076_v22  ;;  %v483_v22 = vld [vmem:[%s4609_s1 + $0xe8] sm:$0xff] }
  0x3e   :  { %2924 = vmatprep.subr.bf16.mxu0 %v2956_v0  ;;  %2948 = vmatprep.subr.bf16.mxu1 %v2956_v0  ;;  %v59_v0 = vld [vmem:[%s4608_s0 + $0x98] sm:$0xff] }
  0x3f   :  { %2193 = vmatmul.mubr.f32.gmra.mrb[14].mxu0 %v47_v40  ;;  %2372 = vmatmul.mubr.f32.gmra.mrb[14].mxu1 %v461_v41  ;;  %v492_v40 = vld [vmem:[%s4609_s1 + $0x130] sm:$0xff]  ;;  %v79_v41 = vld [vmem:[%s4608_s0 + $0x138] sm:$0xff] }
  0x40   :  { %2195 = vmatprep.mubr.msk.f32.mxu0 %vm2957_vm0, %v2958_v6  ;;  %2374 = vmatprep.mubr.msk.f32.mxu1 %vm2957_vm0, %v2958_v6 }
  0x41   :  { %2926 = vmatpush3.bf16.msra.mxu0 %v3088_v25  ;;  %2950 = vmatpush3.bf16.msra.mxu1 %v3088_v25  ;;  %v71_v25 = vld [vmem:[%s4608_s0 + $0xf8] sm:$0xff] }
  0x43   :  { %2196 = vmatmul.mubr.f32.gmra.mrb[16].mxu0 %v48_v42  ;;  %2375 = vmatmul.mubr.f32.gmra.mrb[16].mxu1 %v462_v43  ;;  %v493_v42 = vld [vmem:[%s4609_s1 + $0x138] sm:$0xff]  ;;  %v80_v43 = vld [vmem:[%s4608_s0 + $0x140] sm:$0xff] }
  0x44   :  { %2198 = vmatprep.mubr.msk.f32.mxu0 %vm2957_vm0, %v2958_v6  ;;  %2377 = vmatprep.mubr.msk.f32.mxu1 %vm2957_vm0, %v2958_v6 }
  0x47   :  { %2199 = vmatmul.mubr.f32.gmra.mrb[18].mxu0 %v49_v44  ;;  %2378 = vmatmul.mubr.f32.gmra.mrb[18].mxu1 %v463_v45  ;;  %v494_v44 = vld [vmem:[%s4609_s1 + $0x140] sm:$0xff]  ;;  %v81_v45 = vld [vmem:[%s4608_s0 + $0x148] sm:$0xff] }
  0x48   :  { %2201 = vmatprep.mubr.msk.f32.mxu0 %vm2957_vm0, %v2958_v6  ;;  %2380 = vmatprep.mubr.msk.f32.mxu1 %vm2957_vm0, %v2958_v6 }
  0x4b   :  { %2202 = vmatmul.mubr.f32.gmra.mrb[20].mxu0 %v50_v46  ;;  %2381 = vmatmul.mubr.f32.gmra.mrb[20].mxu1 %v464_v47  ;;  %v495_v46 = vld [vmem:[%s4609_s1 + $0x148] sm:$0xff]  ;;  %v82_v47 = vld [vmem:[%s4608_s0 + $0x150] sm:$0xff] }
  0x4c   :  { %2204 = vmatprep.mubr.msk.f32.mxu0 %vm2957_vm0, %v2958_v6  ;;  %2383 = vmatprep.mubr.msk.f32.mxu1 %vm2957_vm0, %v2958_v6 }
  0x4f   :  { %2205 = vmatmul.mubr.f32.gmra.mrb[22].mxu0 %v51_v48  ;;  %2384 = vmatmul.mubr.f32.gmra.mrb[22].mxu1 %v465_v49  ;;  %v496_v48 = vld [vmem:[%s4609_s1 + $0x150] sm:$0xff]  ;;  %v83_v49 = vld [vmem:[%s4608_s0 + $0x158] sm:$0xff] }
  0x50   :  { %2207 = vmatprep.mubr.msk.f32.mxu0 %vm2957_vm0, %v2958_v6  ;;  %2386 = vmatprep.mubr.msk.f32.mxu1 %vm2957_vm0, %v2958_v6 }
  0x53   :  { %2208 = vmatmul.mubr.f32.gmra.mrb[24].mxu0 %v52_v50  ;;  %2387 = vmatmul.mubr.f32.gmra.mrb[24].mxu1 %v466_v51  ;;  %v497_v50 = vld [vmem:[%s4609_s1 + $0x158] sm:$0xff]  ;;  %v84_v51 = vld [vmem:[%s4608_s0 + $0x160] sm:$0xff] }
  0x54   :  { %2210 = vmatprep.mubr.msk.f32.mxu0 %vm2957_vm0, %v2958_v6  ;;  %2389 = vmatprep.mubr.msk.f32.mxu1 %vm2957_vm0, %v2958_v6 }
  0x57   :  { %2211 = vmatmul.mubr.f32.gmra.mrb[26].mxu0 %v53_v52  ;;  %2390 = vmatmul.mubr.f32.gmra.mrb[26].mxu1 %v467_v53  ;;  %v498_v52 = vld [vmem:[%s4609_s1 + $0x160] sm:$0xff]  ;;  %v85_v53 = vld [vmem:[%s4608_s0 + $0x168] sm:$0xff] }
  0x58   :  { %2213 = vmatprep.mubr.msk.f32.mxu0 %vm2957_vm0, %v2958_v6  ;;  %2392 = vmatprep.mubr.msk.f32.mxu1 %vm2957_vm0, %v2958_v6 }
  0x5b   :  { %2214 = vmatmul.mubr.f32.gmra.mrb[28].mxu0 %v54_v54  ;;  %2393 = vmatmul.mubr.f32.gmra.mrb[28].mxu1 %v468_v55  ;;  %v499_v54 = vld [vmem:[%s4609_s1 + $0x168] sm:$0xff]  ;;  %v86_v55 = vld [vmem:[%s4608_s0 + $0x170] sm:$0xff] }
  0x5c   :  { %2216 = vmatprep.mubr.msk.f32.mxu0 %vm2957_vm0, %v2958_v6  ;;  %2395 = vmatprep.mubr.msk.f32.mxu1 %vm2957_vm0, %v2958_v6 }
  0x5f   :  { %2217 = vmatmul.mubr.f32.gmra.mrb[30].mxu0 %v55_v56  ;;  %2396 = vmatmul.mubr.f32.gmra.mrb[30].mxu1 %v469_v57  ;;  %v500_v56 = vld [vmem:[%s4609_s1 + $0x170] sm:$0xff]  ;;  %v87_v57 = vld [vmem:[%s4608_s0 + $0x178] sm:$0xff] }
  0x60   :  { %2219 = vmatprep.mubr.msk.f32.mxu0 %vm2957_vm0, %v2958_v6  ;;  %2398 = vmatprep.mubr.msk.f32.mxu1 %vm2957_vm0, %v2958_v6 }
  0x63   :  { %2220 = vmatmul.mubr.f32.gmra.mrb[32].mxu0 %v56_v58  ;;  %2399 = vmatmul.mubr.f32.gmra.mrb[32].mxu1 %v470_v59  ;;  %v501_v58 = vld [vmem:[%s4609_s1 + $0x178] sm:$0xff]  ;;  %v88_v59 = vld [vmem:[%s4608_s0 + $0x180] sm:$0xff] }
  0x64   :  { %2222 = vmatprep.mubr.msk.f32.mxu0 %vm2957_vm0, %v2958_v6  ;;  %2401 = vmatprep.mubr.msk.f32.mxu1 %vm2957_vm0, %v2958_v6 }
  0x67   :  { %2223 = vmatmul.mubr.f32.gmra.mrb[34].mxu0 %v57_v60  ;;  %2402 = vmatmul.mubr.f32.gmra.mrb[34].mxu1 %v471_v61  ;;  %v502_v60 = vld [vmem:[%s4609_s1 + $0x180] sm:$0xff] }
  0x68   :  { %2225 = vmatprep.mubr.msk.f32.mxu0 %vm2957_vm0, %v2958_v6  ;;  %2404 = vmatprep.mubr.msk.f32.mxu1 %vm2957_vm0, %v2958_v6  ;;  %v911_v61 = vld [vmem:[%s4610_s2] sm:$0xff] }
  0x6b   :  { %2226 = vmatmul.mubr.f32.gmra.mrb[36].mxu0 %v58_v62  ;;  %2405 = vmatmul.mubr.f32.gmra.mrb[36].mxu1 %v472_v63  ;;  %v1319_v62 = vld [vmem:[%s4611_s3] sm:$0xff]  ;;  %v912_v63 = vld [vmem:[%s4610_s2 + $0x8] sm:$0xff] }
  0x6c   :  { %2228 = vmatprep.mubr.msk.f32.mxu0 %vm2957_vm0, %v2958_v6  ;;  %2407 = vmatprep.mubr.msk.f32.mxu1 %vm2957_vm0, %v2958_v6 }
  0x6f   :  { %2229 = vmatmul.mubr.f32.gmra.mrb[38].mxu0 %v59_v0  ;;  %2408 = vmatmul.mubr.f32.gmra.mrb[38].mxu1 %v473_v1  ;;  %v1320_v0 = vld [vmem:[%s4611_s3 + $0x8] sm:$0xff]  ;;  %v913_v1 = vld [vmem:[%s4610_s2 + $0x10] sm:$0xff] }
  0x70   :  { %2231 = vmatprep.mubr.msk.f32.mxu0 %vm2957_vm0, %v2958_v6  ;;  %2410 = vmatprep.mubr.msk.f32.mxu1 %vm2957_vm0, %v2958_v6 }
  0x73   :  { %2232 = vmatmul.mubr.f32.gmra.mrb[40].mxu0 %v60_v2  ;;  %2411 = vmatmul.mubr.f32.gmra.mrb[40].mxu1 %v474_v3  ;;  %v1321_v2 = vld [vmem:[%s4611_s3 + $0x10] sm:$0xff]  ;;  %v914_v3 = vld [vmem:[%s4610_s2 + $0x18] sm:$0xff] }
  0x74   :  { %2234 = vmatprep.mubr.msk.f32.mxu0 %vm2957_vm0, %v2958_v6  ;;  %2413 = vmatprep.mubr.msk.f32.mxu1 %vm2957_vm0, %v2958_v6 }
  0x77   :  { %2235 = vmatmul.mubr.f32.gmra.mrb[42].mxu0 %v61_v4  ;;  %2414 = vmatmul.mubr.f32.gmra.mrb[42].mxu1 %v475_v5  ;;  %v1322_v4 = vld [vmem:[%s4611_s3 + $0x18] sm:$0xff]  ;;  %v3655_v5 = vld [vmem:[%s4612_s5] ss:$0 sm:$0xff] }
  0x78   :  { %2237 = vmatprep.mubr.msk.f32.mxu0 %vm2957_vm0, %v2958_v6  ;;  %2416 = vmatprep.mubr.msk.f32.mxu1 %vm2957_vm0, %v2958_v6 }
  0x7b   :  { %2238 = vmatmul.mubr.f32.gmra.mrb[44].mxu0 %v62_v7  ;;  %2417 = vmatmul.mubr.f32.gmra.mrb[44].mxu1 %v476_v8  ;;  %v915_v7 = vld [vmem:[%s4610_s2 + $0x20] sm:$0xff] }
  0x7c   :  { %2240 = vmatprep.mubr.msk.f32.mxu0 %vm2957_vm0, %v2958_v6  ;;  %2419 = vmatprep.mubr.msk.f32.mxu1 %vm2957_vm0, %v2958_v6  ;;  %v1323_v8 = vld [vmem:[%s4611_s3 + $0x20] sm:$0xff] }
  0x7f   :  { %2241 = vmatmul.mubr.f32.gmra.mrb[46].mxu0 %v63_v9  ;;  %2420 = vmatmul.mubr.f32.gmra.mrb[46].mxu1 %v477_v10 }
  0x80   :  { %2243 = vmatprep.mubr.msk.f32.mxu0 %vm2957_vm0, %v2958_v6  ;;  %2422 = vmatprep.mubr.msk.f32.mxu1 %vm2957_vm0, %v2958_v6 }
  0x83   :  { %2244 = vmatmul.mubr.f32.gmra.mrb[48].mxu0 %v64_v11  ;;  %2423 = vmatmul.mubr.f32.gmra.mrb[48].mxu1 %v478_v12 }
  0x84   :  { %2246 = vmatprep.mubr.msk.f32.mxu0 %vm2957_vm0, %v2958_v6  ;;  %2425 = vmatprep.mubr.msk.f32.mxu1 %vm2957_vm0, %v2958_v6 }
  0x87   :  { %2247 = vmatmul.mubr.f32.gmra.mrb[50].mxu0 %v65_v13  ;;  %2426 = vmatmul.mubr.f32.gmra.mrb[50].mxu1 %v479_v14 }
  0x88   :  { %2249 = vmatprep.mubr.msk.f32.mxu0 %vm2957_vm0, %v2958_v6  ;;  %2428 = vmatprep.mubr.msk.f32.mxu1 %vm2957_vm0, %v2958_v6 }
  0x8b   :  { %2250 = vmatmul.mubr.f32.gmra.mrb[52].mxu0 %v66_v15  ;;  %2429 = vmatmul.mubr.f32.gmra.mrb[52].mxu1 %v480_v16  ;;  %v916_v15 = vld [vmem:[%s4610_s2 + $0x28] sm:$0xff] }
  0x8c   :  { %2252 = vmatprep.mubr.msk.f32.mxu0 %vm2957_vm0, %v2958_v6  ;;  %2431 = vmatprep.mubr.msk.f32.mxu1 %vm2957_vm0, %v2958_v6  ;;  %v1324_v16 = vld [vmem:[%s4611_s3 + $0x28] sm:$0xff] }
  0x8f   :  { %2253 = vmatmul.mubr.f32.gmra.mrb[54].mxu0 %v67_v17  ;;  %2432 = vmatmul.mubr.f32.gmra.mrb[54].mxu1 %v481_v18 }
  0x90   :  { %2255 = vmatprep.mubr.msk.f32.mxu0 %vm2957_vm0, %v2958_v6  ;;  %2434 = vmatprep.mubr.msk.f32.mxu1 %vm2957_vm0, %v2958_v6 }
  0x93   :  { %2256 = vmatmul.mubr.f32.gmra.mrb[56].mxu0 %v68_v19  ;;  %2435 = vmatmul.mubr.f32.gmra.mrb[56].mxu1 %v482_v20 }
  0x94   :  { %2258 = vmatprep.mubr.msk.f32.mxu0 %vm2957_vm0, %v2958_v6  ;;  %2437 = vmatprep.mubr.msk.f32.mxu1 %vm2957_vm0, %v2958_v6 }
  0x97   :  { %2259 = vmatmul.mubr.f32.gmra.mrb[58].mxu0 %v69_v21  ;;  %2438 = vmatmul.mubr.f32.gmra.mrb[58].mxu1 %v483_v22 }
  0x98   :  { %2261 = vmatprep.mubr.msk.f32.mxu0 %vm2957_vm0, %v2958_v6  ;;  %2440 = vmatprep.mubr.msk.f32.mxu1 %vm2957_vm0, %v2958_v6 }
  0x9b   :  { %2262 = vmatmul.mubr.f32.gmra.mrb[60].mxu0 %v70_v23  ;;  %2441 = vmatmul.mubr.f32.gmra.mrb[60].mxu1 %v484_v24 }
  0x9c   :  { %2264 = vmatprep.mubr.msk.f32.mxu0 %vm2957_vm0, %v2958_v6  ;;  %2443 = vmatprep.mubr.msk.f32.mxu1 %vm2957_vm0, %v2958_v6 }
  0x9f   :  { %2265 = vmatmul.mubr.f32.gmra.mrb[62].mxu0 %v71_v25  ;;  %2444 = vmatmul.mubr.f32.gmra.mrb[62].mxu1 %v485_v26  ;;  %v917_v26 = vld [vmem:[%s4610_s2 + $0x30] sm:$0xff] }
  0xa0   :  { %2267 = vmatprep.mubr.msk.f32.mxu0 %vm2957_vm0, %v2958_v6  ;;  %2446 = vmatprep.mubr.msk.f32.mxu1 %vm2957_vm0, %v2958_v6 }
  0xa3   :  { %2268 = vmatmul.mubr.f32.gmra.mrb[64].mxu0 %v72_v27  ;;  %2447 = vmatmul.mubr.f32.gmra.mrb[64].mxu1 %v486_v28  ;;  %v1325_v27 = vld [vmem:[%s4611_s3 + $0x30] sm:$0xff] }
  0xa4   :  { %2270 = vmatprep.mubr.msk.f32.mxu0 %vm2957_vm0, %v2958_v6  ;;  %2449 = vmatprep.mubr.msk.f32.mxu1 %vm2957_vm0, %v2958_v6 }
  0xa7   :  { %2271 = vmatmul.mubr.f32.gmra.mrb[66].mxu0 %v73_v29  ;;  %2450 = vmatmul.mubr.f32.gmra.mrb[66].mxu1 %v487_v30 }
  0xa8   :  { %2273 = vmatprep.mubr.msk.f32.mxu0 %vm2957_vm0, %v2958_v6  ;;  %2452 = vmatprep.mubr.msk.f32.mxu1 %vm2957_vm0, %v2958_v6 }
  0xab   :  { %2274 = vmatmul.mubr.f32.gmra.mrb[68].mxu0 %v74_v31  ;;  %2453 = vmatmul.mubr.f32.gmra.mrb[68].mxu1 %v488_v32 }
  0xac   :  { %2276 = vmatprep.mubr.msk.f32.mxu0 %vm2957_vm0, %v2958_v6  ;;  %2455 = vmatprep.mubr.msk.f32.mxu1 %vm2957_vm0, %v2958_v6 }
  0xaf   :  { %2277 = vmatmul.mubr.f32.gmra.mrb[70].mxu0 %v75_v33  ;;  %2456 = vmatmul.mubr.f32.gmra.mrb[70].mxu1 %v489_v34 }
  0xb0   :  { %2279 = vmatprep.mubr.msk.f32.mxu0 %vm2957_vm0, %v2958_v6  ;;  %2458 = vmatprep.mubr.msk.f32.mxu1 %vm2957_vm0, %v2958_v6 }
  0xb3   :  { %2280 = vmatmul.mubr.f32.gmra.mrb[72].mxu0 %v76_v35  ;;  %2459 = vmatmul.mubr.f32.gmra.mrb[72].mxu1 %v490_v36 }
  0xb4   :  { %2282 = vmatprep.mubr.msk.f32.mxu0 %vm2957_vm0, %v2958_v6  ;;  %2461 = vmatprep.mubr.msk.f32.mxu1 %vm2957_vm0, %v2958_v6 }
  0xb7   :  { %2283 = vmatmul.mubr.f32.gmra.mrb[74].mxu0 %v77_v37  ;;  %2462 = vmatmul.mubr.f32.gmra.mrb[74].mxu1 %v491_v38  ;;  %v918_v37 = vld [vmem:[%s4610_s2 + $0x38] sm:$0xff] }
  0xb8   :  { %2285 = vmatprep.mubr.msk.f32.mxu0 %vm2957_vm0, %v2958_v6  ;;  %2464 = vmatprep.mubr.msk.f32.mxu1 %vm2957_vm0, %v2958_v6  ;;  %v1326_v38 = vld [vmem:[%s4611_s3 + $0x38] sm:$0xff] }
  0xbb   :  { %2286 = vmatmul.mubr.f32.gmra.mrb[76].mxu0 %v78_v39  ;;  %2465 = vmatmul.mubr.f32.gmra.mrb[76].mxu1 %v492_v40 }
  0xbc   :  { %2288 = vmatprep.mubr.msk.f32.mxu0 %vm2957_vm0, %v2958_v6  ;;  %2467 = vmatprep.mubr.msk.f32.mxu1 %vm2957_vm0, %v2958_v6 }
  0xbf   :  { %2289 = vmatmul.mubr.f32.gmra.mrb[78].mxu0 %v79_v41  ;;  %2468 = vmatmul.mubr.f32.gmra.mrb[78].mxu1 %v493_v42 }
  0xc0   :  { %2291 = vmatprep.mubr.msk.f32.mxu0 %vm2957_vm0, %v2958_v6  ;;  %2470 = vmatprep.mubr.msk.f32.mxu1 %vm2957_vm0, %v2958_v6 }
  0xc3   :  { %2292 = vmatmul.mubr.f32.gmra.mrb[80].mxu0 %v80_v43  ;;  %2471 = vmatmul.mubr.f32.gmra.mrb[80].mxu1 %v494_v44 }
  0xc4   :  { %2294 = vmatprep.mubr.msk.f32.mxu0 %vm2957_vm0, %v2958_v6  ;;  %2473 = vmatprep.mubr.msk.f32.mxu1 %vm2957_vm0, %v2958_v6 }
  0xc7   :  { %2295 = vmatmul.mubr.f32.gmra.mrb[82].mxu0 %v81_v45  ;;  %2474 = vmatmul.mubr.f32.gmra.mrb[82].mxu1 %v495_v46 }
  0xc8   :  { %2297 = vmatprep.mubr.msk.f32.mxu0 %vm2957_vm0, %v2958_v6  ;;  %2476 = vmatprep.mubr.msk.f32.mxu1 %vm2957_vm0, %v2958_v6 }
  0xcb   :  { %2298 = vmatmul.mubr.f32.gmra.mrb[84].mxu0 %v82_v47  ;;  %2477 = vmatmul.mubr.f32.gmra.mrb[84].mxu1 %v496_v48  ;;  %v919_v48 = vld [vmem:[%s4610_s2 + $0x40] sm:$0xff] }
  0xcc   :  { %2300 = vmatprep.mubr.msk.f32.mxu0 %vm2957_vm0, %v2958_v6  ;;  %2479 = vmatprep.mubr.msk.f32.mxu1 %vm2957_vm0, %v2958_v6 }
  0xcf   :  { %2301 = vmatmul.mubr.f32.gmra.mrb[86].mxu0 %v83_v49  ;;  %2480 = vmatmul.mubr.f32.gmra.mrb[86].mxu1 %v497_v50  ;;  %v1327_v49 = vld [vmem:[%s4611_s3 + $0x40] sm:$0xff] }
  0xd0   :  { %2303 = vmatprep.mubr.msk.f32.mxu0 %vm2957_vm0, %v2958_v6  ;;  %2482 = vmatprep.mubr.msk.f32.mxu1 %vm2957_vm0, %v2958_v6 }
  0xd3   :  { %2304 = vmatmul.mubr.f32.gmra.mrb[88].mxu0 %v84_v51  ;;  %2483 = vmatmul.mubr.f32.gmra.mrb[88].mxu1 %v498_v52 }
  0xd4   :  { %2306 = vmatprep.mubr.msk.f32.mxu0 %vm2957_vm0, %v2958_v6  ;;  %2485 = vmatprep.mubr.msk.f32.mxu1 %vm2957_vm0, %v2958_v6 }
  0xd7   :  { %2307 = vmatmul.mubr.f32.gmra.mrb[90].mxu0 %v85_v53  ;;  %2486 = vmatmul.mubr.f32.gmra.mrb[90].mxu1 %v499_v54 }
  0xd8   :  { %2309 = vmatprep.mubr.msk.f32.mxu0 %vm2957_vm0, %v2958_v6  ;;  %2488 = vmatprep.mubr.msk.f32.mxu1 %vm2957_vm0, %v2958_v6 }
  0xdb   :  { %2310 = vmatmul.mubr.f32.gmra.mrb[92].mxu0 %v86_v55  ;;  %2489 = vmatmul.mubr.f32.gmra.mrb[92].mxu1 %v500_v56 }
  0xdc   :  { %2312 = vmatprep.mubr.msk.f32.mxu0 %vm2957_vm0, %v2958_v6  ;;  %2491 = vmatprep.mubr.msk.f32.mxu1 %vm2957_vm0, %v2958_v6 }
  0xdf   :  { %2313 = vmatmul.mubr.f32.gmra.mrb[94].mxu0 %v87_v57  ;;  %2492 = vmatmul.mubr.f32.gmra.mrb[94].mxu1 %v501_v58 }
  0xe0   :  { %2315 = vmatprep.mubr.msk.f32.mxu0 %vm2957_vm0, %v2958_v6  ;;  %2494 = vmatprep.mubr.msk.f32.mxu1 %vm2957_vm0, %v2958_v6 }
  0xe3   :  { %2316 = vmatmul.mubr.f32.gmra.mrb[96].mxu0 %v88_v59  ;;  %2495 = vmatmul.mubr.f32.gmra.mrb[96].mxu1 %v502_v60  ;;  %v920_v59 = vld [vmem:[%s4610_s2 + $0x48] sm:$0xff] }
  0xe4   :  { %2529 = vmatprep.mubr.msk.f32.mxu0 %vm2957_vm0, %v2958_v6  ;;  %2708 = vmatprep.mubr.msk.f32.mxu1 %vm2957_vm0, %v2958_v6  ;;  %v1328_v60 = vld [vmem:[%s4611_s3 + $0x48] sm:$0xff] }
  0xe7   :  { %2530 = vmatmul.mubr.f32.vlgmr.msra.gmra.mrb[98].mxu0 %v911_v61  ;;  %2709 = vmatmul.mubr.f32.vlgmr.msra.gmra.mrb[98].mxu1 %v1319_v62 }
  0xe8   :  { %2532 = vmatprep.mubr.msk.f32.mxu0 %vm2957_vm0, %v2958_v6  ;;  %2711 = vmatprep.mubr.msk.f32.mxu1 %vm2957_vm0, %v2958_v6 }
  0xeb   :  { %2533 = vmatmul.mubr.f32.gmra.mrb[100].mxu0 %v912_v63  ;;  %2712 = vmatmul.mubr.f32.gmra.mrb[100].mxu1 %v1320_v0 }
  0xec   :  { %2535 = vmatprep.mubr.msk.f32.mxu0 %vm2957_vm0, %v2958_v6  ;;  %2714 = vmatprep.mubr.msk.f32.mxu1 %vm2957_vm0, %v2958_v6 }
  0xef   :  { %2536 = vmatmul.mubr.f32.gmra.mrb[102].mxu0 %v913_v1  ;;  %2715 = vmatmul.mubr.f32.gmra.mrb[102].mxu1 %v1321_v2 }
  0xf0   :  { %2538 = vmatprep.mubr.msk.f32.mxu0 %vm2957_vm0, %v2958_v6  ;;  %2717 = vmatprep.mubr.msk.f32.mxu1 %vm2957_vm0, %v2958_v6 }
  0xf3   :  { %2539 = vmatmul.mubr.f32.gmra.mrb[104].mxu0 %v914_v3  ;;  %2718 = vmatmul.mubr.f32.gmra.mrb[104].mxu1 %v1322_v4 }
  0xf4   :  { %2541 = vmatprep.mubr.msk.f32.mxu0 %vm2957_vm0, %v2958_v6  ;;  %2720 = vmatprep.mubr.msk.f32.mxu1 %vm2957_vm0, %v2958_v6 }
  0xf6   :  { %v161_v9 = vpop.f32.mrb[0].mxu0  ;;  %v569_v10 = vpop.f32.mrb[0].mxu1 }
  0xf7   :  { %v162_v11 = vadd.f32 %v3655_v5, %v161_v9  ;;  %v570_v12 = vadd.f32 %v3655_v5, %v569_v10  ;;  %v2173_v13 = vpop.f32.mrb[1].mxu0  ;;  %v2352_v14 = vpop.f32.mrb[1].mxu1  ;;  %2542 = vmatmul.mubr.f32.gmra.mrb[106].mxu0 %v915_v7  ;;  %2721 = vmatmul.mubr.f32.gmra.mrb[106].mxu1 %v1323_v8  ;;  %v921_v8 = vld [vmem:[%s4610_s2 + $0x50] sm:$0xff] }
  0xf8   :  { %2544 = vmatprep.mubr.msk.f32.mxu0 %vm2957_vm0, %v2958_v6  ;;  %2723 = vmatprep.mubr.msk.f32.mxu1 %vm2957_vm0, %v2958_v6  ;;  %v1329_v9 = vld [vmem:[%s4611_s3 + $0x50] sm:$0xff] }
  0xf9   :  { %v405_v17 = vmax.f32 %v162_v11, 0.0  ;;  %v813_v18 = vmax.f32 %v570_v12, 0.0 }
  0xfa   :  { %v166_v19 = vpop.f32.mrb[2].mxu0  ;;  %v574_v20 = vpop.f32.mrb[2].mxu1 }
  0xfb   :  { %v3679_v21 = vmax.f32 %v405_v17, %v813_v18  ;;  %v167_v22 = vadd.f32 %v3655_v5, %v166_v19  ;;  %v575_v23 = vadd.f32 %v3655_v5, %v574_v20  ;;  %v2176_v24 = vpop.f32.mrb[3].mxu0  ;;  %v2355_v25 = vpop.f32.mrb[3].mxu1  ;;  %2545 = vmatmul.mubr.f32.gmra.mrb[108].mxu0 %v916_v15  ;;  %2724 = vmatmul.mubr.f32.gmra.mrb[108].mxu1 %v1324_v16  ;;  %v922_v19 = vld [vmem:[%s4610_s2 + $0x58] sm:$0xff] }
  0xfc   :  { %2547 = vmatprep.mubr.msk.f32.mxu0 %vm2957_vm0, %v2958_v6  ;;  %2726 = vmatprep.mubr.msk.f32.mxu1 %vm2957_vm0, %v2958_v6  ;;  %v1330_v20 = vld [vmem:[%s4611_s3 + $0x58] sm:$0xff] }
  0xfd   :  { %v406_v28 = vmax.f32 %v167_v22, 0.0  ;;  %v814_v29 = vmax.f32 %v575_v23, 0.0 }
  0xfe   :  { %v171_v30 = vpop.f32.mrb[4].mxu0  ;;  %v579_v31 = vpop.f32.mrb[4].mxu1 }
  0xff   :  { %v3693_v32 = vmax.f32 %v406_v28, %v814_v29  ;;  %v172_v33 = vadd.f32 %v3655_v5, %v171_v30  ;;  %v580_v34 = vadd.f32 %v3655_v5, %v579_v31  ;;  %v2179_v35 = vpop.f32.mrb[5].mxu0  ;;  %v2358_v36 = vpop.f32.mrb[5].mxu1  ;;  %2548 = vmatmul.mubr.f32.gmra.mrb[110].mxu0 %v917_v26  ;;  %2727 = vmatmul.mubr.f32.gmra.mrb[110].mxu1 %v1325_v27  ;;  %v923_v31 = vld [vmem:[%s4610_s2 + $0x60] sm:$0xff] }
 0x100   :  { %2550 = vmatprep.mubr.msk.f32.mxu0 %vm2957_vm0, %v2958_v6  ;;  %2729 = vmatprep.mubr.msk.f32.mxu1 %vm2957_vm0, %v2958_v6 }
 0x101   :  { %v407_v39 = vmax.f32 %v172_v33, 0.0  ;;  %v815_v40 = vmax.f32 %v580_v34, 0.0  ;;  %v1331_v33 = vld [vmem:[%s4611_s3 + $0x60] sm:$0xff] }
 0x102   :  { %v176_v41 = vpop.f32.mrb[6].mxu0  ;;  %v584_v42 = vpop.f32.mrb[6].mxu1 }
 0x103   :  { %v3707_v43 = vmax.f32 %v407_v39, %v815_v40  ;;  %v177_v44 = vadd.f32 %v3655_v5, %v176_v41  ;;  %v585_v45 = vadd.f32 %v3655_v5, %v584_v42  ;;  %v2182_v46 = vpop.f32.mrb[7].mxu0  ;;  %v2361_v47 = vpop.f32.mrb[7].mxu1  ;;  %2551 = vmatmul.mubr.f32.gmra.mrb[112].mxu0 %v918_v37  ;;  %2730 = vmatmul.mubr.f32.gmra.mrb[112].mxu1 %v1326_v38 }
 0x104   :  { %2553 = vmatprep.mubr.msk.f32.mxu0 %vm2957_vm0, %v2958_v6  ;;  %2732 = vmatprep.mubr.msk.f32.mxu1 %vm2957_vm0, %v2958_v6 }
 0x105   :  { %v408_v50 = vmax.f32 %v177_v44, 0.0  ;;  %v816_v51 = vmax.f32 %v585_v45, 0.0  ;;  %v924_v44 = vld [vmem:[%s4610_s2 + $0x68] sm:$0xff] }
 0x106   :  { %v181_v52 = vpop.f32.mrb[8].mxu0  ;;  %v589_v53 = vpop.f32.mrb[8].mxu1  ;;  %v1332_v45 = vld [vmem:[%s4611_s3 + $0x68] sm:$0xff] }
 0x107   :  { %v3721_v54 = vmax.f32 %v408_v50, %v816_v51  ;;  %v182_v55 = vadd.f32 %v3655_v5, %v181_v52  ;;  %v590_v56 = vadd.f32 %v3655_v5, %v589_v53  ;;  %v2185_v57 = vpop.f32.mrb[9].mxu0  ;;  %v2364_v58 = vpop.f32.mrb[9].mxu1  ;;  %2554 = vmatmul.mubr.f32.gmra.mrb[114].mxu0 %v919_v48  ;;  %2733 = vmatmul.mubr.f32.gmra.mrb[114].mxu1 %v1327_v49 }
 0x108   :  { %2556 = vmatprep.mubr.msk.f32.mxu0 %vm2957_vm0, %v2958_v6  ;;  %2735 = vmatprep.mubr.msk.f32.mxu1 %vm2957_vm0, %v2958_v6  ;;  %v1333_v57 = vld [vmem:[%s4611_s3 + $0x70] sm:$0xff] }
 0x109   :  { %v409_v61 = vmax.f32 %v182_v55, 0.0  ;;  %v817_v62 = vmax.f32 %v590_v56, 0.0  ;;  %v925_v56 = vld [vmem:[%s4610_s2 + $0x70] sm:$0xff] }
 0x10a   :  { %v186_v63 = vpop.f32.mrb[10].mxu0  ;;  %v594_v0 = vpop.f32.mrb[10].mxu1 }
 0x10b   :  { %v3735_v1 = vmax.f32 %v409_v61, %v817_v62  ;;  %v187_v2 = vadd.f32 %v3655_v5, %v186_v63  ;;  %v595_v3 = vadd.f32 %v3655_v5, %v594_v0  ;;  %v2188_v4 = vpop.f32.mrb[11].mxu0  ;;  %v2367_v7 = vpop.f32.mrb[11].mxu1  ;;  %2557 = vmatmul.mubr.f32.gmra.mrb[116].mxu0 %v920_v59  ;;  %2736 = vmatmul.mubr.f32.gmra.mrb[116].mxu1 %v1328_v60 }
 0x10c   :  { %2559 = vmatprep.mubr.msk.f32.mxu0 %vm2957_vm0, %v2958_v6  ;;  %2738 = vmatprep.mubr.msk.f32.mxu1 %vm2957_vm0, %v2958_v6  ;;  %v926_v4 = vld [vmem:[%s4610_s2 + $0x78] sm:$0xff] }
 0x10d   :  { %v410_v10 = vmax.f32 %v187_v2, 0.0  ;;  %v818_v11 = vmax.f32 %v595_v3, 0.0  ;;  %v1334_v7 = vld [vmem:[%s4611_s3 + $0x78] sm:$0xff] }
 0x10e   :  { %v191_v12 = vpop.f32.mrb[12].mxu0  ;;  %v599_v13 = vpop.f32.mrb[12].mxu1 }
 0x10f   :  { %v3749_v14 = vmax.f32 %v410_v10, %v818_v11  ;;  %v192_v15 = vadd.f32 %v3655_v5, %v191_v12  ;;  %v600_v16 = vadd.f32 %v3655_v5, %v599_v13  ;;  %v2191_v17 = vpop.f32.mrb[13].mxu0  ;;  %v2370_v18 = vpop.f32.mrb[13].mxu1  ;;  %2560 = vmatmul.mubr.f32.gmra.mrb[118].mxu0 %v921_v8  ;;  %2739 = vmatmul.mubr.f32.gmra.mrb[118].mxu1 %v1329_v9 }
 0x110   :  { %2562 = vmatprep.mubr.msk.f32.mxu0 %vm2957_vm0, %v2958_v6  ;;  %2741 = vmatprep.mubr.msk.f32.mxu1 %vm2957_vm0, %v2958_v6  ;;  %v927_v18 = vld [vmem:[%s4610_s2 + $0x80] sm:$0xff] }
 0x111   :  { %v411_v22 = vmax.f32 %v192_v15, 0.0  ;;  %v819_v23 = vmax.f32 %v600_v16, 0.0 }
 0x112   :  { %v196_v24 = vpop.f32.mrb[14].mxu0  ;;  %v604_v25 = vpop.f32.mrb[14].mxu1 }
 0x113   :  { %v3763_v26 = vmax.f32 %v411_v22, %v819_v23  ;;  %v197_v27 = vadd.f32 %v3655_v5, %v196_v24  ;;  %v605_v28 = vadd.f32 %v3655_v5, %v604_v25  ;;  %v2194_v29 = vpop.f32.mrb[15].mxu0  ;;  %v2373_v30 = vpop.f32.mrb[15].mxu1  ;;  %2563 = vmatmul.mubr.f32.gmra.mrb[120].mxu0 %v922_v19  ;;  %2742 = vmatmul.mubr.f32.gmra.mrb[120].mxu1 %v1330_v20  ;;  %v1335_v19 = vld [vmem:[%s4611_s3 + $0x80] sm:$0xff] }
 0x114   :  { %2565 = vmatprep.mubr.msk.f32.mxu0 %vm2957_vm0, %v2958_v6  ;;  %2744 = vmatprep.mubr.msk.f32.mxu1 %vm2957_vm0, %v2958_v6 }
 0x115   :  { %v412_v34 = vmax.f32 %v197_v27, 0.0  ;;  %v820_v35 = vmax.f32 %v605_v28, 0.0 }
 0x116   :  { %v201_v36 = vpop.f32.mrb[16].mxu0  ;;  %v609_v37 = vpop.f32.mrb[16].mxu1 }
 0x117   :  { %v3777_v38 = vmax.f32 %v412_v34, %v820_v35  ;;  %v202_v39 = vadd.f32 %v3655_v5, %v201_v36  ;;  %v610_v40 = vadd.f32 %v3655_v5, %v609_v37  ;;  %v2197_v41 = vpop.f32.mrb[17].mxu0  ;;  %v2376_v42 = vpop.f32.mrb[17].mxu1  ;;  %2566 = vmatmul.mubr.f32.gmra.mrb[122].mxu0 %v923_v31  ;;  %2745 = vmatmul.mubr.f32.gmra.mrb[122].mxu1 %v1331_v33  ;;  %v928_v31 = vld [vmem:[%s4610_s2 + $0x88] sm:$0xff] }
 0x118   :  { %2568 = vmatprep.mubr.msk.f32.mxu0 %vm2957_vm0, %v2958_v6  ;;  %2747 = vmatprep.mubr.msk.f32.mxu1 %vm2957_vm0, %v2958_v6  ;;  %v1336_v33 = vld [vmem:[%s4611_s3 + $0x88] sm:$0xff] }
 0x119   :  { %v413_v46 = vmax.f32 %v202_v39, 0.0  ;;  %v821_v47 = vmax.f32 %v610_v40, 0.0 }
 0x11a   :  { %v206_v48 = vpop.f32.mrb[18].mxu0  ;;  %v614_v49 = vpop.f32.mrb[18].mxu1 }
 0x11b   :  { %v3791_v50 = vmax.f32 %v413_v46, %v821_v47  ;;  %v207_v51 = vadd.f32 %v3655_v5, %v206_v48  ;;  %v615_v52 = vadd.f32 %v3655_v5, %v614_v49  ;;  %v2200_v53 = vpop.f32.mrb[19].mxu0  ;;  %v2379_v55 = vpop.f32.mrb[19].mxu1  ;;  %2569 = vmatmul.mubr.f32.gmra.mrb[124].mxu0 %v924_v44  ;;  %2748 = vmatmul.mubr.f32.gmra.mrb[124].mxu1 %v1332_v45  ;;  %v929_v45 = vld [vmem:[%s4610_s2 + $0x90] sm:$0xff] }
 0x11c   :  { %2571 = vmatprep.mubr.msk.f32.mxu0 %vm2957_vm0, %v2958_v6  ;;  %2750 = vmatprep.mubr.msk.f32.mxu1 %vm2957_vm0, %v2958_v6  ;;  %v1337_v46 = vld [vmem:[%s4611_s3 + $0x90] sm:$0xff] }
 0x11d   :  { %v414_v58 = vmax.f32 %v207_v51, 0.0  ;;  %v822_v59 = vmax.f32 %v615_v52, 0.0 }
 0x11e   :  { %v211_v60 = vpop.f32.mrb[20].mxu0  ;;  %v619_v61 = vpop.f32.mrb[20].mxu1 }
 0x11f   :  { %v3805_v62 = vmax.f32 %v414_v58, %v822_v59  ;;  %v212_v63 = vadd.f32 %v3655_v5, %v211_v60  ;;  %v620_v0 = vadd.f32 %v3655_v5, %v619_v61  ;;  %v2203_v2 = vpop.f32.mrb[21].mxu0  ;;  %v2382_v3 = vpop.f32.mrb[21].mxu1  ;;  %2572 = vmatmul.mubr.f32.gmra.mrb[126].mxu0 %v925_v56  ;;  %2751 = vmatmul.mubr.f32.gmra.mrb[126].mxu1 %v1333_v57  ;;  %v930_v58 = vld [vmem:[%s4610_s2 + $0x98] sm:$0xff] }
 0x120   :  { %2574 = vmatprep.mubr.msk.f32.mxu0 %vm2957_vm0, %v2958_v6  ;;  %2753 = vmatprep.mubr.msk.f32.mxu1 %vm2957_vm0, %v2958_v6  ;;  %v1338_v59 = vld [vmem:[%s4611_s3 + $0x98] sm:$0xff] }
 0x121   :  { %v415_v8 = vmax.f32 %v212_v63, 0.0  ;;  %v823_v9 = vmax.f32 %v620_v0, 0.0 }
 0x122   :  { %v216_v10 = vpop.f32.mrb[22].mxu0  ;;  %v624_v11 = vpop.f32.mrb[22].mxu1 }
 0x123   :  { %v3819_v12 = vmax.f32 %v415_v8, %v823_v9  ;;  %v217_v13 = vadd.f32 %v3655_v5, %v216_v10  ;;  %v625_v15 = vadd.f32 %v3655_v5, %v624_v11  ;;  %v2206_v16 = vpop.f32.mrb[23].mxu0  ;;  %v2385_v17 = vpop.f32.mrb[23].mxu1  ;;  %2575 = vmatmul.mubr.f32.gmra.mrb[128].mxu0 %v926_v4  ;;  %2754 = vmatmul.mubr.f32.gmra.mrb[128].mxu1 %v1334_v7  ;;  %v931_v9 = vld [vmem:[%s4610_s2 + $0xa0] sm:$0xff] }
 0x124   :  { %2577 = vmatprep.mubr.msk.f32.mxu0 %vm2957_vm0, %v2958_v6  ;;  %2756 = vmatprep.mubr.msk.f32.mxu1 %vm2957_vm0, %v2958_v6  ;;  %v1339_v10 = vld [vmem:[%s4611_s3 + $0xa0] sm:$0xff] }
 0x125   :  { %v416_v20 = vmax.f32 %v217_v13, 0.0  ;;  %v824_v22 = vmax.f32 %v625_v15, 0.0 }
 0x126   :  { %v221_v23 = vpop.f32.mrb[24].mxu0  ;;  %v629_v24 = vpop.f32.mrb[24].mxu1 }
 0x127   :  { %v3833_v25 = vmax.f32 %v416_v20, %v824_v22  ;;  %v222_v27 = vadd.f32 %v3655_v5, %v221_v23  ;;  %v630_v28 = vadd.f32 %v3655_v5, %v629_v24  ;;  %v2209_v29 = vpop.f32.mrb[25].mxu0  ;;  %v2388_v30 = vpop.f32.mrb[25].mxu1  ;;  %2578 = vmatmul.mubr.f32.gmra.mrb[130].mxu0 %v927_v18  ;;  %2757 = vmatmul.mubr.f32.gmra.mrb[130].mxu1 %v1335_v19  ;;  %v932_v23 = vld [vmem:[%s4610_s2 + $0xa8] sm:$0xff] }
 0x128   :  { %2580 = vmatprep.mubr.msk.f32.mxu0 %vm2957_vm0, %v2958_v6  ;;  %2759 = vmatprep.mubr.msk.f32.mxu1 %vm2957_vm0, %v2958_v6  ;;  %v1340_v24 = vld [vmem:[%s4611_s3 + $0xa8] sm:$0xff] }
 0x129   :  { %v417_v34 = vmax.f32 %v222_v27, 0.0  ;;  %v825_v35 = vmax.f32 %v630_v28, 0.0 }
 0x12a   :  { %v226_v36 = vpop.f32.mrb[26].mxu0  ;;  %v634_v37 = vpop.f32.mrb[26].mxu1 }
 0x12b   :  { %v3847_v39 = vmax.f32 %v417_v34, %v825_v35  ;;  %v227_v40 = vadd.f32 %v3655_v5, %v226_v36  ;;  %v635_v41 = vadd.f32 %v3655_v5, %v634_v37  ;;  %v2212_v42 = vpop.f32.mrb[27].mxu0  ;;  %v2391_v44 = vpop.f32.mrb[27].mxu1  ;;  %2581 = vmatmul.mubr.f32.gmra.mrb[132].mxu0 %v928_v31  ;;  %2760 = vmatmul.mubr.f32.gmra.mrb[132].mxu1 %v1336_v33  ;;  %v933_v37 = vld [vmem:[%s4610_s2 + $0xb0] sm:$0xff] }
 0x12c   :  { %2583 = vmatprep.mubr.msk.f32.mxu0 %vm2957_vm0, %v2958_v6  ;;  %2762 = vmatprep.mubr.msk.f32.mxu1 %vm2957_vm0, %v2958_v6 }
 0x12d   :  { %v418_v47 = vmax.f32 %v227_v40, 0.0  ;;  %v826_v48 = vmax.f32 %v635_v41, 0.0  ;;  %v1341_v40 = vld [vmem:[%s4611_s3 + $0xb0] sm:$0xff] }
 0x12e   :  { %v231_v49 = vpop.f32.mrb[28].mxu0  ;;  %v639_v51 = vpop.f32.mrb[28].mxu1 }
 0x12f   :  { %v3861_v52 = vmax.f32 %v418_v47, %v826_v48  ;;  %v232_v53 = vadd.f32 %v3655_v5, %v231_v49  ;;  %v640_v55 = vadd.f32 %v3655_v5, %v639_v51  ;;  %v2215_v56 = vpop.f32.mrb[29].mxu0  ;;  %v2394_v57 = vpop.f32.mrb[29].mxu1  ;;  %2584 = vmatmul.mubr.f32.gmra.mrb[134].mxu0 %v929_v45  ;;  %2763 = vmatmul.mubr.f32.gmra.mrb[134].mxu1 %v1337_v46 }
 0x130   :  { %2586 = vmatprep.mubr.msk.f32.mxu0 %vm2957_vm0, %v2958_v6  ;;  %2765 = vmatprep.mubr.msk.f32.mxu1 %vm2957_vm0, %v2958_v6 }
 0x131   :  { %v419_v60 = vmax.f32 %v232_v53, 0.0  ;;  %v827_v61 = vmax.f32 %v640_v55, 0.0  ;;  %v934_v53 = vld [vmem:[%s4610_s2 + $0xb8] sm:$0xff] }
 0x132   :  { %v236_v63 = vpop.f32.mrb[30].mxu0  ;;  %v644_v0 = vpop.f32.mrb[30].mxu1  ;;  %v1342_v55 = vld [vmem:[%s4611_s3 + $0xb8] sm:$0xff] }
 0x133   :  { %v3875_v2 = vmax.f32 %v419_v60, %v827_v61  ;;  %v237_v3 = vadd.f32 %v3655_v5, %v236_v63  ;;  %v645_v4 = vadd.f32 %v3655_v5, %v644_v0  ;;  %v2218_v7 = vpop.f32.mrb[31].mxu0  ;;  %v2397_v8 = vpop.f32.mrb[31].mxu1  ;;  %2587 = vmatmul.mubr.f32.gmra.mrb[136].mxu0 %v930_v58  ;;  %2766 = vmatmul.mubr.f32.gmra.mrb[136].mxu1 %v1338_v59 }
 0x134   :  { %2589 = vmatprep.mubr.msk.f32.mxu0 %vm2957_vm0, %v2958_v6  ;;  %2768 = vmatprep.mubr.msk.f32.mxu1 %vm2957_vm0, %v2958_v6  ;;  %v1343_v7 = vld [vmem:[%s4611_s3 + $0xc0] sm:$0xff] }
 0x135   :  { %v420_v11 = vmax.f32 %v237_v3, 0.0  ;;  %v828_v13 = vmax.f32 %v645_v4, 0.0  ;;  %v935_v4 = vld [vmem:[%s4610_s2 + $0xc0] sm:$0xff] }
 0x136   :  { %v241_v15 = vpop.f32.mrb[32].mxu0  ;;  %v649_v16 = vpop.f32.mrb[32].mxu1 }
 0x137   :  { %v3889_v17 = vmax.f32 %v420_v11, %v828_v13  ;;  %v242_v18 = vadd.f32 %v3655_v5, %v241_v15  ;;  %v650_v19 = vadd.f32 %v3655_v5, %v649_v16  ;;  %v2221_v20 = vpop.f32.mrb[33].mxu0  ;;  %v2400_v22 = vpop.f32.mrb[33].mxu1  ;;  %2590 = vmatmul.mubr.f32.gmra.mrb[138].mxu0 %v931_v9  ;;  %2769 = vmatmul.mubr.f32.gmra.mrb[138].mxu1 %v1339_v10 }
 0x138   :  { %2592 = vmatprep.mubr.msk.f32.mxu0 %vm2957_vm0, %v2958_v6  ;;  %2771 = vmatprep.mubr.msk.f32.mxu1 %vm2957_vm0, %v2958_v6  ;;  %v936_v20 = vld [vmem:[%s4610_s2 + $0xc8] sm:$0xff] }
 0x139   :  { %v421_v27 = vmax.f32 %v242_v18, 0.0  ;;  %v829_v28 = vmax.f32 %v650_v19, 0.0  ;;  %v1344_v22 = vld [vmem:[%s4611_s3 + $0xc8] sm:$0xff] }
 0x13a   :  { %v246_v29 = vpop.f32.mrb[34].mxu0  ;;  %v654_v30 = vpop.f32.mrb[34].mxu1 }
 0x13b   :  { %v3903_v31 = vmax.f32 %v421_v27, %v829_v28  ;;  %v247_v33 = vadd.f32 %v3655_v5, %v246_v29  ;;  %v655_v34 = vadd.f32 %v3655_v5, %v654_v30  ;;  %v2224_v35 = vpop.f32.mrb[35].mxu0  ;;  %v2403_v36 = vpop.f32.mrb[35].mxu1  ;;  %2593 = vmatmul.mubr.f32.gmra.mrb[140].mxu0 %v932_v23  ;;  %2772 = vmatmul.mubr.f32.gmra.mrb[140].mxu1 %v1340_v24 }
 0x13c   :  { %2595 = vmatprep.mubr.msk.f32.mxu0 %vm2957_vm0, %v2958_v6  ;;  %2774 = vmatprep.mubr.msk.f32.mxu1 %vm2957_vm0, %v2958_v6  ;;  %v937_v36 = vld [vmem:[%s4610_s2 + $0xd0] sm:$0xff] }
 0x13d   :  { %v422_v41 = vmax.f32 %v247_v33, 0.0  ;;  %v830_v42 = vmax.f32 %v655_v34, 0.0 }
 0x13e   :  { %v251_v44 = vpop.f32.mrb[36].mxu0  ;;  %v659_v45 = vpop.f32.mrb[36].mxu1 }
 0x13f   :  { %v3917_v46 = vmax.f32 %v422_v41, %v830_v42  ;;  %v252_v47 = vadd.f32 %v3655_v5, %v251_v44  ;;  %v660_v48 = vadd.f32 %v3655_v5, %v659_v45  ;;  %v2227_v49 = vpop.f32.mrb[37].mxu0  ;;  %v2406_v51 = vpop.f32.mrb[37].mxu1  ;;  %2596 = vmatmul.mubr.f32.gmra.mrb[142].mxu0 %v933_v37  ;;  %2775 = vmatmul.mubr.f32.gmra.mrb[142].mxu1 %v1341_v40  ;;  %v1345_v37 = vld [vmem:[%s4611_s3 + $0xd0] sm:$0xff] }
 0x140   :  { %2598 = vmatprep.mubr.msk.f32.mxu0 %vm2957_vm0, %v2958_v6  ;;  %2777 = vmatprep.mubr.msk.f32.mxu1 %vm2957_vm0, %v2958_v6 }
 0x141   :  { %v423_v56 = vmax.f32 %v252_v47, 0.0  ;;  %v831_v57 = vmax.f32 %v660_v48, 0.0 }
 0x142   :  { %v256_v58 = vpop.f32.mrb[38].mxu0  ;;  %v664_v59 = vpop.f32.mrb[38].mxu1 }
 0x143   :  { %v3931_v60 = vmax.f32 %v423_v56, %v831_v57  ;;  %v257_v61 = vadd.f32 %v3655_v5, %v256_v58  ;;  %v665_v63 = vadd.f32 %v3655_v5, %v664_v59  ;;  %v2230_v0 = vpop.f32.mrb[39].mxu0  ;;  %v2409_v3 = vpop.f32.mrb[39].mxu1  ;;  %2599 = vmatmul.mubr.f32.gmra.mrb[144].mxu0 %v934_v53  ;;  %2778 = vmatmul.mubr.f32.gmra.mrb[144].mxu1 %v1342_v55  ;;  %v938_v53 = vld [vmem:[%s4610_s2 + $0xd8] sm:$0xff] }
 0x144   :  { %2601 = vmatprep.mubr.msk.f32.mxu0 %vm2957_vm0, %v2958_v6  ;;  %2780 = vmatprep.mubr.msk.f32.mxu1 %vm2957_vm0, %v2958_v6  ;;  %v1346_v55 = vld [vmem:[%s4611_s3 + $0xd8] sm:$0xff] }
 0x145   :  { %v424_v8 = vmax.f32 %v257_v61, 0.0  ;;  %v832_v9 = vmax.f32 %v665_v63, 0.0 }
 0x146   :  { %v261_v10 = vpop.f32.mrb[40].mxu0  ;;  %v669_v11 = vpop.f32.mrb[40].mxu1 }
 0x147   :  { %v3945_v13 = vmax.f32 %v424_v8, %v832_v9  ;;  %v262_v15 = vadd.f32 %v3655_v5, %v261_v10  ;;  %v670_v16 = vadd.f32 %v3655_v5, %v669_v11  ;;  %v2233_v18 = vpop.f32.mrb[41].mxu0  ;;  %v2412_v19 = vpop.f32.mrb[41].mxu1  ;;  %2602 = vmatmul.mubr.f32.gmra.mrb[146].mxu0 %v935_v4  ;;  %2781 = vmatmul.mubr.f32.gmra.mrb[146].mxu1 %v1343_v7  ;;  %v939_v7 = vld [vmem:[%s4610_s2 + $0xe0] sm:$0xff] }
 0x148   :  { %2604 = vmatprep.mubr.msk.f32.mxu0 %vm2957_vm0, %v2958_v6  ;;  %2783 = vmatprep.mubr.msk.f32.mxu1 %vm2957_vm0, %v2958_v6  ;;  %v1347_v8 = vld [vmem:[%s4611_s3 + $0xe0] sm:$0xff] }
 0x149   :  { %v425_v23 = vmax.f32 %v262_v15, 0.0  ;;  %v833_v24 = vmax.f32 %v670_v16, 0.0 }
 0x14a   :  { %v266_v27 = vpop.f32.mrb[42].mxu0  ;;  %v674_v28 = vpop.f32.mrb[42].mxu1 }
 0x14b   :  { %v3959_v29 = vmax.f32 %v425_v23, %v833_v24  ;;  %v267_v30 = vadd.f32 %v3655_v5, %v266_v27  ;;  %v675_v33 = vadd.f32 %v3655_v5, %v674_v28  ;;  %v2236_v34 = vpop.f32.mrb[43].mxu0  ;;  %v2415_v35 = vpop.f32.mrb[43].mxu1  ;;  %2605 = vmatmul.mubr.f32.gmra.mrb[148].mxu0 %v936_v20  ;;  %2784 = vmatmul.mubr.f32.gmra.mrb[148].mxu1 %v1344_v22  ;;  %v940_v23 = vld [vmem:[%s4610_s2 + $0xe8] sm:$0xff] }
 0x14c   :  { %2607 = vmatprep.mubr.msk.f32.mxu0 %vm2957_vm0, %v2958_v6  ;;  %2786 = vmatprep.mubr.msk.f32.mxu1 %vm2957_vm0, %v2958_v6  ;;  %v1348_v24 = vld [vmem:[%s4611_s3 + $0xe8] sm:$0xff] }
 0x14d   :  { %v426_v40 = vmax.f32 %v267_v30, 0.0  ;;  %v834_v41 = vmax.f32 %v675_v33, 0.0 }
 0x14e   :  { %v271_v42 = vpop.f32.mrb[44].mxu0  ;;  %v679_v44 = vpop.f32.mrb[44].mxu1 }
 0x14f   :  { %v3973_v45 = vmax.f32 %v426_v40, %v834_v41  ;;  %v272_v47 = vadd.f32 %v3655_v5, %v271_v42  ;;  %v680_v48 = vadd.f32 %v3655_v5, %v679_v44  ;;  %v2239_v49 = vpop.f32.mrb[45].mxu0  ;;  %v2418_v51 = vpop.f32.mrb[45].mxu1  ;;  %2608 = vmatmul.mubr.f32.gmra.mrb[150].mxu0 %v937_v36  ;;  %2787 = vmatmul.mubr.f32.gmra.mrb[150].mxu1 %v1345_v37  ;;  %v941_v41 = vld [vmem:[%s4610_s2 + $0xf0] sm:$0xff] }
 0x150   :  { %2610 = vmatprep.mubr.msk.f32.mxu0 %vm2957_vm0, %v2958_v6  ;;  %2789 = vmatprep.mubr.msk.f32.mxu1 %vm2957_vm0, %v2958_v6  ;;  %v1349_v42 = vld [vmem:[%s4611_s3 + $0xf0] sm:$0xff] }
 0x151   :  { %v427_v56 = vmax.f32 %v272_v47, 0.0  ;;  %v835_v57 = vmax.f32 %v680_v48, 0.0 }
 0x152   :  { %v276_v58 = vpop.f32.mrb[46].mxu0  ;;  %v684_v59 = vpop.f32.mrb[46].mxu1 }
 0x153   :  { %v3987_v61 = vmax.f32 %v427_v56, %v835_v57  ;;  %v277_v63 = vadd.f32 %v3655_v5, %v276_v58  ;;  %v685_v0 = vadd.f32 %v3655_v5, %v684_v59  ;;  %v2242_v3 = vpop.f32.mrb[47].mxu0  ;;  %v2421_v4 = vpop.f32.mrb[47].mxu1  ;;  %2611 = vmatmul.mubr.f32.gmra.mrb[152].mxu0 %v938_v53  ;;  %2790 = vmatmul.mubr.f32.gmra.mrb[152].mxu1 %v1346_v55  ;;  %v942_v58 = vld [vmem:[%s4610_s2 + $0xf8] sm:$0xff] }
 0x154   :  { %2613 = vmatprep.mubr.msk.f32.mxu0 %vm2957_vm0, %v2958_v6  ;;  %2792 = vmatprep.mubr.msk.f32.mxu1 %vm2957_vm0, %v2958_v6  ;;  %v1350_v59 = vld [vmem:[%s4611_s3 + $0xf8] sm:$0xff] }
 0x155   :  { %v428_v9 = vmax.f32 %v277_v63, 0.0  ;;  %v836_v10 = vmax.f32 %v685_v0, 0.0 }
 0x156   :  { %v281_v11 = vpop.f32.mrb[48].mxu0  ;;  %v689_v15 = vpop.f32.mrb[48].mxu1 }
 0x157   :  { %v4001_v16 = vmax.f32 %v428_v9, %v836_v10  ;;  %v282_v18 = vadd.f32 %v3655_v5, %v281_v11  ;;  %v690_v19 = vadd.f32 %v3655_v5, %v689_v15  ;;  %v2245_v20 = vpop.f32.mrb[49].mxu0  ;;  %v2424_v22 = vpop.f32.mrb[49].mxu1  ;;  %2614 = vmatmul.mubr.f32.gmra.mrb[154].mxu0 %v939_v7  ;;  %2793 = vmatmul.mubr.f32.gmra.mrb[154].mxu1 %v1347_v8  ;;  %v943_v15 = vld [vmem:[%s4610_s2 + $0x100] sm:$0xff] }
 0x158   :  { %2616 = vmatprep.mubr.msk.f32.mxu0 %vm2957_vm0, %v2958_v6  ;;  %2795 = vmatprep.mubr.msk.f32.mxu1 %vm2957_vm0, %v2958_v6 }
 0x159   :  { %v429_v27 = vmax.f32 %v282_v18, 0.0  ;;  %v837_v28 = vmax.f32 %v690_v19, 0.0  ;;  %v1351_v18 = vld [vmem:[%s4611_s3 + $0x100] sm:$0xff] }
 0x15a   :  { %v286_v30 = vpop.f32.mrb[50].mxu0  ;;  %v694_v33 = vpop.f32.mrb[50].mxu1 }
 0x15b   :  { %v4015_v34 = vmax.f32 %v429_v27, %v837_v28  ;;  %v287_v35 = vadd.f32 %v3655_v5, %v286_v30  ;;  %v695_v36 = vadd.f32 %v3655_v5, %v694_v33  ;;  %v2248_v37 = vpop.f32.mrb[51].mxu0  ;;  %v2427_v40 = vpop.f32.mrb[51].mxu1  ;;  %2617 = vmatmul.mubr.f32.gmra.mrb[156].mxu0 %v940_v23  ;;  %2796 = vmatmul.mubr.f32.gmra.mrb[156].mxu1 %v1348_v24 }
 0x15c   :  { %2619 = vmatprep.mubr.msk.f32.mxu0 %vm2957_vm0, %v2958_v6  ;;  %2798 = vmatprep.mubr.msk.f32.mxu1 %vm2957_vm0, %v2958_v6 }
 0x15d   :  { %v430_v44 = vmax.f32 %v287_v35, 0.0  ;;  %v838_v47 = vmax.f32 %v695_v36, 0.0  ;;  %v944_v35 = vld [vmem:[%s4610_s2 + $0x108] sm:$0xff] }
 0x15e   :  { %v291_v48 = vpop.f32.mrb[52].mxu0  ;;  %v699_v49 = vpop.f32.mrb[52].mxu1  ;;  %v1352_v36 = vld [vmem:[%s4611_s3 + $0x108] sm:$0xff] }
 0x15f   :  { %v4029_v51 = vmax.f32 %v430_v44, %v838_v47  ;;  %v292_v53 = vadd.f32 %v3655_v5, %v291_v48  ;;  %v700_v55 = vadd.f32 %v3655_v5, %v699_v49  ;;  %v2251_v56 = vpop.f32.mrb[53].mxu0  ;;  %v2430_v57 = vpop.f32.mrb[53].mxu1  ;;  %2620 = vmatmul.mubr.f32.gmra.mrb[158].mxu0 %v941_v41  ;;  %2799 = vmatmul.mubr.f32.gmra.mrb[158].mxu1 %v1349_v42 }
 0x160   :  { %2622 = vmatprep.mubr.msk.f32.mxu0 %vm2957_vm0, %v2958_v6  ;;  %2801 = vmatprep.mubr.msk.f32.mxu1 %vm2957_vm0, %v2958_v6  ;;  %v1353_v56 = vld [vmem:[%s4611_s3 + $0x110] sm:$0xff] }
 0x161   :  { %v431_v63 = vmax.f32 %v292_v53, 0.0  ;;  %v839_v0 = vmax.f32 %v700_v55, 0.0  ;;  %v945_v55 = vld [vmem:[%s4610_s2 + $0x110] sm:$0xff] }
 0x162   :  { %v296_v3 = vpop.f32.mrb[54].mxu0  ;;  %v704_v4 = vpop.f32.mrb[54].mxu1 }
 0x163   :  { %v4043_v7 = vmax.f32 %v431_v63, %v839_v0  ;;  %v297_v8 = vadd.f32 %v3655_v5, %v296_v3  ;;  %v705_v9 = vadd.f32 %v3655_v5, %v704_v4  ;;  %v2254_v10 = vpop.f32.mrb[55].mxu0  ;;  %v2433_v11 = vpop.f32.mrb[55].mxu1  ;;  %2623 = vmatmul.mubr.f32.gmra.mrb[160].mxu0 %v942_v58  ;;  %2802 = vmatmul.mubr.f32.gmra.mrb[160].mxu1 %v1350_v59 }
 0x164   :  { %2625 = vmatprep.mubr.msk.f32.mxu0 %vm2957_vm0, %v2958_v6  ;;  %2804 = vmatprep.mubr.msk.f32.mxu1 %vm2957_vm0, %v2958_v6  ;;  %v946_v10 = vld [vmem:[%s4610_s2 + $0x118] sm:$0xff] }
 0x165   :  { %v432_v19 = vmax.f32 %v297_v8, 0.0  ;;  %v840_v20 = vmax.f32 %v705_v9, 0.0  ;;  %v1354_v11 = vld [vmem:[%s4611_s3 + $0x118] sm:$0xff] }
 0x166   :  { %v301_v22 = vpop.f32.mrb[56].mxu0  ;;  %v709_v23 = vpop.f32.mrb[56].mxu1 }
 0x167   :  { %v4057_v24 = vmax.f32 %v432_v19, %v840_v20  ;;  %v302_v27 = vadd.f32 %v3655_v5, %v301_v22  ;;  %v710_v28 = vadd.f32 %v3655_v5, %v709_v23  ;;  %v2257_v30 = vpop.f32.mrb[57].mxu0  ;;  %v2436_v33 = vpop.f32.mrb[57].mxu1  ;;  %2626 = vmatmul.mubr.f32.gmra.mrb[162].mxu0 %v943_v15  ;;  %2805 = vmatmul.mubr.f32.gmra.mrb[162].mxu1 %v1351_v18 }
 0x168   :  { %2628 = vmatprep.mubr.msk.f32.mxu0 %vm2957_vm0, %v2958_v6  ;;  %2807 = vmatprep.mubr.msk.f32.mxu1 %vm2957_vm0, %v2958_v6  ;;  %v947_v33 = vld [vmem:[%s4610_s2 + $0x120] sm:$0xff] }
 0x169   :  { %v433_v37 = vmax.f32 %v302_v27, 0.0  ;;  %v841_v40 = vmax.f32 %v710_v28, 0.0 }
 0x16a   :  { %v306_v41 = vpop.f32.mrb[58].mxu0  ;;  %v714_v42 = vpop.f32.mrb[58].mxu1 }
 0x16b   :  { %v4071_v44 = vmax.f32 %v433_v37, %v841_v40  ;;  %v307_v47 = vadd.f32 %v3655_v5, %v306_v41  ;;  %v715_v48 = vadd.f32 %v3655_v5, %v714_v42  ;;  %v2260_v49 = vpop.f32.mrb[59].mxu0  ;;  %v2439_v53 = vpop.f32.mrb[59].mxu1  ;;  %2629 = vmatmul.mubr.f32.gmra.mrb[164].mxu0 %v944_v35  ;;  %2808 = vmatmul.mubr.f32.gmra.mrb[164].mxu1 %v1352_v36  ;;  %v1355_v35 = vld [vmem:[%s4611_s3 + $0x120] sm:$0xff] }
 0x16c   :  { %2631 = vmatprep.mubr.msk.f32.mxu0 %vm2957_vm0, %v2958_v6  ;;  %2810 = vmatprep.mubr.msk.f32.mxu1 %vm2957_vm0, %v2958_v6 }
 0x16d   :  { %v434_v57 = vmax.f32 %v307_v47, 0.0  ;;  %v842_v58 = vmax.f32 %v715_v48, 0.0 }
 0x16e   :  { %v311_v59 = vpop.f32.mrb[60].mxu0  ;;  %v719_v63 = vpop.f32.mrb[60].mxu1 }
 0x16f   :  { %v4085_v0 = vmax.f32 %v434_v57, %v842_v58  ;;  %v312_v3 = vadd.f32 %v3655_v5, %v311_v59  ;;  %v720_v4 = vadd.f32 %v3655_v5, %v719_v63  ;;  %v2263_v8 = vpop.f32.mrb[61].mxu0  ;;  %v2442_v9 = vpop.f32.mrb[61].mxu1  ;;  %2632 = vmatmul.mubr.f32.gmra.mrb[166].mxu0 %v945_v55  ;;  %2811 = vmatmul.mubr.f32.gmra.mrb[166].mxu1 %v1353_v56  ;;  %v948_v55 = vld [vmem:[%s4610_s2 + $0x128] sm:$0xff] }
 0x170   :  { %2634 = vmatprep.mubr.msk.f32.mxu0 %vm2957_vm0, %v2958_v6  ;;  %2813 = vmatprep.mubr.msk.f32.mxu1 %vm2957_vm0, %v2958_v6  ;;  %v1356_v56 = vld [vmem:[%s4611_s3 + $0x128] sm:$0xff] }
 0x171   :  { %v435_v15 = vmax.f32 %v312_v3, 0.0  ;;  %v843_v18 = vmax.f32 %v720_v4, 0.0 }
 0x172   :  { %v316_v19 = vpop.f32.mrb[62].mxu0  ;;  %v724_v20 = vpop.f32.mrb[62].mxu1 }
 0x173   :  { %v4099_v22 = vmax.f32 %v435_v15, %v843_v18  ;;  %v317_v23 = vadd.f32 %v3655_v5, %v316_v19  ;;  %v725_v27 = vadd.f32 %v3655_v5, %v724_v20  ;;  %v2266_v28 = vpop.f32.mrb[63].mxu0  ;;  %v2445_v30 = vpop.f32.mrb[63].mxu1  ;;  %2635 = vmatmul.mubr.f32.gmra.mrb[168].mxu0 %v946_v10  ;;  %2814 = vmatmul.mubr.f32.gmra.mrb[168].mxu1 %v1354_v11  ;;  %v949_v11 = vld [vmem:[%s4610_s2 + $0x130] sm:$0xff] }
 0x174   :  { %2637 = vmatprep.mubr.msk.f32.mxu0 %vm2957_vm0, %v2958_v6  ;;  %2816 = vmatprep.mubr.msk.f32.mxu1 %vm2957_vm0, %v2958_v6  ;;  %v1357_v15 = vld [vmem:[%s4611_s3 + $0x130] sm:$0xff] }
 0x175   :  { %v436_v36 = vmax.f32 %v317_v23, 0.0  ;;  %v844_v37 = vmax.f32 %v725_v27, 0.0  ;;  %v4146_v27 = vld [vmem:[%s4612_s5] ss:$0 sm:$0xff] }
 0x176   :  { %v321_v40 = vpop.f32.mrb[64].mxu0  ;;  %v729_v41 = vpop.f32.mrb[64].mxu1 }
 0x177   :  { %v4113_v42 = vmax.f32 %v436_v36, %v844_v37  ;;  %v322_v47 = vadd.f32 %v3655_v5, %v321_v40  ;;  %v730_v48 = vadd.f32 %v3655_v5, %v729_v41  ;;  %v2269_v49 = vpop.f32.mrb[65].mxu0  ;;  %v2448_v53 = vpop.f32.mrb[65].mxu1  ;;  %2638 = vmatmul.mubr.f32.gmra.mrb[170].mxu0 %v947_v33  ;;  %2817 = vmatmul.mubr.f32.gmra.mrb[170].mxu1 %v1355_v35  ;;  %v950_v36 = vld [vmem:[%s4610_s2 + $0x138] sm:$0xff] }
 0x178   :  { %2640 = vmatprep.mubr.msk.f32.mxu0 %vm2957_vm0, %v2958_v6  ;;  %2819 = vmatprep.mubr.msk.f32.mxu1 %vm2957_vm0, %v2958_v6  ;;  %v1358_v37 = vld [vmem:[%s4611_s3 + $0x138] sm:$0xff] }
 0x179   :  { %v437_v57 = vmax.f32 %v322_v47, 0.0  ;;  %v845_v58 = vmax.f32 %v730_v48, 0.0 }
 0x17a   :  { %v326_v59 = vpop.f32.mrb[66].mxu0  ;;  %v734_v63 = vpop.f32.mrb[66].mxu1 }
 0x17b   :  { %v4127_v3 = vmax.f32 %v437_v57, %v845_v58  ;;  %v327_v4 = vadd.f32 %v3655_v5, %v326_v59  ;;  %v735_v8 = vadd.f32 %v3655_v5, %v734_v63  ;;  %v2272_v9 = vpop.f32.mrb[67].mxu0  ;;  %v2451_v10 = vpop.f32.mrb[67].mxu1  ;;  %2641 = vmatmul.mubr.f32.gmra.mrb[172].mxu0 %v948_v55  ;;  %2820 = vmatmul.mubr.f32.gmra.mrb[172].mxu1 %v1356_v56  ;;  %v951_v58 = vld [vmem:[%s4610_s2 + $0x140] sm:$0xff] }
 0x17c   :  { %2643 = vmatprep.mubr.msk.f32.mxu0 %vm2957_vm0, %v2958_v6  ;;  %2822 = vmatprep.mubr.msk.f32.mxu1 %vm2957_vm0, %v2958_v6  ;;  %v1359_v59 = vld [vmem:[%s4611_s3 + $0x140] sm:$0xff] }
 0x17d   :  { %v438_v18 = vmax.f32 %v327_v4, 0.0  ;;  %v846_v5 = vmax.f32 %v735_v8, 0.0 }
 0x17e   :  { %v331_v19 = vpop.f32.mrb[68].mxu0  ;;  %v739_v20 = vpop.f32.mrb[68].mxu1 }
 0x17f   :  { %v4141_v23 = vmax.f32 %v438_v18, %v846_v5  ;;  %v332_v28 = vadd.f32 %v4146_v27, %v331_v19  ;;  %v740_v30 = vadd.f32 %v4146_v27, %v739_v20  ;;  %v2275_v33 = vpop.f32.mrb[69].mxu0  ;;  %v2454_v35 = vpop.f32.mrb[69].mxu1  ;;  %2644 = vmatmul.mubr.f32.gmra.mrb[174].mxu0 %v949_v11  ;;  %2823 = vmatmul.mubr.f32.gmra.mrb[174].mxu1 %v1357_v15  ;;  %v952_v19 = vld [vmem:[%s4610_s2 + $0x148] sm:$0xff] }
 0x180   :  { %2646 = vmatprep.mubr.msk.f32.mxu0 %vm2957_vm0, %v2958_v6  ;;  %2825 = vmatprep.mubr.msk.f32.mxu1 %vm2957_vm0, %v2958_v6  ;;  %v1360_v20 = vld [vmem:[%s4611_s3 + $0x148] sm:$0xff] }
 0x181   :  { %v439_v40 = vmax.f32 %v332_v28, 0.0  ;;  %v847_v41 = vmax.f32 %v740_v30, 0.0 }
 0x182   :  { %v336_v47 = vpop.f32.mrb[70].mxu0  ;;  %v744_v48 = vpop.f32.mrb[70].mxu1 }
 0x183   :  { %v4160_v49 = vmax.f32 %v439_v40, %v847_v41  ;;  %v337_v53 = vadd.f32 %v4146_v27, %v336_v47  ;;  %v745_v55 = vadd.f32 %v4146_v27, %v744_v48  ;;  %v2278_v56 = vpop.f32.mrb[71].mxu0  ;;  %v2457_v57 = vpop.f32.mrb[71].mxu1  ;;  %2647 = vmatmul.mubr.f32.gmra.mrb[176].mxu0 %v950_v36  ;;  %2826 = vmatmul.mubr.f32.gmra.mrb[176].mxu1 %v1358_v37  ;;  %v953_v48 = vld [vmem:[%s4610_s2 + $0x150] sm:$0xff] }
 0x184   :  { %2649 = vmatprep.mubr.msk.f32.mxu0 %vm2957_vm0, %v2958_v6  ;;  %2828 = vmatprep.mubr.msk.f32.mxu1 %vm2957_vm0, %v2958_v6 }
 0x185   :  { %v440_v63 = vmax.f32 %v337_v53, 0.0  ;;  %v848_v4 = vmax.f32 %v745_v55, 0.0  ;;  %v1361_v53 = vld [vmem:[%s4611_s3 + $0x150] sm:$0xff] }
 0x186   :  { %v341_v8 = vpop.f32.mrb[72].mxu0  ;;  %v749_v9 = vpop.f32.mrb[72].mxu1 }
 0x187   :  { %v4174_v10 = vmax.f32 %v440_v63, %v848_v4  ;;  %v342_v11 = vadd.f32 %v4146_v27, %v341_v8  ;;  %v750_v15 = vadd.f32 %v4146_v27, %v749_v9  ;;  %v2281_v18 = vpop.f32.mrb[73].mxu0  ;;  %v2460_v5 = vpop.f32.mrb[73].mxu1  ;;  %2650 = vmatmul.mubr.f32.gmra.mrb[178].mxu0 %v951_v58  ;;  %2829 = vmatmul.mubr.f32.gmra.mrb[178].mxu1 %v1359_v59 }
 0x188   :  { %2652 = vmatprep.mubr.msk.f32.mxu0 %vm2957_vm0, %v2958_v6  ;;  %2831 = vmatprep.mubr.msk.f32.mxu1 %vm2957_vm0, %v2958_v6 }
 0x189   :  { %v441_v28 = vmax.f32 %v342_v11, 0.0  ;;  %v849_v30 = vmax.f32 %v750_v15, 0.0  ;;  %v954_v11 = vld [vmem:[%s4610_s2 + $0x158] sm:$0xff] }
 0x18a   :  { %v346_v33 = vpop.f32.mrb[74].mxu0  ;;  %v754_v35 = vpop.f32.mrb[74].mxu1  ;;  %v1362_v15 = vld [vmem:[%s4611_s3 + $0x158] sm:$0xff] }
 0x18b   :  { %v4188_v36 = vmax.f32 %v441_v28, %v849_v30  ;;  %v347_v37 = vadd.f32 %v4146_v27, %v346_v33  ;;  %v755_v40 = vadd.f32 %v4146_v27, %v754_v35  ;;  %v2284_v41 = vpop.f32.mrb[75].mxu0  ;;  %v2463_v47 = vpop.f32.mrb[75].mxu1  ;;  %2653 = vmatmul.mubr.f32.gmra.mrb[180].mxu0 %v952_v19  ;;  %2832 = vmatmul.mubr.f32.gmra.mrb[180].mxu1 %v1360_v20 }
 0x18c   :  { %2655 = vmatprep.mubr.msk.f32.mxu0 %vm2957_vm0, %v2958_v6  ;;  %2834 = vmatprep.mubr.msk.f32.mxu1 %vm2957_vm0, %v2958_v6  ;;  %v1363_v41 = vld [vmem:[%s4611_s3 + $0x160] sm:$0xff] }
 0x18d   :  { %v442_v55 = vmax.f32 %v347_v37, 0.0  ;;  %v850_v56 = vmax.f32 %v755_v40, 0.0  ;;  %v955_v40 = vld [vmem:[%s4610_s2 + $0x160] sm:$0xff] }
 0x18e   :  { %v351_v57 = vpop.f32.mrb[76].mxu0  ;;  %v759_v58 = vpop.f32.mrb[76].mxu1 }
 0x18f   :  { %v4202_v59 = vmax.f32 %v442_v55, %v850_v56  ;;  %v352_v63 = vadd.f32 %v4146_v27, %v351_v57  ;;  %v760_v4 = vadd.f32 %v4146_v27, %v759_v58  ;;  %v2287_v8 = vpop.f32.mrb[77].mxu0  ;;  %v2466_v9 = vpop.f32.mrb[77].mxu1  ;;  %2656 = vmatmul.mubr.f32.gmra.mrb[182].mxu0 %v953_v48  ;;  %2835 = vmatmul.mubr.f32.gmra.mrb[182].mxu1 %v1361_v53 }
 0x190   :  { %2658 = vmatprep.mubr.msk.f32.mxu0 %vm2957_vm0, %v2958_v6  ;;  %2837 = vmatprep.mubr.msk.f32.mxu1 %vm2957_vm0, %v2958_v6  ;;  %v956_v8 = vld [vmem:[%s4610_s2 + $0x168] sm:$0xff] }
 0x191   :  { %v443_v18 = vmax.f32 %v352_v63, 0.0  ;;  %v851_v5 = vmax.f32 %v760_v4, 0.0  ;;  %v1364_v9 = vld [vmem:[%s4611_s3 + $0x168] sm:$0xff] }
 0x192   :  { %v356_v19 = vpop.f32.mrb[78].mxu0  ;;  %v764_v20 = vpop.f32.mrb[78].mxu1 }
 0x193   :  { %v4216_v28 = vmax.f32 %v443_v18, %v851_v5  ;;  %v357_v30 = vadd.f32 %v4146_v27, %v356_v19  ;;  %v765_v33 = vadd.f32 %v4146_v27, %v764_v20  ;;  %v2290_v35 = vpop.f32.mrb[79].mxu0  ;;  %v2469_v37 = vpop.f32.mrb[79].mxu1  ;;  %2659 = vmatmul.mubr.f32.gmra.mrb[184].mxu0 %v954_v11  ;;  %2838 = vmatmul.mubr.f32.gmra.mrb[184].mxu1 %v1362_v15 }
 0x194   :  { %2661 = vmatprep.mubr.msk.f32.mxu0 %vm2957_vm0, %v2958_v6  ;;  %2840 = vmatprep.mubr.msk.f32.mxu1 %vm2957_vm0, %v2958_v6  ;;  %v957_v37 = vld [vmem:[%s4610_s2 + $0x170] sm:$0xff] }
 0x195   :  { %v444_v47 = vmax.f32 %v357_v30, 0.0  ;;  %v852_v48 = vmax.f32 %v765_v33, 0.0 }
 0x196   :  { %v361_v53 = vpop.f32.mrb[80].mxu0  ;;  %v769_v55 = vpop.f32.mrb[80].mxu1 }
 0x197   :  { %v4230_v56 = vmax.f32 %v444_v47, %v852_v48  ;;  %v362_v57 = vadd.f32 %v4146_v27, %v361_v53  ;;  %v770_v58 = vadd.f32 %v4146_v27, %v769_v55  ;;  %v2293_v63 = vpop.f32.mrb[81].mxu0  ;;  %v2472_v4 = vpop.f32.mrb[81].mxu1  ;;  %2662 = vmatmul.mubr.f32.gmra.mrb[186].mxu0 %v955_v40  ;;  %2841 = vmatmul.mubr.f32.gmra.mrb[186].mxu1 %v1363_v41  ;;  %v1365_v40 = vld [vmem:[%s4611_s3 + $0x170] sm:$0xff] }
 0x198   :  { %2664 = vmatprep.mubr.msk.f32.mxu0 %vm2957_vm0, %v2958_v6  ;;  %2843 = vmatprep.mubr.msk.f32.mxu1 %vm2957_vm0, %v2958_v6 }
 0x199   :  { %v445_v11 = vmax.f32 %v362_v57, 0.0  ;;  %v853_v15 = vmax.f32 %v770_v58, 0.0 }
 0x19a   :  { %v366_v18 = vpop.f32.mrb[82].mxu0  ;;  %v774_v5 = vpop.f32.mrb[82].mxu1 }
 0x19b   :  { %v4244_v19 = vmax.f32 %v445_v11, %v853_v15  ;;  %v367_v20 = vadd.f32 %v4146_v27, %v366_v18  ;;  %v775_v30 = vadd.f32 %v4146_v27, %v774_v5  ;;  %v2296_v33 = vpop.f32.mrb[83].mxu0  ;;  %v2475_v35 = vpop.f32.mrb[83].mxu1  ;;  %2665 = vmatmul.mubr.f32.gmra.mrb[188].mxu0 %v956_v8  ;;  %2844 = vmatmul.mubr.f32.gmra.mrb[188].mxu1 %v1364_v9  ;;  %v958_v8 = vld [vmem:[%s4610_s2 + $0x178] sm:$0xff] }
 0x19c   :  { %2667 = vmatprep.mubr.msk.f32.mxu0 %vm2957_vm0, %v2958_v6  ;;  %2846 = vmatprep.mubr.msk.f32.mxu1 %vm2957_vm0, %v2958_v6  ;;  %v1366_v9 = vld [vmem:[%s4611_s3 + $0x178] sm:$0xff] }
 0x19d   :  { %v446_v41 = vmax.f32 %v367_v20, 0.0  ;;  %v854_v47 = vmax.f32 %v775_v30, 0.0 }
 0x19e   :  { %v371_v48 = vpop.f32.mrb[84].mxu0  ;;  %v779_v53 = vpop.f32.mrb[84].mxu1 }
 0x19f   :  { %v4258_v55 = vmax.f32 %v446_v41, %v854_v47  ;;  %v372_v57 = vadd.f32 %v4146_v27, %v371_v48  ;;  %v780_v58 = vadd.f32 %v4146_v27, %v779_v53  ;;  %v2299_v63 = vpop.f32.mrb[85].mxu0  ;;  %v2478_v4 = vpop.f32.mrb[85].mxu1  ;;  %2668 = vmatmul.mubr.f32.gmra.mrb[190].mxu0 %v957_v37  ;;  %2847 = vmatmul.mubr.f32.gmra.mrb[190].mxu1 %v1365_v40  ;;  %v959_v40 = vld [vmem:[%s4610_s2 + $0x180] sm:$0xff] }
 0x1a0   :  { %2670 = vmatprep.mubr.msk.f32.mxu0 %vm2957_vm0, %v2958_v6  ;;  %2849 = vmatprep.mubr.msk.f32.mxu1 %vm2957_vm0, %v2958_v6  ;;  %v1367_v41 = vld [vmem:[%s4611_s3 + $0x180] sm:$0xff] }
 0x1a1   :  { %v447_v11 = vmax.f32 %v372_v57, 0.0  ;;  %v855_v15 = vmax.f32 %v780_v58, 0.0 }
 0x1a2   :  { %v376_v18 = vpop.f32.mrb[86].mxu0  ;;  %v784_v5 = vpop.f32.mrb[86].mxu1 }
 0x1a3   :  { %v4272_v20 = vmax.f32 %v447_v11, %v855_v15  ;;  %v377_v30 = vadd.f32 %v4146_v27, %v376_v18  ;;  %v785_v33 = vadd.f32 %v4146_v27, %v784_v5  ;;  %v2302_v35 = vpop.f32.mrb[87].mxu0  ;;  %v2481_v37 = vpop.f32.mrb[87].mxu1  ;;  %2671 = vmatmul.mubr.f32.gmra.mrb[192].mxu0 %v958_v8  ;;  %2850 = vmatmul.mubr.f32.gmra.mrb[192].mxu1 %v1366_v9 }
 0x1a4   :  { %2673 = vmatprep.mubr.msk.f32.mxu0 %vm2957_vm0, %v2958_v6  ;;  %2852 = vmatprep.mubr.msk.f32.mxu1 %vm2957_vm0, %v2958_v6 }
 0x1a5   :  { %v448_v47 = vmax.f32 %v377_v30, 0.0  ;;  %v856_v48 = vmax.f32 %v785_v33, 0.0 }
 0x1a6   :  { %v381_v53 = vpop.f32.mrb[88].mxu0  ;;  %v789_v57 = vpop.f32.mrb[88].mxu1 }
 0x1a7   :  { %v4286_v58 = vmax.f32 %v448_v47, %v856_v48  ;;  %v382_v63 = vadd.f32 %v4146_v27, %v381_v53  ;;  %v790_v4 = vadd.f32 %v4146_v27, %v789_v57  ;;  %v2305_v8 = vpop.f32.mrb[89].mxu0  ;;  %v2484_v6 = vpop.f32.mrb[89].mxu1  ;;  %2674 = vmatmul.mubr.f32.gmra.mrb[194].mxu0 %v959_v40  ;;  %2853 = vmatmul.mubr.f32.gmra.mrb[194].mxu1 %v1367_v41 }
 0x1a9   :  { %v449_v9 = vmax.f32 %v382_v63, 0.0  ;;  %v857_v11 = vmax.f32 %v790_v4, 0.0 }
 0x1aa   :  { %v386_v15 = vpop.f32.mrb[90].mxu0  ;;  %v794_v18 = vpop.f32.mrb[90].mxu1 }
 0x1ab   :  { %v4290_v5 = vmax.f32 %v449_v9, %v857_v11  ;;  %v387_v30 = vadd.f32 %v4146_v27, %v386_v15  ;;  %v795_v33 = vadd.f32 %v4146_v27, %v794_v18  ;;  %v2308_v35 = vpop.f32.mrb[91].mxu0  ;;  %v2487_v37 = vpop.f32.mrb[91].mxu1 }
 0x1ad   :  { %4614 = vst [vmem:[#allocation2_spill] sm:$0xff] %v4290_v5  ;;  %v450_v47 = vmax.f32 %v387_v30, 0.0  ;;  %v858_v48 = vmax.f32 %v795_v33, 0.0 }
 0x1ae   :  { %v391_v53 = vpop.f32.mrb[92].mxu0  ;;  %v799_v57 = vpop.f32.mrb[92].mxu1 }
 0x1af   :  { %v4294_v8 = vmax.f32 %v450_v47, %v858_v48  ;;  %v392_v40 = vadd.f32 %v4146_v27, %v391_v53  ;;  %v800_v41 = vadd.f32 %v4146_v27, %v799_v57  ;;  %v2311_v63 = vpop.f32.mrb[93].mxu0  ;;  %v2490_v4 = vpop.f32.mrb[93].mxu1 }
 0x1b1   :  { %4615 = vst [vmem:[#allocation3_spill] sm:$0xff] %v4294_v8  ;;  %v451_v6 = vmax.f32 %v392_v40, 0.0  ;;  %v859_v9 = vmax.f32 %v800_v41, 0.0 }
 0x1b2   :  { %v396_v11 = vpop.f32.mrb[94].mxu0  ;;  %v804_v15 = vpop.f32.mrb[94].mxu1 }
 0x1b3   :  { %v4298_v5 = vmax.f32 %v451_v6, %v859_v9  ;;  %v397_v18 = vadd.f32 %v4146_v27, %v396_v11  ;;  %v805_v30 = vadd.f32 %v4146_v27, %v804_v15  ;;  %v2314_v33 = vpop.f32.mrb[95].mxu0  ;;  %v2493_v35 = vpop.f32.mrb[95].mxu1 }
 0x1b5   :  { %4616 = vst [vmem:[#allocation4_spill] sm:$0xff] %v4298_v5  ;;  %v452_v37 = vmax.f32 %v397_v18, 0.0  ;;  %v860_v47 = vmax.f32 %v805_v30, 0.0 }
 0x1b6   :  { %v401_v48 = vpop.f32.mrb[96].mxu0  ;;  %v809_v53 = vpop.f32.mrb[96].mxu1 }
 0x1b7   :  { %v4302_v8 = vmax.f32 %v452_v37, %v860_v47  ;;  %v402_v57 = vadd.f32 %v4146_v27, %v401_v48  ;;  %v810_v40 = vadd.f32 %v4146_v27, %v809_v53  ;;  %v2317_v41 = vpop.f32.mrb[97].mxu0  ;;  %v2496_v63 = vpop.f32.mrb[97].mxu1 }
 0x1b9   :  { %4617 = vst [vmem:[#allocation5_spill] sm:$0xff] %v4302_v8  ;;  %v453_v4 = vmax.f32 %v402_v57, 0.0  ;;  %v861_v6 = vmax.f32 %v810_v40, 0.0 }
 0x1ba   :  { %v1026_v9 = vpop.f32.mrb[98].mxu0  ;;  %v1434_v11 = vpop.f32.mrb[98].mxu1 }
 0x1bb   :  { %v4306_v5 = vmax.f32 %v453_v4, %v861_v6  ;;  %v1027_v15 = vadd.f32 %v4146_v27, %v1026_v9  ;;  %v1435_v18 = vadd.f32 %v4146_v27, %v1434_v11  ;;  %v2531_v30 = vpop.f32.mrb[99].mxu0  ;;  %v2710_v33 = vpop.f32.mrb[99].mxu1 }
 0x1bd   :  { %4618 = vst [vmem:[#allocation6_spill] sm:$0xff] %v4306_v5  ;;  %v1270_v35 = vmax.f32 %v1027_v15, 0.0  ;;  %v1678_v37 = vmax.f32 %v1435_v18, 0.0 }
 0x1be   :  { %v1031_v47 = vpop.f32.mrb[100].mxu0  ;;  %v1439_v48 = vpop.f32.mrb[100].mxu1 }
 0x1bf   :  { %v1727_v8 = vmax.f32 %v1270_v35, %v1678_v37  ;;  %v1032_v53 = vadd.f32 %v4146_v27, %v1031_v47  ;;  %v1440_v57 = vadd.f32 %v4146_v27, %v1439_v48  ;;  %v2534_v40 = vpop.f32.mrb[101].mxu0  ;;  %v2713_v41 = vpop.f32.mrb[101].mxu1 }
 0x1c1   :  { %v1776_v63 = vmax.f32 %v3679_v21, %v1727_v8  ;;  %v1271_v4 = vmax.f32 %v1032_v53, 0.0  ;;  %v1679_v6 = vmax.f32 %v1440_v57, 0.0 }
 0x1c2   :  { %v1036_v9 = vpop.f32.mrb[102].mxu0  ;;  %v1444_v5 = vpop.f32.mrb[102].mxu1 }
 0x1c3   :  { %1825 = vst [vmem:[%s4613_s6] sm:$0xff] %v1776_v63  ;;  %v1728_v11 = vmax.f32 %v1271_v4, %v1679_v6  ;;  %v1037_v15 = vadd.f32 %v4146_v27, %v1036_v9  ;;  %v1445_v18 = vadd.f32 %v4146_v27, %v1444_v5  ;;  %v2537_v30 = vpop.f32.mrb[103].mxu0  ;;  %v2716_v33 = vpop.f32.mrb[103].mxu1 }
 0x1c5   :  { %v1777_v35 = vmax.f32 %v3693_v32, %v1728_v11  ;;  %v1272_v37 = vmax.f32 %v1037_v15, 0.0  ;;  %v1680_v47 = vmax.f32 %v1445_v18, 0.0 }
 0x1c6   :  { %v1041_v21 = vpop.f32.mrb[104].mxu0  ;;  %v1449_v8 = vpop.f32.mrb[104].mxu1 }
 0x1c7   :  { %1826 = vst [vmem:[%s4613_s6 + $0x8] sm:$0xff] %v1777_v35  ;;  %v1729_v48 = vmax.f32 %v1272_v37, %v1680_v47  ;;  %v1042_v53 = vadd.f32 %v4146_v27, %v1041_v21  ;;  %v1450_v57 = vadd.f32 %v4146_v27, %v1449_v8  ;;  %v2540_v40 = vpop.f32.mrb[105].mxu0  ;;  %v2719_v41 = vpop.f32.mrb[105].mxu1 }
 0x1c9   :  { %v1778_v5 = vmax.f32 %v3707_v43, %v1729_v48  ;;  %v1273_v63 = vmax.f32 %v1042_v53, 0.0  ;;  %v1681_v4 = vmax.f32 %v1450_v57, 0.0 }
 0x1ca   :  { %v1046_v32 = vpop.f32.mrb[106].mxu0  ;;  %v1454_v6 = vpop.f32.mrb[106].mxu1 }
 0x1cb   :  { %1827 = vst [vmem:[%s4613_s6 + $0x10] sm:$0xff] %v1778_v5  ;;  %v1730_v9 = vmax.f32 %v1273_v63, %v1681_v4  ;;  %v1047_v11 = vadd.f32 %v4146_v27, %v1046_v32  ;;  %v1455_v15 = vadd.f32 %v4146_v27, %v1454_v6  ;;  %v2543_v18 = vpop.f32.mrb[107].mxu0  ;;  %v2722_v30 = vpop.f32.mrb[107].mxu1 }
 0x1cd   :  { %v1779_v33 = vmax.f32 %v3721_v54, %v1730_v9  ;;  %v1274_v35 = vmax.f32 %v1047_v11, 0.0  ;;  %v1682_v37 = vmax.f32 %v1455_v15, 0.0 }
 0x1ce   :  { %v1051_v43 = vpop.f32.mrb[108].mxu0  ;;  %v1459_v47 = vpop.f32.mrb[108].mxu1 }
 0x1cf   :  { %1828 = vst [vmem:[%s4613_s6 + $0x18] sm:$0xff] %v1779_v33  ;;  %v1731_v21 = vmax.f32 %v1274_v35, %v1682_v37  ;;  %v1052_v8 = vadd.f32 %v4146_v27, %v1051_v43  ;;  %v1460_v48 = vadd.f32 %v4146_v27, %v1459_v47  ;;  %v2546_v53 = vpop.f32.mrb[109].mxu0  ;;  %v2725_v57 = vpop.f32.mrb[109].mxu1 }
 0x1d1   :  { %v1780_v40 = vmax.f32 %v3735_v1, %v1731_v21  ;;  %v1275_v41 = vmax.f32 %v1052_v8, 0.0  ;;  %v1683_v5 = vmax.f32 %v1460_v48, 0.0 }
 0x1d2   :  { %v1056_v54 = vpop.f32.mrb[110].mxu0  ;;  %v1464_v63 = vpop.f32.mrb[110].mxu1 }
 0x1d3   :  { %1829 = vst [vmem:[%s4613_s6 + $0x20] sm:$0xff] %v1780_v40  ;;  %v1732_v4 = vmax.f32 %v1275_v41, %v1683_v5  ;;  %v1057_v32 = vadd.f32 %v4146_v27, %v1056_v54  ;;  %v1465_v6 = vadd.f32 %v4146_v27, %v1464_v63  ;;  %v2549_v9 = vpop.f32.mrb[111].mxu0  ;;  %v2728_v11 = vpop.f32.mrb[111].mxu1 }
 0x1d5   :  { %v1781_v15 = vmax.f32 %v3749_v14, %v1732_v4  ;;  %v1276_v18 = vmax.f32 %v1057_v32, 0.0  ;;  %v1684_v30 = vmax.f32 %v1465_v6, 0.0 }
 0x1d6   :  { %v1061_v1 = vpop.f32.mrb[112].mxu0  ;;  %v1469_v33 = vpop.f32.mrb[112].mxu1 }
 0x1d7   :  { %1830 = vst [vmem:[%s4613_s6 + $0x28] sm:$0xff] %v1781_v15  ;;  %v1733_v35 = vmax.f32 %v1276_v18, %v1684_v30  ;;  %v1062_v37 = vadd.f32 %v4146_v27, %v1061_v1  ;;  %v1470_v43 = vadd.f32 %v4146_v27, %v1469_v33  ;;  %v2552_v47 = vpop.f32.mrb[113].mxu0  ;;  %v2731_v21 = vpop.f32.mrb[113].mxu1 }
 0x1d9   :  { %v1782_v8 = vmax.f32 %v3763_v26, %v1733_v35  ;;  %v1277_v48 = vmax.f32 %v1062_v37, 0.0  ;;  %v1685_v53 = vmax.f32 %v1470_v43, 0.0 }
 0x1da   :  { %v1066_v14 = vpop.f32.mrb[114].mxu0  ;;  %v1474_v57 = vpop.f32.mrb[114].mxu1 }
 0x1db   :  { %1831 = vst [vmem:[%s4613_s6 + $0x30] sm:$0xff] %v1782_v8  ;;  %v1734_v40 = vmax.f32 %v1277_v48, %v1685_v53  ;;  %v1067_v41 = vadd.f32 %v4146_v27, %v1066_v14  ;;  %v1475_v5 = vadd.f32 %v4146_v27, %v1474_v57  ;;  %v2555_v54 = vpop.f32.mrb[115].mxu0  ;;  %v2734_v63 = vpop.f32.mrb[115].mxu1 }
 0x1dd   :  { %v1783_v4 = vmax.f32 %v3777_v38, %v1734_v40  ;;  %v1278_v32 = vmax.f32 %v1067_v41, 0.0  ;;  %v1686_v6 = vmax.f32 %v1475_v5, 0.0 }
 0x1de   :  { %v1071_v26 = vpop.f32.mrb[116].mxu0  ;;  %v1479_v9 = vpop.f32.mrb[116].mxu1 }
 0x1df   :  { %1832 = vst [vmem:[%s4613_s6 + $0x38] sm:$0xff] %v1783_v4  ;;  %v1735_v11 = vmax.f32 %v1278_v32, %v1686_v6  ;;  %v1072_v15 = vadd.f32 %v4146_v27, %v1071_v26  ;;  %v1480_v18 = vadd.f32 %v4146_v27, %v1479_v9  ;;  %v2558_v30 = vpop.f32.mrb[117].mxu0  ;;  %v2737_v1 = vpop.f32.mrb[117].mxu1 }
 0x1e1   :  { %v1784_v33 = vmax.f32 %v3791_v50, %v1735_v11  ;;  %v1279_v35 = vmax.f32 %v1072_v15, 0.0  ;;  %v1687_v37 = vmax.f32 %v1480_v18, 0.0 }
 0x1e2   :  { %v1076_v38 = vpop.f32.mrb[118].mxu0  ;;  %v1484_v43 = vpop.f32.mrb[118].mxu1 }
 0x1e3   :  { %1833 = vst [vmem:[%s4613_s6 + $0x40] sm:$0xff] %v1784_v33  ;;  %v1736_v47 = vmax.f32 %v1279_v35, %v1687_v37  ;;  %v1077_v21 = vadd.f32 %v4146_v27, %v1076_v38  ;;  %v1485_v8 = vadd.f32 %v4146_v27, %v1484_v43  ;;  %v2561_v48 = vpop.f32.mrb[119].mxu0  ;;  %v2740_v53 = vpop.f32.mrb[119].mxu1 }
 0x1e5   :  { %v1785_v14 = vmax.f32 %v3805_v62, %v1736_v47  ;;  %v1280_v57 = vmax.f32 %v1077_v21, 0.0  ;;  %v1688_v40 = vmax.f32 %v1485_v8, 0.0 }
 0x1e6   :  { %v1081_v50 = vpop.f32.mrb[120].mxu0  ;;  %v1489_v41 = vpop.f32.mrb[120].mxu1 }
 0x1e7   :  { %1834 = vst [vmem:[%s4613_s6 + $0x48] sm:$0xff] %v1785_v14  ;;  %v1737_v5 = vmax.f32 %v1280_v57, %v1688_v40  ;;  %v1082_v54 = vadd.f32 %v4146_v27, %v1081_v50  ;;  %v1490_v63 = vadd.f32 %v4146_v27, %v1489_v41  ;;  %v2564_v4 = vpop.f32.mrb[121].mxu0  ;;  %v2743_v32 = vpop.f32.mrb[121].mxu1 }
 0x1e9   :  { %v1786_v6 = vmax.f32 %v3819_v12, %v1737_v5  ;;  %v1281_v26 = vmax.f32 %v1082_v54, 0.0  ;;  %v1689_v9 = vmax.f32 %v1490_v63, 0.0 }
 0x1ea   :  { %v1086_v62 = vpop.f32.mrb[122].mxu0  ;;  %v1494_v11 = vpop.f32.mrb[122].mxu1 }
 0x1eb   :  { %1835 = vst [vmem:[%s4613_s6 + $0x50] sm:$0xff] %v1786_v6  ;;  %v1738_v15 = vmax.f32 %v1281_v26, %v1689_v9  ;;  %v1087_v18 = vadd.f32 %v4146_v27, %v1086_v62  ;;  %v1495_v30 = vadd.f32 %v4146_v27, %v1494_v11  ;;  %v2567_v1 = vpop.f32.mrb[123].mxu0  ;;  %v2746_v33 = vpop.f32.mrb[123].mxu1 }
 0x1ed   :  { %v1787_v35 = vmax.f32 %v3833_v25, %v1738_v15  ;;  %v1282_v37 = vmax.f32 %v1087_v18, 0.0  ;;  %v1690_v38 = vmax.f32 %v1495_v30, 0.0 }
 0x1ee   :  { %v1091_v12 = vpop.f32.mrb[124].mxu0  ;;  %v1499_v43 = vpop.f32.mrb[124].mxu1 }
 0x1ef   :  { %1836 = vst [vmem:[%s4613_s6 + $0x58] sm:$0xff] %v1787_v35  ;;  %v1739_v47 = vmax.f32 %v1282_v37, %v1690_v38  ;;  %v1092_v21 = vadd.f32 %v4146_v27, %v1091_v12  ;;  %v1500_v8 = vadd.f32 %v4146_v27, %v1499_v43  ;;  %v2570_v48 = vpop.f32.mrb[125].mxu0  ;;  %v2749_v53 = vpop.f32.mrb[125].mxu1 }
 0x1f1   :  { %v1788_v14 = vmax.f32 %v3847_v39, %v1739_v47  ;;  %v1283_v57 = vmax.f32 %v1092_v21, 0.0  ;;  %v1691_v40 = vmax.f32 %v1500_v8, 0.0 }
 0x1f2   :  { %v1096_v25 = vpop.f32.mrb[126].mxu0  ;;  %v1504_v50 = vpop.f32.mrb[126].mxu1 }
 0x1f3   :  { %1837 = vst [vmem:[%s4613_s6 + $0x60] sm:$0xff] %v1788_v14  ;;  %v1740_v41 = vmax.f32 %v1283_v57, %v1691_v40  ;;  %v1097_v5 = vadd.f32 %v4146_v27, %v1096_v25  ;;  %v1505_v54 = vadd.f32 %v4146_v27, %v1504_v50  ;;  %v2573_v63 = vpop.f32.mrb[127].mxu0  ;;  %v2752_v4 = vpop.f32.mrb[127].mxu1 }
 0x1f5   :  { %v1789_v32 = vmax.f32 %v3861_v52, %v1740_v41  ;;  %v1284_v6 = vmax.f32 %v1097_v5, 0.0  ;;  %v1692_v26 = vmax.f32 %v1505_v54, 0.0 }
 0x1f6   :  { %v1101_v39 = vpop.f32.mrb[128].mxu0  ;;  %v1509_v9 = vpop.f32.mrb[128].mxu1 }
 0x1f7   :  { %1838 = vst [vmem:[%s4613_s6 + $0x68] sm:$0xff] %v1789_v32  ;;  %v1741_v62 = vmax.f32 %v1284_v6, %v1692_v26  ;;  %v1102_v11 = vadd.f32 %v4146_v27, %v1101_v39  ;;  %v1510_v15 = vadd.f32 %v4146_v27, %v1509_v9  ;;  %v2576_v18 = vpop.f32.mrb[129].mxu0  ;;  %v2755_v30 = vpop.f32.mrb[129].mxu1 }
 0x1f9   :  { %v1790_v1 = vmax.f32 %v3875_v2, %v1741_v62  ;;  %v1285_v33 = vmax.f32 %v1102_v11, 0.0  ;;  %v1693_v35 = vmax.f32 %v1510_v15, 0.0 }
 0x1fa   :  { %v1106_v52 = vpop.f32.mrb[130].mxu0  ;;  %v1514_v37 = vpop.f32.mrb[130].mxu1 }
 0x1fb   :  { %1839 = vst [vmem:[%s4613_s6 + $0x70] sm:$0xff] %v1790_v1  ;;  %v1742_v38 = vmax.f32 %v1285_v33, %v1693_v35  ;;  %v1107_v12 = vadd.f32 %v4146_v27, %v1106_v52  ;;  %v1515_v43 = vadd.f32 %v4146_v27, %v1514_v37  ;;  %v2579_v47 = vpop.f32.mrb[131].mxu0  ;;  %v2758_v21 = vpop.f32.mrb[131].mxu1 }
 0x1fd   :  { %v1791_v8 = vmax.f32 %v3889_v17, %v1742_v38  ;;  %v1286_v48 = vmax.f32 %v1107_v12, 0.0  ;;  %v1694_v53 = vmax.f32 %v1515_v43, 0.0 }
 0x1fe   :  { %v1111_v2 = vpop.f32.mrb[132].mxu0  ;;  %v1519_v14 = vpop.f32.mrb[132].mxu1 }
 0x1ff   :  { %1840 = vst [vmem:[%s4613_s6 + $0x78] sm:$0xff] %v1791_v8  ;;  %v1743_v57 = vmax.f32 %v1286_v48, %v1694_v53  ;;  %v1112_v40 = vadd.f32 %v4146_v27, %v1111_v2  ;;  %v1520_v25 = vadd.f32 %v4146_v27, %v1519_v14  ;;  %v2582_v50 = vpop.f32.mrb[133].mxu0  ;;  %v2761_v41 = vpop.f32.mrb[133].mxu1 }
 0x201   :  { %v1792_v5 = vmax.f32 %v3903_v31, %v1743_v57  ;;  %v1287_v54 = vmax.f32 %v1112_v40, 0.0  ;;  %v1695_v63 = vmax.f32 %v1520_v25, 0.0 }
 0x202   :  { %v1116_v17 = vpop.f32.mrb[134].mxu0  ;;  %v1524_v4 = vpop.f32.mrb[134].mxu1 }
 0x203   :  { %1841 = vst [vmem:[%s4613_s6 + $0x80] sm:$0xff] %v1792_v5  ;;  %v1744_v32 = vmax.f32 %v1287_v54, %v1695_v63  ;;  %v1117_v6 = vadd.f32 %v4146_v27, %v1116_v17  ;;  %v1525_v26 = vadd.f32 %v4146_v27, %v1524_v4  ;;  %v2585_v39 = vpop.f32.mrb[135].mxu0  ;;  %v2764_v9 = vpop.f32.mrb[135].mxu1 }
 0x205   :  { %v1793_v62 = vmax.f32 %v3917_v46, %v1744_v32  ;;  %v1288_v11 = vmax.f32 %v1117_v6, 0.0  ;;  %v1696_v15 = vmax.f32 %v1525_v26, 0.0 }
 0x206   :  { %v1121_v31 = vpop.f32.mrb[136].mxu0  ;;  %v1529_v18 = vpop.f32.mrb[136].mxu1 }
 0x207   :  { %1842 = vst [vmem:[%s4613_s6 + $0x88] sm:$0xff] %v1793_v62  ;;  %v1745_v30 = vmax.f32 %v1288_v11, %v1696_v15  ;;  %v1122_v1 = vadd.f32 %v4146_v27, %v1121_v31  ;;  %v1530_v33 = vadd.f32 %v4146_v27, %v1529_v18  ;;  %v2588_v35 = vpop.f32.mrb[137].mxu0  ;;  %v2767_v52 = vpop.f32.mrb[137].mxu1 }
 0x209   :  { %v1794_v37 = vmax.f32 %v3931_v60, %v1745_v30  ;;  %v1289_v38 = vmax.f32 %v1122_v1, 0.0  ;;  %v1697_v12 = vmax.f32 %v1530_v33, 0.0 }
 0x20a   :  { %v1126_v46 = vpop.f32.mrb[138].mxu0  ;;  %v1534_v43 = vpop.f32.mrb[138].mxu1 }
 0x20b   :  { %1843 = vst [vmem:[%s4613_s6 + $0x90] sm:$0xff] %v1794_v37  ;;  %v1746_v47 = vmax.f32 %v1289_v38, %v1697_v12  ;;  %v1127_v21 = vadd.f32 %v4146_v27, %v1126_v46  ;;  %v1535_v8 = vadd.f32 %v4146_v27, %v1534_v43  ;;  %v2591_v48 = vpop.f32.mrb[139].mxu0  ;;  %v2770_v53 = vpop.f32.mrb[139].mxu1 }
 0x20d   :  { %v1795_v2 = vmax.f32 %v3945_v13, %v1746_v47  ;;  %v1290_v14 = vmax.f32 %v1127_v21, 0.0  ;;  %v1698_v57 = vmax.f32 %v1535_v8, 0.0 }
 0x20e   :  { %v1131_v60 = vpop.f32.mrb[140].mxu0  ;;  %v1539_v40 = vpop.f32.mrb[140].mxu1 }
 0x20f   :  { %1844 = vst [vmem:[%s4613_s6 + $0x98] sm:$0xff] %v1795_v2  ;;  %v1747_v25 = vmax.f32 %v1290_v14, %v1698_v57  ;;  %v1132_v50 = vadd.f32 %v4146_v27, %v1131_v60  ;;  %v1540_v41 = vadd.f32 %v4146_v27, %v1539_v40  ;;  %v2594_v5 = vpop.f32.mrb[141].mxu0  ;;  %v2773_v54 = vpop.f32.mrb[141].mxu1 }
 0x211   :  { %v1796_v63 = vmax.f32 %v3959_v29, %v1747_v25  ;;  %v1291_v17 = vmax.f32 %v1132_v50, 0.0  ;;  %v1699_v4 = vmax.f32 %v1540_v41, 0.0 }
 0x212   :  { %v1136_v13 = vpop.f32.mrb[142].mxu0  ;;  %v1544_v32 = vpop.f32.mrb[142].mxu1 }
 0x213   :  { %1845 = vst [vmem:[%s4613_s6 + $0xa0] sm:$0xff] %v1796_v63  ;;  %v1748_v6 = vmax.f32 %v1291_v17, %v1699_v4  ;;  %v1137_v26 = vadd.f32 %v4146_v27, %v1136_v13  ;;  %v1545_v39 = vadd.f32 %v4146_v27, %v1544_v32  ;;  %v2597_v9 = vpop.f32.mrb[143].mxu0  ;;  %v2776_v62 = vpop.f32.mrb[143].mxu1 }
 0x215   :  { %v1797_v11 = vmax.f32 %v3973_v45, %v1748_v6  ;;  %v1292_v15 = vmax.f32 %v1137_v26, 0.0  ;;  %v1700_v31 = vmax.f32 %v1545_v39, 0.0 }
 0x216   :  { %v1141_v29 = vpop.f32.mrb[144].mxu0  ;;  %v1549_v18 = vpop.f32.mrb[144].mxu1 }
 0x217   :  { %1846 = vst [vmem:[%s4613_s6 + $0xa8] sm:$0xff] %v1797_v11  ;;  %v1749_v30 = vmax.f32 %v1292_v15, %v1700_v31  ;;  %v1142_v1 = vadd.f32 %v4146_v27, %v1141_v29  ;;  %v1550_v33 = vadd.f32 %v4146_v27, %v1549_v18  ;;  %v2600_v35 = vpop.f32.mrb[145].mxu0  ;;  %v2779_v52 = vpop.f32.mrb[145].mxu1 }
 0x219   :  { %v1798_v37 = vmax.f32 %v3987_v61, %v1749_v30  ;;  %v1293_v38 = vmax.f32 %v1142_v1, 0.0  ;;  %v1701_v12 = vmax.f32 %v1550_v33, 0.0 }
 0x21a   :  { %v1146_v45 = vpop.f32.mrb[146].mxu0  ;;  %v1554_v46 = vpop.f32.mrb[146].mxu1 }
 0x21b   :  { %1847 = vst [vmem:[%s4613_s6 + $0xb0] sm:$0xff] %v1798_v37  ;;  %v1750_v43 = vmax.f32 %v1293_v38, %v1701_v12  ;;  %v1147_v47 = vadd.f32 %v4146_v27, %v1146_v45  ;;  %v1555_v21 = vadd.f32 %v4146_v27, %v1554_v46  ;;  %v2603_v8 = vpop.f32.mrb[147].mxu0  ;;  %v2782_v48 = vpop.f32.mrb[147].mxu1 }
 0x21d   :  { %v1799_v53 = vmax.f32 %v4001_v16, %v1750_v43  ;;  %v1294_v2 = vmax.f32 %v1147_v47, 0.0  ;;  %v1702_v14 = vmax.f32 %v1555_v21, 0.0 }
 0x21e   :  { %v1151_v61 = vpop.f32.mrb[148].mxu0  ;;  %v1559_v57 = vpop.f32.mrb[148].mxu1 }
 0x21f   :  { %1848 = vst [vmem:[%s4613_s6 + $0xb8] sm:$0xff] %v1799_v53  ;;  %v1751_v60 = vmax.f32 %v1294_v2, %v1702_v14  ;;  %v1152_v40 = vadd.f32 %v4146_v27, %v1151_v61  ;;  %v1560_v25 = vadd.f32 %v4146_v27, %v1559_v57  ;;  %v2606_v50 = vpop.f32.mrb[149].mxu0  ;;  %v2785_v41 = vpop.f32.mrb[149].mxu1  ;;  %v4481_v53 = vld [vmem:[%s4612_s5] ss:$0 sm:$0xff] }
 0x221   :  { %v1800_v5 = vmax.f32 %v4015_v34, %v1751_v60  ;;  %v1295_v54 = vmax.f32 %v1152_v40, 0.0  ;;  %v1703_v63 = vmax.f32 %v1560_v25, 0.0 }
 0x222   :  { %v1156_v16 = vpop.f32.mrb[150].mxu0  ;;  %v1564_v17 = vpop.f32.mrb[150].mxu1 }
 0x223   :  { %1849 = vst [vmem:[%s4613_s6 + $0xc0] sm:$0xff] %v1800_v5  ;;  %v1752_v4 = vmax.f32 %v1295_v54, %v1703_v63  ;;  %v1157_v13 = vadd.f32 %v4146_v27, %v1156_v16  ;;  %v1565_v32 = vadd.f32 %v4146_v27, %v1564_v17  ;;  %v2609_v6 = vpop.f32.mrb[151].mxu0  ;;  %v2788_v26 = vpop.f32.mrb[151].mxu1 }
 0x225   :  { %v1801_v39 = vmax.f32 %v4029_v51, %v1752_v4  ;;  %v1296_v9 = vmax.f32 %v1157_v13, 0.0  ;;  %v1704_v62 = vmax.f32 %v1565_v32, 0.0 }
 0x226   :  { %v1161_v34 = vpop.f32.mrb[152].mxu0  ;;  %v1569_v11 = vpop.f32.mrb[152].mxu1 }
 0x227   :  { %1850 = vst [vmem:[%s4613_s6 + $0xc8] sm:$0xff] %v1801_v39  ;;  %v1753_v15 = vmax.f32 %v1296_v9, %v1704_v62  ;;  %v1162_v31 = vadd.f32 %v4146_v27, %v1161_v34  ;;  %v1570_v29 = vadd.f32 %v4146_v27, %v1569_v11  ;;  %v2612_v18 = vpop.f32.mrb[153].mxu0  ;;  %v2791_v30 = vpop.f32.mrb[153].mxu1 }
 0x229   :  { %v1802_v1 = vmax.f32 %v4043_v7, %v1753_v15  ;;  %v1297_v33 = vmax.f32 %v1162_v31, 0.0  ;;  %v1705_v35 = vmax.f32 %v1570_v29, 0.0 }
 0x22a   :  { %v1166_v51 = vpop.f32.mrb[154].mxu0  ;;  %v1574_v52 = vpop.f32.mrb[154].mxu1 }
 0x22b   :  { %1851 = vst [vmem:[%s4613_s6 + $0xd0] sm:$0xff] %v1802_v1  ;;  %v1754_v37 = vmax.f32 %v1297_v33, %v1705_v35  ;;  %v1167_v38 = vadd.f32 %v4146_v27, %v1166_v51  ;;  %v1575_v12 = vadd.f32 %v4146_v27, %v1574_v52  ;;  %v2615_v45 = vpop.f32.mrb[155].mxu0  ;;  %v2794_v46 = vpop.f32.mrb[155].mxu1 }
 0x22d   :  { %v1803_v43 = vmax.f32 %v4057_v24, %v1754_v37  ;;  %v1298_v47 = vmax.f32 %v1167_v38, 0.0  ;;  %v1706_v21 = vmax.f32 %v1575_v12, 0.0 }
 0x22e   :  { %v1171_v7 = vpop.f32.mrb[156].mxu0  ;;  %v1579_v8 = vpop.f32.mrb[156].mxu1 }
 0x22f   :  { %1852 = vst [vmem:[%s4613_s6 + $0xd8] sm:$0xff] %v1803_v43  ;;  %v1755_v48 = vmax.f32 %v1298_v47, %v1706_v21  ;;  %v1172_v27 = vadd.f32 %v4481_v53, %v1171_v7  ;;  %v1580_v2 = vadd.f32 %v4481_v53, %v1579_v8  ;;  %v2618_v14 = vpop.f32.mrb[157].mxu0  ;;  %v2797_v24 = vpop.f32.mrb[157].mxu1 }
 0x231   :  { %v1804_v61 = vmax.f32 %v4071_v44, %v1755_v48  ;;  %v1299_v57 = vmax.f32 %v1172_v27, 0.0  ;;  %v1707_v60 = vmax.f32 %v1580_v2, 0.0 }
 0x232   :  { %v1176_v40 = vpop.f32.mrb[158].mxu0  ;;  %v1584_v25 = vpop.f32.mrb[158].mxu1 }
 0x233   :  { %1853 = vst [vmem:[%s4613_s6 + $0xe0] sm:$0xff] %v1804_v61  ;;  %v1756_v50 = vmax.f32 %v1299_v57, %v1707_v60  ;;  %v1177_v41 = vadd.f32 %v4481_v53, %v1176_v40  ;;  %v1585_v5 = vadd.f32 %v4481_v53, %v1584_v25  ;;  %v2621_v54 = vpop.f32.mrb[159].mxu0  ;;  %v2800_v63 = vpop.f32.mrb[159].mxu1 }
 0x235   :  { %v1805_v16 = vmax.f32 %v4085_v0, %v1756_v50  ;;  %v1300_v17 = vmax.f32 %v1177_v41, 0.0  ;;  %v1708_v4 = vmax.f32 %v1585_v5, 0.0 }
 0x236   :  { %v1181_v44 = vpop.f32.mrb[160].mxu0  ;;  %v1589_v13 = vpop.f32.mrb[160].mxu1 }
 0x237   :  { %1854 = vst [vmem:[%s4613_s6 + $0xe8] sm:$0xff] %v1805_v16  ;;  %v1757_v32 = vmax.f32 %v1300_v17, %v1708_v4  ;;  %v1182_v6 = vadd.f32 %v4481_v53, %v1181_v44  ;;  %v1590_v26 = vadd.f32 %v4481_v53, %v1589_v13  ;;  %v2624_v39 = vpop.f32.mrb[161].mxu0  ;;  %v2803_v9 = vpop.f32.mrb[161].mxu1 }
 0x239   :  { %v1806_v62 = vmax.f32 %v4099_v22, %v1757_v32  ;;  %v1301_v34 = vmax.f32 %v1182_v6, 0.0  ;;  %v1709_v11 = vmax.f32 %v1590_v26, 0.0 }
 0x23a   :  { %v1186_v0 = vpop.f32.mrb[162].mxu0  ;;  %v1594_v15 = vpop.f32.mrb[162].mxu1 }
 0x23b   :  { %1855 = vst [vmem:[%s4613_s6 + $0xf0] sm:$0xff] %v1806_v62  ;;  %v1758_v31 = vmax.f32 %v1301_v34, %v1709_v11  ;;  %v1187_v29 = vadd.f32 %v4481_v53, %v1186_v0  ;;  %v1595_v18 = vadd.f32 %v4481_v53, %v1594_v15  ;;  %v2627_v30 = vpop.f32.mrb[163].mxu0  ;;  %v2806_v1 = vpop.f32.mrb[163].mxu1 }
 0x23d   :  { %v1807_v33 = vmax.f32 %v4113_v42, %v1758_v31  ;;  %v1302_v35 = vmax.f32 %v1187_v29, 0.0  ;;  %v1710_v51 = vmax.f32 %v1595_v18, 0.0 }
 0x23e   :  { %v1191_v22 = vpop.f32.mrb[164].mxu0  ;;  %v1599_v52 = vpop.f32.mrb[164].mxu1 }
 0x23f   :  { %1856 = vst [vmem:[%s4613_s6 + $0xf8] sm:$0xff] %v1807_v33  ;;  %v1759_v37 = vmax.f32 %v1302_v35, %v1710_v51  ;;  %v1192_v38 = vadd.f32 %v4481_v53, %v1191_v22  ;;  %v1600_v12 = vadd.f32 %v4481_v53, %v1599_v52  ;;  %v2630_v45 = vpop.f32.mrb[165].mxu0  ;;  %v2809_v46 = vpop.f32.mrb[165].mxu1 }
 0x241   :  { %v1808_v43 = vmax.f32 %v4127_v3, %v1759_v37  ;;  %v1303_v47 = vmax.f32 %v1192_v38, 0.0  ;;  %v1711_v21 = vmax.f32 %v1600_v12, 0.0 }
 0x242   :  { %v1196_v42 = vpop.f32.mrb[166].mxu0  ;;  %v1604_v7 = vpop.f32.mrb[166].mxu1 }
 0x243   :  { %1857 = vst [vmem:[%s4613_s6 + $0x100] sm:$0xff] %v1808_v43  ;;  %v1760_v8 = vmax.f32 %v1303_v47, %v1711_v21  ;;  %v1197_v48 = vadd.f32 %v4481_v53, %v1196_v42  ;;  %v1605_v27 = vadd.f32 %v4481_v53, %v1604_v7  ;;  %v2633_v2 = vpop.f32.mrb[167].mxu0  ;;  %v2812_v14 = vpop.f32.mrb[167].mxu1 }
 0x245   :  { %v1809_v24 = vmax.f32 %v4141_v23, %v1760_v8  ;;  %v1304_v61 = vmax.f32 %v1197_v48, 0.0  ;;  %v1712_v57 = vmax.f32 %v1605_v27, 0.0 }
 0x246   :  { %v1201_v3 = vpop.f32.mrb[168].mxu0  ;;  %v1609_v60 = vpop.f32.mrb[168].mxu1 }
 0x247   :  { %1858 = vst [vmem:[%s4613_s6 + $0x108] sm:$0xff] %v1809_v24  ;;  %v1761_v40 = vmax.f32 %v1304_v61, %v1712_v57  ;;  %v1202_v25 = vadd.f32 %v4481_v53, %v1201_v3  ;;  %v1610_v50 = vadd.f32 %v4481_v53, %v1609_v60  ;;  %v2636_v41 = vpop.f32.mrb[169].mxu0  ;;  %v2815_v5 = vpop.f32.mrb[169].mxu1 }
 0x249   :  { %v1810_v54 = vmax.f32 %v4160_v49, %v1761_v40  ;;  %v1305_v63 = vmax.f32 %v1202_v25, 0.0  ;;  %v1713_v16 = vmax.f32 %v1610_v50, 0.0 }
 0x24a   :  { %v1206_v23 = vpop.f32.mrb[170].mxu0  ;;  %v1614_v17 = vpop.f32.mrb[170].mxu1 }
 0x24b   :  { %1859 = vst [vmem:[%s4613_s6 + $0x110] sm:$0xff] %v1810_v54  ;;  %v1762_v4 = vmax.f32 %v1305_v63, %v1713_v16  ;;  %v1207_v44 = vadd.f32 %v4481_v53, %v1206_v23  ;;  %v1615_v13 = vadd.f32 %v4481_v53, %v1614_v17  ;;  %v2639_v32 = vpop.f32.mrb[171].mxu0  ;;  %v2818_v6 = vpop.f32.mrb[171].mxu1 }
 0x24d   :  { %v1811_v26 = vmax.f32 %v4174_v10, %v1762_v4  ;;  %v1306_v39 = vmax.f32 %v1207_v44, 0.0  ;;  %v1714_v9 = vmax.f32 %v1615_v13, 0.0 }
 0x24e   :  { %v1211_v49 = vpop.f32.mrb[172].mxu0  ;;  %v1619_v62 = vpop.f32.mrb[172].mxu1 }
 0x24f   :  { %1860 = vst [vmem:[%s4613_s6 + $0x118] sm:$0xff] %v1811_v26  ;;  %v1763_v34 = vmax.f32 %v1306_v39, %v1714_v9  ;;  %v1212_v11 = vadd.f32 %v4481_v53, %v1211_v49  ;;  %v1620_v0 = vadd.f32 %v4481_v53, %v1619_v62  ;;  %v2642_v15 = vpop.f32.mrb[173].mxu0  ;;  %v2821_v31 = vpop.f32.mrb[173].mxu1 }
 0x251   :  { %v1812_v29 = vmax.f32 %v4188_v36, %v1763_v34  ;;  %v1307_v18 = vmax.f32 %v1212_v11, 0.0  ;;  %v1715_v30 = vmax.f32 %v1620_v0, 0.0 }
 0x252   :  { %v1216_v10 = vpop.f32.mrb[174].mxu0  ;;  %v1624_v1 = vpop.f32.mrb[174].mxu1 }
 0x253   :  { %1861 = vst [vmem:[%s4613_s6 + $0x120] sm:$0xff] %v1812_v29  ;;  %v1764_v33 = vmax.f32 %v1307_v18, %v1715_v30  ;;  %v1217_v35 = vadd.f32 %v4481_v53, %v1216_v10  ;;  %v1625_v51 = vadd.f32 %v4481_v53, %v1624_v1  ;;  %v2645_v22 = vpop.f32.mrb[175].mxu0  ;;  %v2824_v52 = vpop.f32.mrb[175].mxu1 }
 0x255   :  { %v1813_v37 = vmax.f32 %v4202_v59, %v1764_v33  ;;  %v1308_v38 = vmax.f32 %v1217_v35, 0.0  ;;  %v1716_v12 = vmax.f32 %v1625_v51, 0.0 }
 0x256   :  { %v1221_v36 = vpop.f32.mrb[176].mxu0  ;;  %v1629_v45 = vpop.f32.mrb[176].mxu1 }
 0x257   :  { %1862 = vst [vmem:[%s4613_s6 + $0x128] sm:$0xff] %v1813_v37  ;;  %v1765_v46 = vmax.f32 %v1308_v38, %v1716_v12  ;;  %v1222_v43 = vadd.f32 %v4481_v53, %v1221_v36  ;;  %v1630_v47 = vadd.f32 %v4481_v53, %v1629_v45  ;;  %v2648_v21 = vpop.f32.mrb[177].mxu0  ;;  %v2827_v42 = vpop.f32.mrb[177].mxu1 }
 0x258   :  { %v4619_v21 = vld [vmem:[#allocation2_spill] sm:$0xff] }
 0x259   :  { %v1814_v7 = vmax.f32 %v4216_v28, %v1765_v46  ;;  %v1309_v8 = vmax.f32 %v1222_v43, 0.0  ;;  %v1717_v48 = vmax.f32 %v1630_v47, 0.0 }
 0x25a   :  { %v1226_v59 = vpop.f32.mrb[178].mxu0  ;;  %v1634_v27 = vpop.f32.mrb[178].mxu1 }
 0x25b   :  { %1863 = vst [vmem:[%s4613_s6 + $0x130] sm:$0xff] %v1814_v7  ;;  %v1766_v2 = vmax.f32 %v1309_v8, %v1717_v48  ;;  %v1227_v14 = vadd.f32 %v4481_v53, %v1226_v59  ;;  %v1635_v24 = vadd.f32 %v4481_v53, %v1634_v27  ;;  %v2651_v61 = vpop.f32.mrb[179].mxu0  ;;  %v2830_v57 = vpop.f32.mrb[179].mxu1 }
 0x25c   :  { %v4620_v61 = vld [vmem:[#allocation3_spill] sm:$0xff] }
 0x25d   :  { %v1815_v3 = vmax.f32 %v4230_v56, %v1766_v2  ;;  %v1310_v60 = vmax.f32 %v1227_v14, 0.0  ;;  %v1718_v40 = vmax.f32 %v1635_v24, 0.0 }
 0x25e   :  { %v1231_v28 = vpop.f32.mrb[180].mxu0  ;;  %v1639_v25 = vpop.f32.mrb[180].mxu1 }
 0x25f   :  { %1864 = vst [vmem:[%s4613_s6 + $0x138] sm:$0xff] %v1815_v3  ;;  %v1767_v50 = vmax.f32 %v1310_v60, %v1718_v40  ;;  %v1232_v41 = vadd.f32 %v4481_v53, %v1231_v28  ;;  %v1640_v5 = vadd.f32 %v4481_v53, %v1639_v25  ;;  %v2654_v54 = vpop.f32.mrb[181].mxu0  ;;  %v2833_v63 = vpop.f32.mrb[181].mxu1 }
 0x260   :  { %v4621_v63 = vld [vmem:[#allocation4_spill] sm:$0xff] }
 0x261   :  { %v1816_v16 = vmax.f32 %v4244_v19, %v1767_v50  ;;  %v1311_v23 = vmax.f32 %v1232_v41, 0.0  ;;  %v1719_v17 = vmax.f32 %v1640_v5, 0.0 }
 0x262   :  { %v1236_v56 = vpop.f32.mrb[182].mxu0  ;;  %v1644_v4 = vpop.f32.mrb[182].mxu1 }
 0x263   :  { %1865 = vst [vmem:[%s4613_s6 + $0x140] sm:$0xff] %v1816_v16  ;;  %v1768_v44 = vmax.f32 %v1311_v23, %v1719_v17  ;;  %v1237_v13 = vadd.f32 %v4481_v53, %v1236_v56  ;;  %v1645_v32 = vadd.f32 %v4481_v53, %v1644_v4  ;;  %v2657_v6 = vpop.f32.mrb[183].mxu0  ;;  %v2836_v26 = vpop.f32.mrb[183].mxu1 }
 0x265   :  { %v1817_v39 = vmax.f32 %v4258_v55, %v1768_v44  ;;  %v1312_v9 = vmax.f32 %v1237_v13, 0.0  ;;  %v1720_v49 = vmax.f32 %v1645_v32, 0.0 }
 0x266   :  { %v1241_v19 = vpop.f32.mrb[184].mxu0  ;;  %v1649_v62 = vpop.f32.mrb[184].mxu1 }
 0x267   :  { %1866 = vst [vmem:[%s4613_s6 + $0x148] sm:$0xff] %v1817_v39  ;;  %v1769_v34 = vmax.f32 %v1312_v9, %v1720_v49  ;;  %v1242_v11 = vadd.f32 %v4481_v53, %v1241_v19  ;;  %v1650_v0 = vadd.f32 %v4481_v53, %v1649_v62  ;;  %v2660_v15 = vpop.f32.mrb[185].mxu0  ;;  %v2839_v31 = vpop.f32.mrb[185].mxu1  ;;  %v4622_v39 = vld [vmem:[#allocation5_spill] sm:$0xff] }
 0x269   :  { %v1818_v29 = vmax.f32 %v4272_v20, %v1769_v34  ;;  %v1313_v18 = vmax.f32 %v1242_v11, 0.0  ;;  %v1721_v30 = vmax.f32 %v1650_v0, 0.0  ;;  %v4623_v34 = vld [vmem:[#allocation6_spill] sm:$0xff] }
 0x26a   :  { %v1246_v55 = vpop.f32.mrb[186].mxu0  ;;  %v1654_v10 = vpop.f32.mrb[186].mxu1 }
 0x26b   :  { %1867 = vst [vmem:[%s4613_s6 + $0x150] sm:$0xff] %v1818_v29  ;;  %v1770_v1 = vmax.f32 %v1313_v18, %v1721_v30  ;;  %v1247_v33 = vadd.f32 %v4481_v53, %v1246_v55  ;;  %v1655_v35 = vadd.f32 %v4481_v53, %v1654_v10  ;;  %v2663_v51 = vpop.f32.mrb[187].mxu0  ;;  %v2842_v22 = vpop.f32.mrb[187].mxu1 }
 0x26d   :  { %v1819_v52 = vmax.f32 %v4286_v58, %v1770_v1  ;;  %v1314_v37 = vmax.f32 %v1247_v33, 0.0  ;;  %v1722_v38 = vmax.f32 %v1655_v35, 0.0 }
 0x26e   :  { %v1251_v20 = vpop.f32.mrb[188].mxu0  ;;  %v1659_v12 = vpop.f32.mrb[188].mxu1 }
 0x26f   :  { %1868 = vst [vmem:[%s4613_s6 + $0x158] sm:$0xff] %v1819_v52  ;;  %v1771_v36 = vmax.f32 %v1314_v37, %v1722_v38  ;;  %v1252_v45 = vadd.f32 %v4481_v53, %v1251_v20  ;;  %v1660_v46 = vadd.f32 %v4481_v53, %v1659_v12  ;;  %v2666_v43 = vpop.f32.mrb[189].mxu0  ;;  %v2845_v47 = vpop.f32.mrb[189].mxu1 }
 0x271   :  { %v1820_v42 = vmax.f32 %v4619_v21, %v1771_v36  ;;  %v1315_v7 = vmax.f32 %v1252_v45, 0.0  ;;  %v1723_v8 = vmax.f32 %v1660_v46, 0.0 }
 0x272   :  { %v1256_v58 = vpop.f32.mrb[190].mxu0  ;;  %v1664_v48 = vpop.f32.mrb[190].mxu1 }
 0x273   :  { %1869 = vst [vmem:[%s4613_s6 + $0x160] sm:$0xff] %v1820_v42  ;;  %v1772_v59 = vmax.f32 %v1315_v7, %v1723_v8  ;;  %v1257_v27 = vadd.f32 %v4481_v53, %v1256_v58  ;;  %v1665_v2 = vadd.f32 %v4481_v53, %v1664_v48  ;;  %v2669_v14 = vpop.f32.mrb[191].mxu0  ;;  %v2848_v24 = vpop.f32.mrb[191].mxu1 }
 0x275   :  { %v1821_v57 = vmax.f32 %v4620_v61, %v1772_v59  ;;  %v1316_v3 = vmax.f32 %v1257_v27, 0.0  ;;  %v1724_v60 = vmax.f32 %v1665_v2, 0.0 }
 0x276   :  { %v1261_v40 = vpop.f32.mrb[192].mxu0  ;;  %v1669_v28 = vpop.f32.mrb[192].mxu1 }
 0x277   :  { %1870 = vst [vmem:[%s4613_s6 + $0x168] sm:$0xff] %v1821_v57  ;;  %v1773_v25 = vmax.f32 %v1316_v3, %v1724_v60  ;;  %v1262_v50 = vadd.f32 %v4481_v53, %v1261_v40  ;;  %v1670_v41 = vadd.f32 %v4481_v53, %v1669_v28  ;;  %v2672_v5 = vpop.f32.mrb[193].mxu0  ;;  %v2851_v54 = vpop.f32.mrb[193].mxu1 }
 0x279   :  { %v1822_v16 = vmax.f32 %v4621_v63, %v1773_v25  ;;  %v1317_v23 = vmax.f32 %v1262_v50, 0.0  ;;  %v1725_v17 = vmax.f32 %v1670_v41, 0.0 }
 0x27a   :  { %v1266_v56 = vpop.f32.mrb[194].mxu0  ;;  %v1674_v4 = vpop.f32.mrb[194].mxu1 }
 0x27b   :  { %1871 = vst [vmem:[%s4613_s6 + $0x170] sm:$0xff] %v1822_v16  ;;  %v1774_v44 = vmax.f32 %v1317_v23, %v1725_v17  ;;  %v1267_v13 = vadd.f32 %v4481_v53, %v1266_v56  ;;  %v1675_v32 = vadd.f32 %v4481_v53, %v1674_v4  ;;  %v2675_v6 = vpop.f32.mrb[195].mxu0  ;;  %v2854_v26 = vpop.f32.mrb[195].mxu1 }
 0x27d   :  { %v1823_v9 = vmax.f32 %v4622_v39, %v1774_v44  ;;  %v1318_v49 = vmax.f32 %v1267_v13, 0.0  ;;  %v1726_v19 = vmax.f32 %v1675_v32, 0.0 }
 0x27f   :  { %1872 = vst [vmem:[%s4613_s6 + $0x178] sm:$0xff] %v1823_v9  ;;  %v1775_v62 = vmax.f32 %v1318_v49, %v1726_v19 }
 0x281   :  { %v1824_v11 = vmax.f32 %v4623_v34, %v1775_v62 }
 0x283   :  { %1873 = vst [vmem:[%s4613_s6 + $0x180] sm:$0xff] %v1824_v11 }

// kernel: lenet_forward.4
= control target key start
LH: loop header
LB: loop body
LE: loop exit
PB: predicated region body
PF: predicated region fallthrough
CT: control target
= control target key end

     0   :  { %s1389_s4 = inlined_call_operand.vmem [shape: f32[256,128], index: 4, kind: input, shape index: {}]   ;;  %s1390_s0 = inlined_call_operand.vmem [shape: f32[50,256], index: 0, kind: input, shape index: {}]   ;;  %s1391_s1 = inlined_call_operand.vmem [shape: f32[50,256], index: 1, kind: input, shape index: {}]   ;;  %s1392_s2 = inlined_call_operand.vmem [shape: f32[50,256], index: 2, kind: input, shape index: {}]   ;;  %s1393_s3 = inlined_call_operand.vmem [shape: f32[50,256], index: 3, kind: input, shape index: {}]   ;;  %s1394_s5 = inlined_call_operand.vmem [shape: f32[1,128], index: 5, kind: input, shape index: {}]   ;;  %s1395_s6 = inlined_call_operand.vmem [shape: f32[50,128], index: 6, kind: output, shape index: {}]  }
   0x1   :  { %v39_v0 = vld [vmem:[%s1389_s4 + $0x80] sm:$0xff]  ;;  %v40_v1 = vld [vmem:[%s1389_s4 + $0x88] sm:$0xff]  ;;  %v41_v5 = vld [vmem:[%s1389_s4 + $0x90] sm:$0xff] }
   0x2   :  { %v23_v2 = vld [vmem:[%s1389_s4] sm:$0xff]  ;;  %v963_v3 = vpack.c.bf16 %v40_v1, %v39_v0  ;;  %v24_v4 = vld [vmem:[%s1389_s4 + $0x8] sm:$0xff]  ;;  %v42_v6 = vld [vmem:[%s1389_s4 + $0x98] sm:$0xff] }
   0x3   :  { %v974_v7 = vpack.c.bf16 %v24_v4, %v23_v2  ;;  %v976_v8 = vpack.c.bf16 %v42_v6, %v41_v5  ;;  %v25_v9 = vld [vmem:[%s1389_s4 + $0x10] sm:$0xff]  ;;  %v26_v10 = vld [vmem:[%s1389_s4 + $0x18] sm:$0xff]  ;;  %v43_v11 = vld [vmem:[%s1389_s4 + $0xa0] sm:$0xff] }
   0x4   :  { %792 = vmatprep.subr.bf16.mxu0 %v963_v3  ;;  %824 = vmatprep.subr.bf16.mxu1 %v963_v3  ;;  %v44_v12 = vld [vmem:[%s1389_s4 + $0xa8] sm:$0xff]  ;;  %v994_v13 = vpack.c.bf16 %v26_v10, %v25_v9  ;;  %v27_v15 = vld [vmem:[%s1389_s4 + $0x20] sm:$0xff]  ;;  %v45_v17 = vld [vmem:[%s1389_s4 + $0xb0] sm:$0xff] }
   0x5   :  { %794 = vmatpush3.bf16.msra.mxu0 %v974_v7  ;;  %826 = vmatpush3.bf16.msra.mxu1 %v974_v7  ;;  %v998_v14 = vpack.c.bf16 %v44_v12, %v43_v11  ;;  %v28_v16 = vld [vmem:[%s1389_s4 + $0x28] sm:$0xff]  ;;  %v46_v18 = vld [vmem:[%s1389_s4 + $0xb8] sm:$0xff]  ;;  %v29_v21 = vld [vmem:[%s1389_s4 + $0x30] sm:$0xff] }
   0x6   :  { %796 = vmatprep.subr.bf16.mxu0 %v976_v8  ;;  %828 = vmatprep.subr.bf16.mxu1 %v976_v8  ;;  %v1014_v19 = vpack.c.bf16 %v28_v16, %v27_v15  ;;  %v1018_v20 = vpack.c.bf16 %v46_v18, %v45_v17  ;;  %v30_v22 = vld [vmem:[%s1389_s4 + $0x38] sm:$0xff]  ;;  %v47_v23 = vld [vmem:[%s1389_s4 + $0xc0] sm:$0xff]  ;;  %v48_v24 = vld [vmem:[%s1389_s4 + $0xc8] sm:$0xff] }
   0x7   :  { %v57_v25 = vld [vmem:[%s1390_s0 + $0x8] sm:$0xff]  ;;  %v1040_v27 = vpack.c.bf16 %v30_v22, %v29_v21  ;;  %v1044_v28 = vpack.c.bf16 %v48_v24, %v47_v23  ;;  %v31_v29 = vld [vmem:[%s1389_s4 + $0x40] sm:$0xff]  ;;  %v49_v31 = vld [vmem:[%s1389_s4 + $0xd0] sm:$0xff] }
   0x8   :  { %140 = vmatprep.mubr.f32.mxu0 %v57_v25  ;;  %v184_v26 = vld [vmem:[%s1391_s1 + $0x8] sm:$0xff]  ;;  %v50_v32 = vld [vmem:[%s1389_s4 + $0xd8] sm:$0xff]  ;;  %v33_v35 = vld [vmem:[%s1389_s4 + $0x50] sm:$0xff] }
   0x9   :  { %798 = vmatpush3.bf16.msra.mxu0 %v994_v13  ;;  %830 = vmatpush3.bf16.msra.mxu1 %v994_v13  ;;  %v32_v30 = vld [vmem:[%s1389_s4 + $0x48] sm:$0xff]  ;;  %v1064_v34 = vpack.c.bf16 %v50_v32, %v49_v31  ;;  %v34_v36 = vld [vmem:[%s1389_s4 + $0x58] sm:$0xff]  ;;  %v51_v37 = vld [vmem:[%s1389_s4 + $0xe0] sm:$0xff] }
   0xa   :  { %800 = vmatprep.subr.bf16.mxu0 %v998_v14  ;;  %832 = vmatprep.subr.bf16.mxu1 %v998_v14  ;;  %v1060_v33 = vpack.c.bf16 %v32_v30, %v31_v29  ;;  %v52_v38 = vld [vmem:[%s1389_s4 + $0xe8] sm:$0xff]  ;;  %v1080_v39 = vpack.c.bf16 %v34_v36, %v33_v35  ;;  %v35_v41 = vld [vmem:[%s1389_s4 + $0x60] sm:$0xff]  ;;  %v53_v43 = vld [vmem:[%s1389_s4 + $0xf0] sm:$0xff] }
   0xb   :  { %261 = vmatprep.mubr.f32.mxu1 %v184_v26  ;;  %v1084_v40 = vpack.c.bf16 %v52_v38, %v51_v37  ;;  %v36_v42 = vld [vmem:[%s1389_s4 + $0x68] sm:$0xff]  ;;  %v54_v44 = vld [vmem:[%s1389_s4 + $0xf8] sm:$0xff]  ;;  %v37_v47 = vld [vmem:[%s1389_s4 + $0x70] sm:$0xff] }
   0xc   :  { %v1100_v45 = vpack.c.bf16 %v36_v42, %v35_v41  ;;  %v1104_v46 = vpack.c.bf16 %v54_v44, %v53_v43  ;;  %v38_v48 = vld [vmem:[%s1389_s4 + $0x78] sm:$0xff]  ;;  %v56_v50 = vld [vmem:[%s1390_s0] sm:$0xff]  ;;  %v58_v54 = vld [vmem:[%s1390_s0 + $0x10] sm:$0xff] }
   0xd   :  { %802 = vmatpush3.bf16.msra.mxu0 %v1014_v19  ;;  %834 = vmatpush3.bf16.msra.mxu1 %v1014_v19  ;;  %v1114_v49 = vpack.c.bf16 %v38_v48, %v37_v47  ;;  %v183_v51 = vld [vmem:[%s1391_s1] sm:$0xff]  ;;  %v59_v52 = vld [vmem:[%s1390_s0 + $0x18] sm:$0xff]  ;;  %v185_v55 = vld [vmem:[%s1391_s1 + $0x10] sm:$0xff] }
   0xe   :  { %804 = vmatprep.subr.bf16.mxu0 %v1018_v20  ;;  %836 = vmatprep.subr.bf16.mxu1 %v1018_v20  ;;  %v186_v53 = vld [vmem:[%s1391_s1 + $0x18] sm:$0xff]  ;;  %v61_v56 = vld [vmem:[%s1390_s0 + $0x28] sm:$0xff]  ;;  %v60_v58 = vld [vmem:[%s1390_s0 + $0x20] sm:$0xff] }
   0xf   :  { %v188_v57 = vld [vmem:[%s1391_s1 + $0x28] sm:$0xff]  ;;  %v187_v59 = vld [vmem:[%s1391_s1 + $0x20] sm:$0xff]  ;;  %v63_v60 = vld [vmem:[%s1390_s0 + $0x38] sm:$0xff] }
  0x10   :  { %v190_v61 = vld [vmem:[%s1391_s1 + $0x38] sm:$0xff]  ;;  %v62_v62 = vld [vmem:[%s1390_s0 + $0x30] sm:$0xff]  ;;  %v65_v0 = vld [vmem:[%s1390_s0 + $0x48] sm:$0xff] }
  0x11   :  { %806 = vmatpush3.bf16.msra.mxu0 %v1040_v27  ;;  %838 = vmatpush3.bf16.msra.mxu1 %v1040_v27  ;;  %v189_v63 = vld [vmem:[%s1391_s1 + $0x30] sm:$0xff]  ;;  %v192_v1 = vld [vmem:[%s1391_s1 + $0x48] sm:$0xff]  ;;  %v64_v2 = vld [vmem:[%s1390_s0 + $0x40] sm:$0xff] }
  0x12   :  { %808 = vmatprep.subr.bf16.mxu0 %v1044_v28  ;;  %840 = vmatprep.subr.bf16.mxu1 %v1044_v28  ;;  %v67_v4 = vld [vmem:[%s1390_s0 + $0x58] sm:$0xff]  ;;  %v66_v6 = vld [vmem:[%s1390_s0 + $0x50] sm:$0xff]  ;;  %v196_v9 = vld [vmem:[%s1391_s1 + $0x68] sm:$0x3] }
  0x13   :  { %v194_v5 = vld [vmem:[%s1391_s1 + $0x58] sm:$0xff]  ;;  %v68_v10 = vld [vmem:[%s1390_s0 + $0x60] sm:$0x3]  ;;  %v312_v12 = vld [vmem:[%s1392_s2 + $0x8] sm:$0xff] }
  0x14   :  { %v195_v11 = vld [vmem:[%s1391_s1 + $0x60] sm:$0x3]  ;;  %v314_v16 = vld [vmem:[%s1392_s2 + $0x18] sm:$0xff]  ;;  %v313_v18 = vld [vmem:[%s1392_s2 + $0x10] sm:$0xff] }
  0x15   :  { %810 = vmatpush3.bf16.msra.mxu0 %v1060_v33  ;;  %842 = vmatpush3.bf16.msra.mxu1 %v1060_v33  ;;  %v432_v15 = vld [vmem:[%s1393_s3] sm:$0xff]  ;;  %v435_v17 = vld [vmem:[%s1393_s3 + $0x18] sm:$0xff]  ;;  %v437_v21 = vld [vmem:[%s1393_s3 + $0x28] sm:$0xff] }
  0x16   :  { %812 = vmatprep.subr.bf16.mxu0 %v1064_v34  ;;  %844 = vmatprep.subr.bf16.mxu1 %v1064_v34  ;;  %v315_v22 = vld [vmem:[%s1392_s2 + $0x20] sm:$0xff]  ;;  %v318_v24 = vld [vmem:[%s1392_s2 + $0x38] sm:$0xff]  ;;  %v317_v26 = vld [vmem:[%s1392_s2 + $0x30] sm:$0xff] }
  0x17   :  { %v436_v23 = vld [vmem:[%s1393_s3 + $0x20] sm:$0xff]  ;;  %v439_v25 = vld [vmem:[%s1393_s3 + $0x38] sm:$0xff]  ;;  %v441_v29 = vld [vmem:[%s1393_s3 + $0x48] sm:$0xff] }
  0x18   :  { %v319_v30 = vld [vmem:[%s1392_s2 + $0x40] sm:$0xff]  ;;  %v322_v32 = vld [vmem:[%s1392_s2 + $0x58] sm:$0xff]  ;;  %v442_v35 = vld [vmem:[%s1393_s3 + $0x50] sm:$0xff] }
  0x19   :  { %814 = vmatpush3.bf16.msra.mxu0 %v1080_v39  ;;  %846 = vmatpush3.bf16.msra.mxu1 %v1080_v39  ;;  %v440_v31 = vld [vmem:[%s1393_s3 + $0x40] sm:$0xff]  ;;  %v324_v36 = vld [vmem:[%s1392_s2 + $0x68] sm:$0x3] }
  0x1a   :  { %816 = vmatprep.subr.bf16.mxu0 %v1084_v40  ;;  %848 = vmatprep.subr.bf16.mxu1 %v1084_v40  ;;  %v445_v37 = vld [vmem:[%s1393_s3 + $0x68] sm:$0x3]  ;;  %v323_v38 = vld [vmem:[%s1392_s2 + $0x60] sm:$0x3] }
  0x1b   :  { %v1317_v42 = vld [vmem:[%s1394_s5] ss:$0 sm:$0xff] }
  0x1d   :  { %818 = vmatpush3.bf16.msra.mxu0 %v1100_v45  ;;  %850 = vmatpush3.bf16.msra.mxu1 %v1100_v45 }
  0x1e   :  { %820 = vmatprep.subr.bf16.mxu0 %v1104_v46  ;;  %852 = vmatprep.subr.bf16.mxu1 %v1104_v46 }
  0x21   :  { %822 = vmatpush3.bf16.msra.mxu0 %v1114_v49  ;;  %854 = vmatpush3.bf16.msra.mxu1 %v1114_v49 }
  0x22   :  { %856 = vmatprep.subr.bf16.mxu0 %v963_v3  ;;  %888 = vmatprep.subr.bf16.mxu1 %v963_v3  ;;  %v191_v3 = vld [vmem:[%s1391_s1 + $0x40] sm:$0xff] }
  0x24   :  { %141 = vmatmul.mubr.f32.vlgmr.msra.gmra.mrb[0].mxu0 %v56_v50  ;;  %262 = vmatmul.mubr.f32.vlgmr.msra.gmra.mrb[0].mxu1 %v183_v51 }
  0x25   :  { %858 = vmatpush3.bf16.msra.mxu0 %v974_v7  ;;  %890 = vmatpush3.bf16.msra.mxu1 %v974_v7  ;;  %v193_v7 = vld [vmem:[%s1391_s1 + $0x50] sm:$0xff] }
  0x26   :  { %860 = vmatprep.subr.bf16.mxu0 %v976_v8  ;;  %892 = vmatprep.subr.bf16.mxu1 %v976_v8  ;;  %v69_v8 = vld [vmem:[%s1390_s0 + $0x68] sm:$0x3] }
  0x27   :  { %145 = vmatprep.mubr.f32.mxu0 %v59_v52  ;;  %266 = vmatprep.mubr.f32.mxu1 %v186_v53 }
  0x28   :  { %146 = vmatmul.mubr.f32.gmra.mrb[2].mxu0 %v58_v54  ;;  %267 = vmatmul.mubr.f32.gmra.mrb[2].mxu1 %v185_v55 }
  0x29   :  { %862 = vmatpush3.bf16.msra.mxu0 %v994_v13  ;;  %894 = vmatpush3.bf16.msra.mxu1 %v994_v13  ;;  %v433_v13 = vld [vmem:[%s1393_s3 + $0x8] sm:$0xff] }
  0x2a   :  { %864 = vmatprep.subr.bf16.mxu0 %v998_v14  ;;  %896 = vmatprep.subr.bf16.mxu1 %v998_v14  ;;  %v311_v14 = vld [vmem:[%s1392_s2] sm:$0xff] }
  0x2b   :  { %150 = vmatprep.mubr.f32.mxu0 %v61_v56  ;;  %271 = vmatprep.mubr.f32.mxu1 %v188_v57 }
  0x2c   :  { %151 = vmatmul.mubr.f32.gmra.mrb[4].mxu0 %v60_v58  ;;  %272 = vmatmul.mubr.f32.gmra.mrb[4].mxu1 %v187_v59 }
  0x2d   :  { %866 = vmatpush3.bf16.msra.mxu0 %v1014_v19  ;;  %898 = vmatpush3.bf16.msra.mxu1 %v1014_v19  ;;  %v434_v19 = vld [vmem:[%s1393_s3 + $0x10] sm:$0xff] }
  0x2e   :  { %868 = vmatprep.subr.bf16.mxu0 %v1018_v20  ;;  %900 = vmatprep.subr.bf16.mxu1 %v1018_v20  ;;  %v316_v20 = vld [vmem:[%s1392_s2 + $0x28] sm:$0xff] }
  0x2f   :  { %155 = vmatprep.mubr.f32.mxu0 %v63_v60  ;;  %276 = vmatprep.mubr.f32.mxu1 %v190_v61 }
  0x30   :  { %156 = vmatmul.mubr.f32.gmra.mrb[6].mxu0 %v62_v62  ;;  %277 = vmatmul.mubr.f32.gmra.mrb[6].mxu1 %v189_v63 }
  0x31   :  { %870 = vmatpush3.bf16.msra.mxu0 %v1040_v27  ;;  %902 = vmatpush3.bf16.msra.mxu1 %v1040_v27  ;;  %v438_v27 = vld [vmem:[%s1393_s3 + $0x30] sm:$0xff] }
  0x32   :  { %872 = vmatprep.subr.bf16.mxu0 %v1044_v28  ;;  %904 = vmatprep.subr.bf16.mxu1 %v1044_v28  ;;  %v320_v28 = vld [vmem:[%s1392_s2 + $0x48] sm:$0xff] }
  0x33   :  { %160 = vmatprep.mubr.f32.mxu0 %v65_v0  ;;  %281 = vmatprep.mubr.f32.mxu1 %v192_v1 }
  0x34   :  { %161 = vmatmul.mubr.f32.gmra.mrb[8].mxu0 %v64_v2  ;;  %282 = vmatmul.mubr.f32.gmra.mrb[8].mxu1 %v191_v3 }
  0x35   :  { %874 = vmatpush3.bf16.msra.mxu0 %v1060_v33  ;;  %906 = vmatpush3.bf16.msra.mxu1 %v1060_v33  ;;  %v443_v33 = vld [vmem:[%s1393_s3 + $0x58] sm:$0xff] }
  0x36   :  { %876 = vmatprep.subr.bf16.mxu0 %v1064_v34  ;;  %908 = vmatprep.subr.bf16.mxu1 %v1064_v34  ;;  %v321_v34 = vld [vmem:[%s1392_s2 + $0x50] sm:$0xff] }
  0x37   :  { %165 = vmatprep.mubr.f32.mxu0 %v67_v4  ;;  %286 = vmatprep.mubr.f32.mxu1 %v194_v5 }
  0x38   :  { %166 = vmatmul.mubr.f32.gmra.mrb[10].mxu0 %v66_v6  ;;  %287 = vmatmul.mubr.f32.gmra.mrb[10].mxu1 %v193_v7 }
  0x39   :  { %878 = vmatpush3.bf16.msra.mxu0 %v1080_v39  ;;  %910 = vmatpush3.bf16.msra.mxu1 %v1080_v39  ;;  %v444_v39 = vld [vmem:[%s1393_s3 + $0x60] sm:$0x3] }
  0x3a   :  { %880 = vmatprep.subr.bf16.mxu0 %v1084_v40  ;;  %912 = vmatprep.subr.bf16.mxu1 %v1084_v40 }
  0x3b   :  { %170 = vmatprep.mubr.f32.mxu0 %v69_v8  ;;  %291 = vmatprep.mubr.f32.mxu1 %v196_v9 }
  0x3c   :  { %171 = vmatmul.mubr.f32.gmra.mrb[12].mxu0 %v68_v10  ;;  %292 = vmatmul.mubr.f32.gmra.mrb[12].mxu1 %v195_v11 }
  0x3d   :  { %882 = vmatpush3.bf16.msra.mxu0 %v1100_v45  ;;  %914 = vmatpush3.bf16.msra.mxu1 %v1100_v45 }
  0x3e   :  { %884 = vmatprep.subr.bf16.mxu0 %v1104_v46  ;;  %916 = vmatprep.subr.bf16.mxu1 %v1104_v46 }
  0x3f   :  { %389 = vmatprep.mubr.f32.mxu0 %v312_v12  ;;  %510 = vmatprep.mubr.f32.mxu1 %v433_v13 }
  0x41   :  { %886 = vmatpush3.bf16.msra.mxu0 %v1114_v49  ;;  %918 = vmatpush3.bf16.msra.mxu1 %v1114_v49 }
  0x44   :  { %390 = vmatmul.mubr.f32.vlgmr.msra.gmra.mrb[14].mxu0 %v311_v14  ;;  %511 = vmatmul.mubr.f32.vlgmr.msra.gmra.mrb[14].mxu1 %v432_v15 }
  0x45   :  { %394 = vmatprep.mubr.f32.mxu0 %v314_v16  ;;  %515 = vmatprep.mubr.f32.mxu1 %v435_v17 }
  0x48   :  { %395 = vmatmul.mubr.f32.gmra.mrb[16].mxu0 %v313_v18  ;;  %516 = vmatmul.mubr.f32.gmra.mrb[16].mxu1 %v434_v19 }
  0x49   :  { %399 = vmatprep.mubr.f32.mxu0 %v316_v20  ;;  %520 = vmatprep.mubr.f32.mxu1 %v437_v21 }
  0x4c   :  { %400 = vmatmul.mubr.f32.gmra.mrb[18].mxu0 %v315_v22  ;;  %521 = vmatmul.mubr.f32.gmra.mrb[18].mxu1 %v436_v23 }
  0x4d   :  { %404 = vmatprep.mubr.f32.mxu0 %v318_v24  ;;  %525 = vmatprep.mubr.f32.mxu1 %v439_v25 }
  0x50   :  { %405 = vmatmul.mubr.f32.gmra.mrb[20].mxu0 %v317_v26  ;;  %526 = vmatmul.mubr.f32.gmra.mrb[20].mxu1 %v438_v27 }
  0x51   :  { %409 = vmatprep.mubr.f32.mxu0 %v320_v28  ;;  %530 = vmatprep.mubr.f32.mxu1 %v441_v29 }
  0x54   :  { %410 = vmatmul.mubr.f32.gmra.mrb[22].mxu0 %v319_v30  ;;  %531 = vmatmul.mubr.f32.gmra.mrb[22].mxu1 %v440_v31 }
  0x55   :  { %414 = vmatprep.mubr.f32.mxu0 %v322_v32  ;;  %535 = vmatprep.mubr.f32.mxu1 %v443_v33 }
  0x58   :  { %415 = vmatmul.mubr.f32.gmra.mrb[24].mxu0 %v321_v34  ;;  %536 = vmatmul.mubr.f32.gmra.mrb[24].mxu1 %v442_v35 }
  0x59   :  { %419 = vmatprep.mubr.f32.mxu0 %v324_v36  ;;  %540 = vmatprep.mubr.f32.mxu1 %v445_v37 }
  0x5c   :  { %420 = vmatmul.mubr.f32.gmra.mrb[26].mxu0 %v323_v38  ;;  %541 = vmatmul.mubr.f32.gmra.mrb[26].mxu1 %v444_v39 }
  0xf7   :  { %v611_v40 = vpop.f32.mrb[0].mxu0  ;;  %v664_v41 = vpop.f32.mrb[0].mxu1 }
  0xf8   :  { %v612_v43 = vpop.f32.mrb[1].mxu0  ;;  %v665_v44 = vpop.f32.mrb[1].mxu1 }
  0xf9   :  { %v613_v45 = vadd.f32 %v612_v43, %v611_v40  ;;  %v666_v46 = vadd.f32 %v665_v44, %v664_v41 }
  0xfb   :  { %v143_v47 = vadd.f32 %v613_v45, %v1317_v42  ;;  %v264_v48 = vadd.f32 %v666_v46, %v1317_v42  ;;  %v614_v49 = vpop.f32.mrb[2].mxu0  ;;  %v667_v50 = vpop.f32.mrb[2].mxu1 }
  0xfc   :  { %v615_v51 = vpop.f32.mrb[3].mxu0  ;;  %v668_v52 = vpop.f32.mrb[3].mxu1 }
  0xfd   :  { %v176_v53 = vmax.f32 %v143_v47, 0.0  ;;  %v297_v54 = vmax.f32 %v264_v48, 0.0  ;;  %v616_v55 = vadd.f32 %v615_v51, %v614_v49  ;;  %v669_v56 = vadd.f32 %v668_v52, %v667_v50 }
  0xff   :  { %v1321_v57 = vmax.f32 %v176_v53, %v297_v54  ;;  %v148_v58 = vadd.f32 %v616_v55, %v1317_v42  ;;  %v269_v59 = vadd.f32 %v669_v56, %v1317_v42  ;;  %v617_v60 = vpop.f32.mrb[4].mxu0  ;;  %v670_v61 = vpop.f32.mrb[4].mxu1 }
 0x100   :  { %v618_v62 = vpop.f32.mrb[5].mxu0  ;;  %v671_v63 = vpop.f32.mrb[5].mxu1 }
 0x101   :  { %v177_v0 = vmax.f32 %v148_v58, 0.0  ;;  %v298_v1 = vmax.f32 %v269_v59, 0.0  ;;  %v619_v2 = vadd.f32 %v618_v62, %v617_v60  ;;  %v672_v3 = vadd.f32 %v671_v63, %v670_v61 }
 0x103   :  { %v1325_v4 = vmax.f32 %v177_v0, %v298_v1  ;;  %v153_v5 = vadd.f32 %v619_v2, %v1317_v42  ;;  %v274_v6 = vadd.f32 %v672_v3, %v1317_v42  ;;  %v620_v7 = vpop.f32.mrb[6].mxu0  ;;  %v673_v8 = vpop.f32.mrb[6].mxu1 }
 0x104   :  { %v621_v9 = vpop.f32.mrb[7].mxu0  ;;  %v674_v10 = vpop.f32.mrb[7].mxu1 }
 0x105   :  { %v178_v11 = vmax.f32 %v153_v5, 0.0  ;;  %v299_v12 = vmax.f32 %v274_v6, 0.0  ;;  %v622_v13 = vadd.f32 %v621_v9, %v620_v7  ;;  %v675_v14 = vadd.f32 %v674_v10, %v673_v8 }
 0x107   :  { %v1329_v15 = vmax.f32 %v178_v11, %v299_v12  ;;  %v158_v16 = vadd.f32 %v622_v13, %v1317_v42  ;;  %v279_v17 = vadd.f32 %v675_v14, %v1317_v42  ;;  %v623_v18 = vpop.f32.mrb[8].mxu0  ;;  %v676_v19 = vpop.f32.mrb[8].mxu1 }
 0x108   :  { %v624_v20 = vpop.f32.mrb[9].mxu0  ;;  %v677_v21 = vpop.f32.mrb[9].mxu1 }
 0x109   :  { %v179_v22 = vmax.f32 %v158_v16, 0.0  ;;  %v300_v23 = vmax.f32 %v279_v17, 0.0  ;;  %v625_v24 = vadd.f32 %v624_v20, %v623_v18  ;;  %v678_v25 = vadd.f32 %v677_v21, %v676_v19 }
 0x10b   :  { %v1333_v26 = vmax.f32 %v179_v22, %v300_v23  ;;  %v163_v27 = vadd.f32 %v625_v24, %v1317_v42  ;;  %v284_v28 = vadd.f32 %v678_v25, %v1317_v42  ;;  %v626_v29 = vpop.f32.mrb[10].mxu0  ;;  %v679_v30 = vpop.f32.mrb[10].mxu1 }
 0x10c   :  { %v627_v31 = vpop.f32.mrb[11].mxu0  ;;  %v680_v32 = vpop.f32.mrb[11].mxu1 }
 0x10d   :  { %v180_v33 = vmax.f32 %v163_v27, 0.0  ;;  %v301_v34 = vmax.f32 %v284_v28, 0.0  ;;  %v628_v35 = vadd.f32 %v627_v31, %v626_v29  ;;  %v681_v36 = vadd.f32 %v680_v32, %v679_v30 }
 0x10f   :  { %v1337_v37 = vmax.f32 %v180_v33, %v301_v34  ;;  %v168_v38 = vadd.f32 %v628_v35, %v1317_v42  ;;  %v289_v39 = vadd.f32 %v681_v36, %v1317_v42  ;;  %v629_v40 = vpop.f32.mrb[12].mxu0  ;;  %v682_v41 = vpop.f32.mrb[12].mxu1 }
 0x110   :  { %v630_v43 = vpop.f32.mrb[13].mxu0  ;;  %v683_v44 = vpop.f32.mrb[13].mxu1 }
 0x111   :  { %v181_v45 = vmax.f32 %v168_v38, 0.0  ;;  %v302_v46 = vmax.f32 %v289_v39, 0.0  ;;  %v631_v47 = vadd.f32 %v630_v43, %v629_v40  ;;  %v684_v48 = vadd.f32 %v683_v44, %v682_v41 }
 0x113   :  { %v1341_v49 = vmax.f32 %v181_v45, %v302_v46  ;;  %v173_v50 = vadd.f32 %v631_v47, %v1317_v42  ;;  %v294_v51 = vadd.f32 %v684_v48, %v1317_v42 }
 0x115   :  { %v182_v52 = vmax.f32 %v173_v50, 0.0  ;;  %v303_v53 = vmax.f32 %v294_v51, 0.0 }
 0x117   :  { %v1345_v54 = vmax.f32 %v182_v52, %v303_v53  ;;  %v717_v55 = vpop.f32.mrb[14].mxu0  ;;  %v770_v56 = vpop.f32.mrb[14].mxu1 }
 0x118   :  { %v718_v58 = vpop.f32.mrb[15].mxu0  ;;  %v771_v59 = vpop.f32.mrb[15].mxu1 }
 0x119   :  { %v719_v60 = vadd.f32 %v718_v58, %v717_v55  ;;  %v772_v61 = vadd.f32 %v771_v59, %v770_v56 }
 0x11b   :  { %v392_v62 = vadd.f32 %v719_v60, %v1317_v42  ;;  %v513_v63 = vadd.f32 %v772_v61, %v1317_v42  ;;  %v720_v0 = vpop.f32.mrb[16].mxu0  ;;  %v773_v1 = vpop.f32.mrb[16].mxu1 }
 0x11c   :  { %v721_v2 = vpop.f32.mrb[17].mxu0  ;;  %v774_v3 = vpop.f32.mrb[17].mxu1 }
 0x11d   :  { %v425_v5 = vmax.f32 %v392_v62, 0.0  ;;  %v546_v6 = vmax.f32 %v513_v63, 0.0  ;;  %v722_v7 = vadd.f32 %v721_v2, %v720_v0  ;;  %v775_v8 = vadd.f32 %v774_v3, %v773_v1 }
 0x11f   :  { %v553_v9 = vmax.f32 %v425_v5, %v546_v6  ;;  %v397_v10 = vadd.f32 %v722_v7, %v1317_v42  ;;  %v518_v11 = vadd.f32 %v775_v8, %v1317_v42  ;;  %v723_v12 = vpop.f32.mrb[18].mxu0  ;;  %v776_v13 = vpop.f32.mrb[18].mxu1 }
 0x120   :  { %v724_v14 = vpop.f32.mrb[19].mxu0  ;;  %v777_v16 = vpop.f32.mrb[19].mxu1 }
 0x121   :  { %v560_v17 = vmax.f32 %v1321_v57, %v553_v9  ;;  %v426_v18 = vmax.f32 %v397_v10, 0.0  ;;  %v547_v19 = vmax.f32 %v518_v11, 0.0  ;;  %v725_v20 = vadd.f32 %v724_v14, %v723_v12 }
 0x122   :  { %v778_v21 = vadd.f32 %v777_v16, %v776_v13 }
 0x123   :  { %567 = vst [vmem:[%s1395_s6] sm:$0xff] %v560_v17  ;;  %v554_v22 = vmax.f32 %v426_v18, %v547_v19  ;;  %v402_v23 = vadd.f32 %v725_v20, %v1317_v42  ;;  %v726_v24 = vpop.f32.mrb[20].mxu0  ;;  %v779_v25 = vpop.f32.mrb[20].mxu1 }
 0x124   :  { %v523_v27 = vadd.f32 %v778_v21, %v1317_v42  ;;  %v727_v28 = vpop.f32.mrb[21].mxu0  ;;  %v780_v29 = vpop.f32.mrb[21].mxu1 }
 0x125   :  { %v561_v30 = vmax.f32 %v1325_v4, %v554_v22  ;;  %v427_v57 = vmax.f32 %v402_v23, 0.0  ;;  %v728_v31 = vadd.f32 %v727_v28, %v726_v24  ;;  %v781_v32 = vadd.f32 %v780_v29, %v779_v25 }
 0x126   :  { %v548_v33 = vmax.f32 %v523_v27, 0.0 }
 0x127   :  { %568 = vst [vmem:[%s1395_s6 + $0x8] sm:$0xff] %v561_v30  ;;  %v407_v34 = vadd.f32 %v728_v31, %v1317_v42  ;;  %v528_v35 = vadd.f32 %v781_v32, %v1317_v42  ;;  %v729_v36 = vpop.f32.mrb[22].mxu0  ;;  %v782_v38 = vpop.f32.mrb[22].mxu1 }
 0x128   :  { %v555_v39 = vmax.f32 %v427_v57, %v548_v33  ;;  %v730_v40 = vpop.f32.mrb[23].mxu0  ;;  %v783_v41 = vpop.f32.mrb[23].mxu1 }
 0x129   :  { %v428_v43 = vmax.f32 %v407_v34, 0.0  ;;  %v549_v44 = vmax.f32 %v528_v35, 0.0  ;;  %v731_v4 = vadd.f32 %v730_v40, %v729_v36  ;;  %v784_v45 = vadd.f32 %v783_v41, %v782_v38 }
 0x12a   :  { %v562_v46 = vmax.f32 %v1329_v15, %v555_v39 }
 0x12b   :  { %v556_v47 = vmax.f32 %v428_v43, %v549_v44  ;;  %v412_v48 = vadd.f32 %v731_v4, %v1317_v42  ;;  %v533_v50 = vadd.f32 %v784_v45, %v1317_v42  ;;  %v732_v51 = vpop.f32.mrb[24].mxu0  ;;  %v785_v52 = vpop.f32.mrb[24].mxu1 }
 0x12c   :  { %569 = vst [vmem:[%s1395_s6 + $0x10] sm:$0xff] %v562_v46  ;;  %v733_v53 = vpop.f32.mrb[25].mxu0  ;;  %v786_v55 = vpop.f32.mrb[25].mxu1 }
 0x12d   :  { %v563_v56 = vmax.f32 %v1333_v26, %v556_v47  ;;  %v429_v58 = vmax.f32 %v412_v48, 0.0  ;;  %v550_v59 = vmax.f32 %v533_v50, 0.0  ;;  %v734_v60 = vadd.f32 %v733_v53, %v732_v51 }
 0x12e   :  { %v787_v61 = vadd.f32 %v786_v55, %v785_v52 }
 0x12f   :  { %570 = vst [vmem:[%s1395_s6 + $0x18] sm:$0xff] %v563_v56  ;;  %v557_v15 = vmax.f32 %v429_v58, %v550_v59  ;;  %v417_v62 = vadd.f32 %v734_v60, %v1317_v42  ;;  %v735_v63 = vpop.f32.mrb[26].mxu0  ;;  %v788_v0 = vpop.f32.mrb[26].mxu1 }
 0x130   :  { %v538_v1 = vadd.f32 %v787_v61, %v1317_v42  ;;  %v736_v2 = vpop.f32.mrb[27].mxu0  ;;  %v789_v3 = vpop.f32.mrb[27].mxu1 }
 0x131   :  { %v564_v5 = vmax.f32 %v1337_v37, %v557_v15  ;;  %v430_v26 = vmax.f32 %v417_v62, 0.0  ;;  %v737_v6 = vadd.f32 %v736_v2, %v735_v63  ;;  %v790_v7 = vadd.f32 %v789_v3, %v788_v0 }
 0x132   :  { %v551_v8 = vmax.f32 %v538_v1, 0.0 }
 0x133   :  { %571 = vst [vmem:[%s1395_s6 + $0x20] sm:$0xff] %v564_v5  ;;  %v422_v9 = vadd.f32 %v737_v6, %v1317_v42  ;;  %v543_v10 = vadd.f32 %v790_v7, %v1317_v42 }
 0x134   :  { %v558_v11 = vmax.f32 %v430_v26, %v551_v8 }
 0x135   :  { %v431_v12 = vmax.f32 %v422_v9, 0.0  ;;  %v552_v13 = vmax.f32 %v543_v10, 0.0 }
 0x136   :  { %v565_v14 = vmax.f32 %v1341_v49, %v558_v11 }
 0x137   :  { %v559_v16 = vmax.f32 %v431_v12, %v552_v13 }
 0x138   :  { %572 = vst [vmem:[%s1395_s6 + $0x28] sm:$0xff] %v565_v14 }
 0x139   :  { %v566_v37 = vmax.f32 %v1345_v54, %v559_v16 }
 0x13b   :  { %573 = vst [vmem:[%s1395_s6 + $0x30] sm:$0x3] %v566_v37 }

// kernel: lenet_forward.5
= control target key start
LH: loop header
LB: loop body
LE: loop exit
PB: predicated region body
PF: predicated region fallthrough
CT: control target
= control target key end

     0   :  { %v732_v4 = vmov 0.0|0.0   ;;  %v733_v26 = vmov 1983009808   ;;  %v90_v28 = vlaneseq  ;;  %vm106_vm0 = vcmask 130048   ;;  %s1072_s0 = inlined_call_operand.vmem [shape: f32[2,400], index: 0, kind: input, shape index: {}]   ;;  %s1073_s1 = inlined_call_operand.vmem [shape: f32[400,128], index: 1, kind: input, shape index: {}]   ;;  %s1074_s2 = inlined_call_operand.vmem [shape: f32[1,128], index: 2, kind: input, shape index: {}]   ;;  %s1075_s3 = inlined_call_operand.vmem [shape: f32[128,128], index: 3, kind: input, shape index: {}]   ;;  %s1076_s4 = inlined_call_operand.vmem [shape: f32[1,128], index: 4, kind: input, shape index: {}]   ;;  %s1077_s5 = inlined_call_operand.vmem [shape: f32[128,128], index: 5, kind: input, shape index: {}]   ;;  %s1078_s6 = inlined_call_operand.vmem [shape: f32[1,128], index: 6, kind: input, shape index: {}]   ;;  %s1079_s7 = inlined_call_operand.hbm [shape: f32[2,128], index: 7, kind: output, shape index: {}]  }
   0x1   :  { %v44_v0 = vld [vmem:[%s1073_s1 + $0x80] sm:$0xff]  ;;  %v45_v1 = vld [vmem:[%s1073_s1 + $0x88] sm:$0xff]  ;;  %627 = vmatprep.subr.bf16.mxu1 %v732_v4  ;;  %v46_v10 = vld [vmem:[%s1073_s1 + $0x90] sm:$0xff]  ;;  %v88_v27 = vunpack.c.l.s4 %v733_v26 }
   0x2   :  { %v28_v2 = vld [vmem:[%s1073_s1] sm:$0xff]  ;;  %v595_v3 = vpack.c.bf16 %v45_v1, %v44_v0  ;;  %v29_v5 = vld [vmem:[%s1073_s1 + $0x8] sm:$0xff]  ;;  %v47_v11 = vld [vmem:[%s1073_s1 + $0x98] sm:$0xff]  ;;  %v91_v39 = vshrl.u32 %v90_v28, 7 }
   0x3   :  { %v60_v6 = vld [vmem:[%s1073_s1 + $0x100] sm:$0xff]  ;;  %v61_v7 = vld [vmem:[%s1073_s1 + $0x108] sm:$0xff]  ;;  %v597_v8 = vpack.c.bf16 %v29_v5, %v28_v2  ;;  %v30_v12 = vld [vmem:[%s1073_s1 + $0x10] sm:$0xff]  ;;  %v599_v13 = vpack.c.bf16 %v47_v11, %v46_v10  ;;  %v89_v38 = vunpack.c.0.s8 %v88_v27 }
   0x4   :  { %v628_v9 = vpack.c.bf16 %v61_v7, %v60_v6  ;;  %596 = vmatprep.subr.bf16.mxu0 %v595_v3  ;;  %v31_v14 = vld [vmem:[%s1073_s1 + $0x18] sm:$0xff]  ;;  %v62_v15 = vld [vmem:[%s1073_s1 + $0x110] sm:$0xff]  ;;  %v48_v19 = vld [vmem:[%s1073_s1 + $0xa0] sm:$0xff] }
   0x5   :  { %v63_v16 = vld [vmem:[%s1073_s1 + $0x118] sm:$0xff]  ;;  %598 = vmatpush3.bf16.msra.mxu0 %v597_v8  ;;  %v601_v17 = vpack.c.bf16 %v31_v14, %v30_v12  ;;  %v49_v20 = vld [vmem:[%s1073_s1 + $0xa8] sm:$0xff]  ;;  %v32_v21 = vld [vmem:[%s1073_s1 + $0x20] sm:$0xff]  ;;  %v92_v49 = vsub.s32 %v89_v38, %v91_v39 }
   0x6   :  { %629 = vmatpush1.bf16.msra.mxu1 %v628_v9  ;;  %v631_v18 = vpack.c.bf16 %v63_v16, %v62_v15  ;;  %600 = vmatprep.subr.bf16.mxu0 %v599_v13  ;;  %v603_v22 = vpack.c.bf16 %v49_v20, %v48_v19  ;;  %v33_v23 = vld [vmem:[%s1073_s1 + $0x28] sm:$0xff]  ;;  %v64_v24 = vld [vmem:[%s1073_s1 + $0x120] sm:$0xff]  ;;  %v50_v29 = vld [vmem:[%s1073_s1 + $0xb0] sm:$0xff] }
   0x7   :  { %630 = vmatprep.subr.bf16.mxu1 %v732_v4  ;;  %v65_v25 = vld [vmem:[%s1073_s1 + $0x128] sm:$0xff]  ;;  %v51_v30 = vld [vmem:[%s1073_s1 + $0xb8] sm:$0xff]  ;;  %v605_v31 = vpack.c.bf16 %v33_v23, %v32_v21  ;;  %v34_v33 = vld [vmem:[%s1073_s1 + $0x30] sm:$0xff] }
   0x8   :  { %v634_v32 = vpack.c.bf16 %v65_v25, %v64_v24  ;;  %v607_v34 = vpack.c.bf16 %v51_v30, %v50_v29  ;;  %v35_v35 = vld [vmem:[%s1073_s1 + $0x38] sm:$0xff]  ;;  %v66_v36 = vld [vmem:[%s1073_s1 + $0x130] sm:$0xff]  ;;  %v52_v40 = vld [vmem:[%s1073_s1 + $0xc0] sm:$0xff] }
   0x9   :  { %602 = vmatpush3.bf16.msra.mxu0 %v601_v17  ;;  %v67_v37 = vld [vmem:[%s1073_s1 + $0x138] sm:$0xff]  ;;  %v53_v41 = vld [vmem:[%s1073_s1 + $0xc8] sm:$0xff]  ;;  %v609_v42 = vpack.c.bf16 %v35_v35, %v34_v33  ;;  %v36_v44 = vld [vmem:[%s1073_s1 + $0x40] sm:$0xff] }
   0xa   :  { %632 = vmatpush1.bf16.msra.mxu1 %v631_v18  ;;  %604 = vmatprep.subr.bf16.mxu0 %v603_v22  ;;  %v637_v43 = vpack.c.bf16 %v67_v37, %v66_v36  ;;  %v611_v45 = vpack.c.bf16 %v53_v41, %v52_v40  ;;  %v37_v46 = vld [vmem:[%s1073_s1 + $0x48] sm:$0xff]  ;;  %v68_v47 = vld [vmem:[%s1073_s1 + $0x140] sm:$0xff]  ;;  %v54_v50 = vld [vmem:[%s1073_s1 + $0xd0] sm:$0xff] }
   0xb   :  { %633 = vmatprep.subr.bf16.mxu1 %v732_v4  ;;  %v69_v48 = vld [vmem:[%s1073_s1 + $0x148] sm:$0xff]  ;;  %v55_v51 = vld [vmem:[%s1073_s1 + $0xd8] sm:$0xff]  ;;  %v613_v52 = vpack.c.bf16 %v37_v46, %v36_v44  ;;  %v38_v54 = vld [vmem:[%s1073_s1 + $0x50] sm:$0xff] }
   0xc   :  { %v640_v53 = vpack.c.bf16 %v69_v48, %v68_v47  ;;  %v27_v55 = vld [vmem:[%s1072_s0] sm:$0xff]  ;;  %v615_v56 = vpack.c.bf16 %v55_v51, %v54_v50  ;;  %v39_v57 = vld [vmem:[%s1073_s1 + $0x58] sm:$0xff]  ;;  %v70_v58 = vld [vmem:[%s1073_s1 + $0x150] sm:$0xff] }
   0xd   :  { %606 = vmatpush3.bf16.msra.mxu0 %v605_v31  ;;  %v71_v59 = vld [vmem:[%s1073_s1 + $0x158] sm:$0xff]  ;;  %v86_v60 = vcombine.high %v27_v55, %v27_v55  ;;  %v93_v61 = vrot.slane %v27_v55, %v92_v49  ;;  %v56_v62 = vld [vmem:[%s1073_s1 + $0xe0] sm:$0xff]  ;;  %v57_v63 = vld [vmem:[%s1073_s1 + $0xe8] sm:$0xff]  ;;  %v617_v2 = vpack.c.bf16 %v39_v57, %v38_v54 }
   0xe   :  { %635 = vmatpush1.bf16.msra.mxu1 %v634_v32  ;;  %608 = vmatprep.subr.bf16.mxu0 %v607_v34  ;;  %v643_v3 = vpack.c.bf16 %v71_v59, %v70_v58  ;;  %v40_v5 = vld [vmem:[%s1073_s1 + $0x60] sm:$0xff]  ;;  %v41_v6 = vld [vmem:[%s1073_s1 + $0x68] sm:$0xff]  ;;  %v619_v7 = vpack.c.bf16 %v57_v63, %v56_v62 }
   0xf   :  { %636 = vmatprep.subr.bf16.mxu1 %v732_v4  ;;  %v101_v0 = vcombine.high %v93_v61, %v93_v61  ;;  %v100_v1 = vrot.slane %v86_v60, %v92_v49  ;;  %v72_v8 = vld [vmem:[%s1073_s1 + $0x160] sm:$0xff]  ;;  %v73_v9 = vld [vmem:[%s1073_s1 + $0x168] sm:$0xff] }
  0x11   :  { %610 = vmatpush3.bf16.msra.mxu0 %v609_v42  ;;  %v102_v10 = vcombine.high %v100_v1, %v100_v1 }
  0x12   :  { %638 = vmatpush1.bf16.msra.mxu1 %v637_v43  ;;  %612 = vmatprep.subr.bf16.mxu0 %v611_v45 }
  0x13   :  { %639 = vmatprep.subr.bf16.mxu1 %v732_v4 }
  0x15   :  { %614 = vmatpush3.bf16.msra.mxu0 %v613_v52 }
  0x16   :  { %641 = vmatpush1.bf16.msra.mxu1 %v640_v53  ;;  %616 = vmatprep.subr.bf16.mxu0 %v615_v56 }
  0x17   :  { %642 = vmatprep.subr.bf16.mxu1 %v732_v4 }
  0x18   :  { %12 = vsyncpa [#allocation3], 0  ;;  %v58_v11 = vld [vmem:[%s1073_s1 + $0xf0] sm:$0xff]  ;;  %v59_v12 = vld [vmem:[%s1073_s1 + $0xf8] sm:$0xff]  ;;  %173 = vmatprep.mubr.f32.mxu0 %v101_v0  ;;  %453 = vmatprep.mubr.msk.f32.mxu1 %vm106_vm0, %v102_v10  ;;  %v621_v13 = vpack.c.bf16 %v41_v6, %v40_v5  ;;  %v646_v14 = vpack.c.bf16 %v73_v9, %v72_v8  ;;  %vm734_vm1 = vmmov 0   ;;  %v735_v49 = vmov 0.0  }
  0x19   :  { %618 = vmatpush3.bf16.msra.mxu0 %v617_v2  ;;  %v42_v15 = vld [vmem:[%s1073_s1 + $0x70] sm:$0xff]  ;;  %v623_v16 = vpack.c.bf16 %v59_v12, %v58_v11  ;;  %v43_v17 = vld [vmem:[%s1073_s1 + $0x78] sm:$0xff]  ;;  %v76_v22 = vld [vmem:[%s1073_s1 + $0x180] sm:$0xff]  ;;  %s736_s25 = smov [#allocation2]  }
  0x1a   :  { %644 = vmatpush1.bf16.msra.mxu1 %v643_v3  ;;  %620 = vmatprep.subr.bf16.mxu0 %v619_v7  ;;  %v74_v18 = vld [vmem:[%s1073_s1 + $0x170] sm:$0xff]  ;;  %v75_v19 = vld [vmem:[%s1073_s1 + $0x178] sm:$0xff]  ;;  %v625_v20 = vpack.c.bf16 %v43_v17, %v42_v15  ;;  %v77_v23 = vld [vmem:[%s1073_s1 + $0x188] sm:$0xff]  ;;  %s444_s26 = sshll.u32 %s736_s25, 4  ;;  %s445_s26 = int_to_ptr.vmem [resolvable:$true] %s444_s26 }
  0x1b   :  { %645 = vmatprep.subr.bf16.mxu1 %v732_v4  ;;  %v649_v21 = vpack.c.bf16 %v75_v19, %v74_v18  ;;  %v250_v24 = vld [vmem:[%s1075_s3] sm:$0xff]  ;;  %v251_v25 = vld [vmem:[%s1075_s3 + $0x8] sm:$0xff]  ;;  %v652_v26 = vpack.c.bf16 %v77_v23, %v76_v22  ;;  %v252_v28 = vld [vmem:[%s1075_s3 + $0x10] sm:$0xff]  ;;  %p713_p1 = scmp.lt.s32.totalorder %s445_s26, %s445_s26 }
  0x1c   :  { %v655_v27 = vpack.c.bf16 %v251_v25, %v250_v24  ;;  %v253_v29 = vld [vmem:[%s1075_s3 + $0x18] sm:$0xff]  ;;  %v254_v31 = vld [vmem:[%s1075_s3 + $0x20] sm:$0xff]  ;;  %v255_v32 = vld [vmem:[%s1075_s3 + $0x28] sm:$0xff] }
  0x1d   :  { %622 = vmatpush3.bf16.msra.mxu0 %v621_v13  ;;  %v658_v30 = vpack.c.bf16 %v253_v29, %v252_v28  ;;  %v661_v33 = vpack.c.bf16 %v255_v32, %v254_v31  ;;  %v256_v34 = vld [vmem:[%s1075_s3 + $0x30] sm:$0xff]  ;;  %v257_v35 = vld [vmem:[%s1075_s3 + $0x38] sm:$0xff]  ;;  %v258_v37 = vld [vmem:[%s1075_s3 + $0x40] sm:$0xff] }
  0x1e   :  { %647 = vmatpush1.bf16.msra.mxu1 %v646_v14  ;;  %624 = vmatprep.subr.bf16.mxu0 %v623_v16  ;;  %v664_v36 = vpack.c.bf16 %v257_v35, %v256_v34  ;;  %v259_v38 = vld [vmem:[%s1075_s3 + $0x48] sm:$0xff]  ;;  %v260_v40 = vld [vmem:[%s1075_s3 + $0x50] sm:$0xff]  ;;  %v261_v41 = vld [vmem:[%s1075_s3 + $0x58] sm:$0xff] }
  0x1f   :  { %648 = vmatprep.subr.bf16.mxu1 %v732_v4  ;;  %v667_v39 = vpack.c.bf16 %v259_v38, %v258_v37  ;;  %v670_v42 = vpack.c.bf16 %v261_v41, %v260_v40  ;;  %v262_v43 = vld [vmem:[%s1075_s3 + $0x60] sm:$0xff]  ;;  %v263_v44 = vld [vmem:[%s1075_s3 + $0x68] sm:$0xff]  ;;  %v264_v46 = vld [vmem:[%s1075_s3 + $0x70] sm:$0xff] }
  0x20   :  { %v673_v45 = vpack.c.bf16 %v263_v44, %v262_v43  ;;  %v265_v47 = vld [vmem:[%s1075_s3 + $0x78] sm:$0xff]  ;;  %v344_v50 = vld [vmem:[%s1077_s5] sm:$0xff]  ;;  %v345_v51 = vld [vmem:[%s1077_s5 + $0x8] sm:$0xff] }
  0x21   :  { %626 = vmatpush3.bf16.msra.mxu0 %v625_v20  ;;  %v676_v48 = vpack.c.bf16 %v265_v47, %v264_v46  ;;  %v346_v52 = vld [vmem:[%s1077_s5 + $0x10] sm:$0xff]  ;;  %v679_v53 = vpack.c.bf16 %v345_v51, %v344_v50  ;;  %v347_v54 = vld [vmem:[%s1077_s5 + $0x18] sm:$0xff]  ;;  %v348_v56 = vld [vmem:[%s1077_s5 + $0x20] sm:$0xff] }
  0x22   :  { %650 = vmatpush1.bf16.msra.mxu1 %v649_v21  ;;  %654 = vmatprep.subr.bf16.mxu0 %v732_v4  ;;  %v682_v55 = vpack.c.bf16 %v347_v54, %v346_v52  ;;  %v349_v57 = vld [vmem:[%s1077_s5 + $0x28] sm:$0xff]  ;;  %v350_v59 = vld [vmem:[%s1077_s5 + $0x30] sm:$0xff]  ;;  %v351_v60 = vld [vmem:[%s1077_s5 + $0x38] sm:$0xff] }
  0x23   :  { %651 = vmatprep.subr.bf16.mxu1 %v732_v4  ;;  %v685_v58 = vpack.c.bf16 %v349_v57, %v348_v56  ;;  %v352_v62 = vld [vmem:[%s1077_s5 + $0x40] sm:$0xff]  ;;  %v353_v63 = vld [vmem:[%s1077_s5 + $0x48] sm:$0xff]  ;;  %v355_v2 = vld [vmem:[%s1077_s5 + $0x58] sm:$0xff] }
  0x24   :  { %174 = vmatmul.mubr.f32.vlgmr.msra.gmra.mrb[0].mxu0 %v93_v61  ;;  %v688_v61 = vpack.c.bf16 %v351_v60, %v350_v59  ;;  %v691_v0 = vpack.c.bf16 %v353_v63, %v352_v62  ;;  %v356_v5 = vld [vmem:[%s1077_s5 + $0x60] sm:$0xff]  ;;  %v357_v6 = vld [vmem:[%s1077_s5 + $0x68] sm:$0xff]  ;;  %v358_v17 = vld [vmem:[%s1077_s5 + $0x70] sm:$0xff] }
  0x25   :  { %656 = vmatpush3.bf16.msra.mxu0 %v655_v27  ;;  %557 = vmatprep.mubr.msk.f32.mxu0 %vm734_vm1, %v735_v49  ;;  %v697_v7 = vpack.c.bf16 %v357_v6, %v356_v5  ;;  %v452_v10 = vld [vmem:[%s1074_s2] ss:$0 sm:$0xff] }
  0x26   :  { %653 = vmatpush1.bf16.msra.mxu1 %v652_v26  ;;  %657 = vmatprep.subr.bf16.mxu0 %v732_v4  ;;  %v454_v19 = vld [vmem:[%s1076_s4] ss:$0 sm:$0xff] }
  0x27   :  { %678 = vmatprep.subr.bf16.mxu1 %v732_v4  ;;  %v455_v24 = vld [vmem:[%s1078_s6] ss:$0 sm:$0xff] }
  0x29   :  { %244 = vmatmul.mubr.f32.vlgmr.msra.gmra.mrb[0].mxu1 %v100_v1  ;;  %659 = vmatpush3.bf16.msra.mxu0 %v658_v30  ;;  %v354_v1 = vld [vmem:[%s1077_s5 + $0x50] sm:$0xff] }
  0x2a   :  { %660 = vmatprep.subr.bf16.mxu0 %v732_v4  ;;  %592 = vmatprep.mubr.msk.f32.mxu1 %vm734_vm1, %v735_v49  ;;  %v694_v3 = vpack.c.bf16 %v355_v2, %v354_v1 }
  0x2b   :  { %680 = vmatpush3.bf16.msra.mxu1 %v679_v53 }
  0x2c   :  { %681 = vmatprep.subr.bf16.mxu1 %v732_v4 }
  0x2d   :  { %662 = vmatpush3.bf16.msra.mxu0 %v661_v33 }
  0x2e   :  { %663 = vmatprep.subr.bf16.mxu0 %v732_v4 }
  0x2f   :  { %683 = vmatpush3.bf16.msra.mxu1 %v682_v55 }
  0x30   :  { %684 = vmatprep.subr.bf16.mxu1 %v732_v4 }
  0x31   :  { %665 = vmatpush3.bf16.msra.mxu0 %v664_v36 }
  0x32   :  { %666 = vmatprep.subr.bf16.mxu0 %v732_v4 }
  0x33   :  { %686 = vmatpush3.bf16.msra.mxu1 %v685_v58 }
  0x34   :  { %687 = vmatprep.subr.bf16.mxu1 %v732_v4 }
  0x35   :  { %668 = vmatpush3.bf16.msra.mxu0 %v667_v39 }
  0x36   :  { %669 = vmatprep.subr.bf16.mxu0 %v732_v4 }
  0x37   :  { %689 = vmatpush3.bf16.msra.mxu1 %v688_v61 }
  0x38   :  { %690 = vmatprep.subr.bf16.mxu1 %v732_v4 }
  0x39   :  { %671 = vmatpush3.bf16.msra.mxu0 %v670_v42 }
  0x3a   :  { %672 = vmatprep.subr.bf16.mxu0 %v732_v4 }
  0x3b   :  { %692 = vmatpush3.bf16.msra.mxu1 %v691_v0 }
  0x3c   :  { %693 = vmatprep.subr.bf16.mxu1 %v732_v4 }
  0x3d   :  { %674 = vmatpush3.bf16.msra.mxu0 %v673_v45 }
  0x3e   :  { %675 = vmatprep.subr.bf16.mxu0 %v732_v4 }
  0x3f   :  { %695 = vmatpush3.bf16.msra.mxu1 %v694_v3 }
  0x40   :  { %696 = vmatprep.subr.bf16.mxu1 %v732_v4 }
  0x41   :  { %677 = vmatpush3.bf16.msra.mxu0 %v676_v48 }
  0x43   :  { %698 = vmatpush3.bf16.msra.mxu1 %v697_v7 }
  0x44   :  { %699 = vmatprep.subr.bf16.mxu1 %v732_v4  ;;  %v359_v4 = vld [vmem:[%s1077_s5 + $0x78] sm:$0xff]  ;;  %s708_s5 = scalar_lea.vmem %s445_s26, 32 }
  0x45   :  { %v700_v18 = vpack.c.bf16 %v359_v4, %v358_v17  ;;  %p709_p0 = scmp.ne.s32.totalorder %s445_s26, %s708_s5  ;;  %p714_p2 = scmp.lt.s32.totalorder %s708_s5, %s708_s5 }
  0x47   :  { %701 = vmatpush3.bf16.msra.mxu1 %v700_v18  ;;  %p715_p3 = por %p714_p2, %p713_p1 }
  0x49   :  { %p716_p4 = pnand %p715_p3, %p709_p0 }
  0xf7   :  { %v488_v8 = vpop.f32.mrb[0].mxu0 }
  0xf8   :  { %v489_v9 = vpop.f32.mrb[1].mxu0 }
  0xf9   :  { %v490_v11 = vadd.f32 %v489_v9, %v488_v8 }
  0xfb   :  { %v176_v12 = vadd.f32 %v490_v11, %v452_v10 }
  0xfc   :  { %v245_v13 = vpop.f32.mrb[0].mxu1 }
  0xfd   :  { %v247_v14 = vpop.f32.mrb[1].mxu1  ;;  %v246_v15 = vadd.f32 %v245_v13, %v176_v12 }
  0xff   :  { %v249_v16 = vmax.f32 %v246_v15, 0.0 }
 0x101   :  { %558 = vmatmul.mubr.f32.vlgmr.msra.gmra.mrb[2].mxu0 %v249_v16 }
 0x1d4   :  { %v339_v20 = vpop.f32.mrb[2].mxu0 }
 0x1d5   :  { %v340_v21 = vadd.f32 %v454_v19, %v339_v20  ;;  %v559_v22 = vpop.f32.mrb[3].mxu0 }
 0x1d7   :  { %v343_v23 = vmax.f32 %v340_v21, 0.0 }
 0x1d9   :  { %593 = vmatmul.mubr.f32.vlgmr.msra.gmra.mrb[2].mxu1 %v343_v23 }
 0x2ac   :  { %v433_v25 = vpop.f32.mrb[2].mxu1 }
 0x2ad   :  { %v434_v26 = vadd.f32 %v455_v24, %v433_v25  ;;  %v594_v27 = vpop.f32.mrb[3].mxu1 }
 0x2af   :  { %437 = vst [vmem:[#allocation2] sm:$0x3] %v434_v26 }
 0x2b0   :  { %719 = shalt.err (!%p716_p4)
}
 0x2b1   :  { %s720_s28 = scalar_lea.hbm %s1079_s7, 32 }
 0x2b2   :  { %p721_p5 = scmp.ne.s32.totalorder %s1079_s7, %s720_s28  ;;  %p724_p6 = scmp.lt.u32.totalorder %s720_s28, %s1079_s7 }
 0x2b4   :  { %p726_p7 = pnand %p724_p6, %p721_p5 }
 0x2b6   :  { %729 = shalt.err (!%p726_p7)
}
 0x2b7   :  { %447 = dma.vmem_to_hbm [thread:$0]  %s445_s26, 32, %s1079_s7, [#allocation3]  }
 0x2b8   :  { %730 = dma.done.wait [#allocation3], 32  }
 0x2b9   :  { %731 = vsyncadd [#allocation3], 4294967264 }
 0x2ba   :  { %451 = vsyncpa [#allocation3], 1 }

</bundles_post_ra>
